<compile_context>
chip_gen: v7x
topology: tpu7x:2x2x1
jax: 0.10.0
libtpu: 0.0.40
codegen_flags: <defaults>
</compile_context>

<pallas_src>
import jax
import jax.numpy as jnp
from jax.experimental import pallas as pl
from jax.experimental.pallas import tpu as pltpu

# ----------------------------- configuration -------------------------------
N = 2            # batch size
H = W = 16       # spatial size
C_IN = 3         # channels after the "tile to 3 channels" transform
HIDDEN = 32      # backbone feature dim  (== base_encoder.fc.weight.shape[1])
MLP_DIM = 32     # MLP hidden dim (module default 2048; small synthetic size)
DIM = 16         # output feature dim
M_MOM = 0.999    # momentum coefficient
T = 1.0          # softmax temperature
BN_EPS = 1e-5
KH = KW = 3
K_RAW = KH * KW * C_IN       # 27
K_PAD = 32                   # contraction dim zero-padded for alignment

# Block-diagonal average-pool matrix: (2N, 2N*H*W), row i averages image i's
# H*W rows of the conv activation.  Constant; bf16 so the pool runs on MXU.
_rows = jnp.arange(2 * N, dtype=jnp.int32)[:, None]
_cols = jnp.arange(2 * N * H * W, dtype=jnp.int32)[None, :]
POOL_MAT = jnp.where((_cols // (H * W)) == _rows,
                     1.0 / (H * W), 0.0).astype(jnp.bfloat16)


# ------------------------------- fused kernel -------------------------------
def moco_fused_kernel(p_ref, pool_ref,
                      bcw_ref, bw1_ref, bg1_ref, bb1_ref, bw2_ref,
                      mcw_ref, mw1_ref, mg1_ref, mb1_ref, mw2_ref,
                      pw1_ref, pg1_ref, pb1_ref, pw2_ref,
                      loss_ref):
    """Conv+ReLU+pool (both views, both encoders) -> MLP heads -> loss."""
    patches = p_ref[...]      # (2N*H*W, K_PAD) bf16, rows [0:NHW)=view1
    pool = pool_ref[...]      # (2N, 2N*H*W)    bf16

    def backbone(cw):
        # im2col conv as MXU matmul, ReLU, then global average pool as a
        # second MXU matmul (keeps the reduction off the XLU).
        h = jnp.dot(patches, cw, preferred_element_type=jnp.float32)
        h = jnp.maximum(h, 0.0).astype(jnp.bfloat16)
        return jnp.dot(pool, h, preferred_element_type=jnp.float32)  # (2N, HIDDEN) f32

    def mlp(x, w1, g1, b1, w2, last_bn):
        # Linear -> BN(affine) -> ReLU -> Linear [-> BN(no affine)]
        # BatchNorm uses training-mode (biased) batch statistics, in f32.
        h = jnp.dot(x.astype(jnp.bfloat16), w1,
                    preferred_element_type=jnp.float32)
        mu = jnp.mean(h, axis=0, keepdims=True)
        var = jnp.mean((h - mu) ** 2, axis=0, keepdims=True)
        h = (h - mu) * jax.lax.rsqrt(var + BN_EPS)
        h = h * g1 + b1
        h = jnp.maximum(h, 0.0)
        y = jnp.dot(h.astype(jnp.bfloat16), w2,
                    preferred_element_type=jnp.float32)
        if last_bn:
            mu2 = jnp.mean(y, axis=0, keepdims=True)
            var2 = jnp.mean((y - mu2) ** 2, axis=0, keepdims=True)
            y = (y - mu2) * jax.lax.rsqrt(var2 + BN_EPS)
        return y

    def ctr(q, k):
        # L2-normalize, q @ k.T / T, cross-entropy vs labels=arange(N), * 2T.
        qn = q / jnp.maximum(jnp.sqrt(jnp.sum(q * q, axis=1, keepdims=True)),
                             1e-12)
        kn = k / jnp.maximum(jnp.sqrt(jnp.sum(k * k, axis=1, keepdims=True)),
                             1e-12)
        logits = jax.lax.dot_general(
            qn, kn, (((1,), (1,)), ((), ())),
            preferred_element_type=jnp.float32) / T
        row_max = jnp.max(logits, axis=1, keepdims=True)
        lse = row_max + jnp.log(
            jnp.sum(jnp.exp(logits - row_max), axis=1, keepdims=True))
        # logits[i, i] computed directly (no iota/where temporaries).
        diag = jnp.sum(qn * kn, axis=1, keepdims=True) / T
        return jnp.mean(lse - diag) * (2.0 * T)

    feat_b = backbone(bcw_ref[...])   # (2N, HIDDEN): rows [0:N)=x1, [N:2N)=x2
    feat_m = backbone(mcw_ref[...])

    bw1, bg1, bb1, bw2 = bw1_ref[...], bg1_ref[...], bb1_ref[...], bw2_ref[...]
    mw1, mg1, mb1, mw2 = mw1_ref[...], mg1_ref[...], mb1_ref[...], mw2_ref[...]
    pw1, pg1, pb1, pw2 = pw1_ref[...], pg1_ref[...], pb1_ref[...], pw2_ref[...]

    # MLP heads run per (encoder, view) so BatchNorm statistics match the
    # reference's separate x1 / x2 forward passes.
    qs, ks = [], []
    for v in range(2):
        fb = feat_b[v * N:(v + 1) * N, :]
        fm = feat_m[v * N:(v + 1) * N, :]
        proj = mlp(fb, bw1, bg1, bb1, bw2, last_bn=True)
        qs.append(mlp(proj, pw1, pg1, pb1, pw2, last_bn=False))
        ks.append(mlp(fm, mw1, mg1, mb1, mw2, last_bn=True))

    loss_ref[0, 0] = ctr(qs[0], ks[1]) + ctr(qs[1], ks[0])


_NUM_INPUTS = 16
_moco_call = pl.pallas_call(
    moco_fused_kernel,
    out_shape=jax.ShapeDtypeStruct((1, 1), jnp.float32),
    in_specs=[pl.BlockSpec(memory_space=pltpu.MemorySpace.VMEM)
              for _ in range(_NUM_INPUTS)],
    out_specs=pl.BlockSpec(memory_space=pltpu.MemorySpace.SMEM),
)


# ------------------------------- JAX glue -----------------------------------
def im2col_views(batch):
    """(N, 2, H, W) -> (2*N*H*W, K_PAD) bf16 3x3 'same' patches, both views.

    Row layout: images ordered [x1 batch, x2 batch]; per image H*W rows;
    patch column order (kh, kw, c).
    """
    x = jnp.concatenate([batch[:, 0], batch[:, 1]], axis=0).astype(jnp.float32)
    x_nhwc = jnp.repeat(x[..., None], C_IN, axis=3)     # tile to 3 channels
    xp = jnp.pad(x_nhwc, ((0, 0), (1, 1), (1, 1), (0, 0)))
    cols = []
    for i in range(KH):
        for j in range(KW):
            cols.append(xp[:, i:i + H, j:j + W, :])
    p = jnp.stack(cols, axis=3)                          # (2N, H, W, 9, C_IN)
    p = p.reshape(2 * N * H * W, K_RAW)
    p = jnp.pad(p, ((0, 0), (0, K_PAD - K_RAW)))
    return p.astype(jnp.bfloat16)


def init_params(key):
    """Parameters stored in kernel-ready layout: matmul weights are (in, out)
    and the conv weight is already flattened to (K_PAD, HIDDEN)."""
    ks = jax.random.split(key, 5)

    def nrm(k, shape, scale=0.2):
        return scale * jax.random.normal(k, shape, dtype=jnp.float32)

    conv_w = jnp.pad(nrm(ks[0], (K_RAW, HIDDEN)),
                     ((0, K_PAD - K_RAW), (0, 0)))
    base = dict(
        conv_w=conv_w,                                   # (K_PAD, HIDDEN)
        fc_w1=nrm(ks[1], (HIDDEN, MLP_DIM)),             # (in, out)
        fc_g1=jnp.ones((1, MLP_DIM), jnp.float32),       # BN weight
        fc_b1=jnp.zeros((1, MLP_DIM), jnp.float32),      # BN bias
        fc_w2=nrm(ks[2], (MLP_DIM, DIM)),
    )
    # param_m.data.copy_(param_b.data)
    momentum = jax.tree_util.tree_map(lambda p: p + 0.0, base)
    predictor = dict(
        w1=nrm(ks[3], (DIM, MLP_DIM)),
        g1=jnp.ones((1, MLP_DIM), jnp.float32),
        b1=jnp.zeros((1, MLP_DIM), jnp.float32),
        w2=nrm(ks[4], (MLP_DIM, DIM)),
    )
    return dict(base=base, momentum=momentum, predictor=predictor)


@jax.jit
def moco_forward(batch, params):
    patches = im2col_views(batch)

    # momentum update: theta_k = m * theta_k + (1 - m) * theta_q  (no_grad);
    # master parameters stay f32, only the matmul copies are cast to bf16.
    momentum = jax.tree_util.tree_map(
        lambda pm, pb: M_MOM * pm + (1.0 - M_MOM) * pb,
        params['momentum'], params['base'])

    base, pred = params['base'], params['predictor']
    bf16 = lambda w: w.astype(jnp.bfloat16)

    loss = _moco_call(
        patches, POOL_MAT,
        bf16(base['conv_w']), bf16(base['fc_w1']),
        base['fc_g1'], base['fc_b1'], bf16(base['fc_w2']),
        bf16(momentum['conv_w']), bf16(momentum['fc_w1']),
        momentum['fc_g1'], momentum['fc_b1'], bf16(momentum['fc_w2']),
        bf16(pred['w1']), pred['g1'], pred['b1'], bf16(pred['w2']),
    )[0, 0]
    return loss, momentum


if __name__ == "__main__":
    key = jax.random.PRNGKey(0)
    k_batch, k_params = jax.random.split(key)
    batch = jax.random.normal(k_batch, (N, 2, H, W), dtype=jnp.float32)
    params = init_params(k_params)
    loss, _ = moco_forward(batch, params)
    jax.block_until_ready(loss)
    assert loss.shape == () and bool(jnp.isfinite(loss))
    print("KERNEL_OK")
</pallas_src>

<mosaic_0001>
module attributes {stable_mosaic.version = 11 : i64} {
  func.func @moco_fused_kernel(%arg0: memref<1024x32xbf16, #tpu.memory_space<vmem>>, %arg1: memref<4x1024xbf16, #tpu.memory_space<vmem>>, %arg2: memref<32x32xbf16, #tpu.memory_space<vmem>>, %arg3: memref<32x32xbf16, #tpu.memory_space<vmem>>, %arg4: memref<1x32xf32, #tpu.memory_space<vmem>>, %arg5: memref<1x32xf32, #tpu.memory_space<vmem>>, %arg6: memref<32x16xbf16, #tpu.memory_space<vmem>>, %arg7: memref<32x32xbf16, #tpu.memory_space<vmem>>, %arg8: memref<32x32xbf16, #tpu.memory_space<vmem>>, %arg9: memref<1x32xf32, #tpu.memory_space<vmem>>, %arg10: memref<1x32xf32, #tpu.memory_space<vmem>>, %arg11: memref<32x16xbf16, #tpu.memory_space<vmem>>, %arg12: memref<16x32xbf16, #tpu.memory_space<vmem>>, %arg13: memref<1x32xf32, #tpu.memory_space<vmem>>, %arg14: memref<1x32xf32, #tpu.memory_space<vmem>>, %arg15: memref<32x16xbf16, #tpu.memory_space<vmem>>, %arg16: memref<1x1xf32, #tpu.memory_space<smem>>) attributes {dimension_semantics = [], scalar_prefetch = 0 : i64, scratch_operands = 0 : i64, tpu.core_type = #tpu.core_type<tc>} {
    %c0 = arith.constant 0 : index
    %c0_0 = arith.constant 0 : index
    %0 = vector.load %arg0[%c0, %c0_0] : memref<1024x32xbf16, #tpu.memory_space<vmem>>, vector<1024x32xbf16>
    %c0_1 = arith.constant 0 : index
    %c0_2 = arith.constant 0 : index
    %1 = vector.load %arg1[%c0_1, %c0_2] : memref<4x1024xbf16, #tpu.memory_space<vmem>>, vector<4x1024xbf16>
    %c0_3 = arith.constant 0 : index
    %c0_4 = arith.constant 0 : index
    %2 = vector.load %arg2[%c0_3, %c0_4] : memref<32x32xbf16, #tpu.memory_space<vmem>>, vector<32x32xbf16>
    %cst = arith.constant dense<0.000000e+00> : vector<1024x32xf32>
    %3 = tpu.matmul %0, %2, %cst {dimension_numbers = #tpu.dot_dimension_numbers<[1], [0], [0], [1], [0, 0, 1, 1], [], []>} : vector<1024x32xbf16>, vector<32x32xbf16>, vector<1024x32xf32> -> vector<1024x32xf32>
    %cst_5 = arith.constant 0.000000e+00 : f32
    %4 = vector.broadcast %cst_5 : f32 to vector<1024x32xf32>
    %5 = arith.maximumf %3, %4 : vector<1024x32xf32>
    %6 = arith.truncf %5 : vector<1024x32xf32> to vector<1024x32xbf16>
    %cst_6 = arith.constant dense<0.000000e+00> : vector<4x32xf32>
    %7 = tpu.matmul %1, %6, %cst_6 {dimension_numbers = #tpu.dot_dimension_numbers<[1], [0], [0], [1], [0, 0, 1, 1], [], []>} : vector<4x1024xbf16>, vector<1024x32xbf16>, vector<4x32xf32> -> vector<4x32xf32>
    %c0_7 = arith.constant 0 : index
    %c0_8 = arith.constant 0 : index
    %8 = vector.load %arg7[%c0_7, %c0_8] : memref<32x32xbf16, #tpu.memory_space<vmem>>, vector<32x32xbf16>
    %cst_9 = arith.constant dense<0.000000e+00> : vector<1024x32xf32>
    %9 = tpu.matmul %0, %8, %cst_9 {dimension_numbers = #tpu.dot_dimension_numbers<[1], [0], [0], [1], [0, 0, 1, 1], [], []>} : vector<1024x32xbf16>, vector<32x32xbf16>, vector<1024x32xf32> -> vector<1024x32xf32>
    %cst_10 = arith.constant 0.000000e+00 : f32
    %10 = vector.broadcast %cst_10 : f32 to vector<1024x32xf32>
    %11 = arith.maximumf %9, %10 : vector<1024x32xf32>
    %12 = arith.truncf %11 : vector<1024x32xf32> to vector<1024x32xbf16>
    %cst_11 = arith.constant dense<0.000000e+00> : vector<4x32xf32>
    %13 = tpu.matmul %1, %12, %cst_11 {dimension_numbers = #tpu.dot_dimension_numbers<[1], [0], [0], [1], [0, 0, 1, 1], [], []>} : vector<4x1024xbf16>, vector<1024x32xbf16>, vector<4x32xf32> -> vector<4x32xf32>
    %c0_12 = arith.constant 0 : index
    %c0_13 = arith.constant 0 : index
    %14 = vector.load %arg3[%c0_12, %c0_13] : memref<32x32xbf16, #tpu.memory_space<vmem>>, vector<32x32xbf16>
    %c0_14 = arith.constant 0 : index
    %c0_15 = arith.constant 0 : index
    %15 = vector.load %arg4[%c0_14, %c0_15] : memref<1x32xf32, #tpu.memory_space<vmem>>, vector<1x32xf32>
    %c0_16 = arith.constant 0 : index
    %c0_17 = arith.constant 0 : index
    %16 = vector.load %arg5[%c0_16, %c0_17] : memref<1x32xf32, #tpu.memory_space<vmem>>, vector<1x32xf32>
    %c0_18 = arith.constant 0 : index
    %c0_19 = arith.constant 0 : index
    %17 = vector.load %arg6[%c0_18, %c0_19] : memref<32x16xbf16, #tpu.memory_space<vmem>>, vector<32x16xbf16>
    %c0_20 = arith.constant 0 : index
    %c0_21 = arith.constant 0 : index
    %18 = vector.load %arg8[%c0_20, %c0_21] : memref<32x32xbf16, #tpu.memory_space<vmem>>, vector<32x32xbf16>
    %c0_22 = arith.constant 0 : index
    %c0_23 = arith.constant 0 : index
    %19 = vector.load %arg9[%c0_22, %c0_23] : memref<1x32xf32, #tpu.memory_space<vmem>>, vector<1x32xf32>
    %c0_24 = arith.constant 0 : index
    %c0_25 = arith.constant 0 : index
    %20 = vector.load %arg10[%c0_24, %c0_25] : memref<1x32xf32, #tpu.memory_space<vmem>>, vector<1x32xf32>
    %c0_26 = arith.constant 0 : index
    %c0_27 = arith.constant 0 : index
    %21 = vector.load %arg11[%c0_26, %c0_27] : memref<32x16xbf16, #tpu.memory_space<vmem>>, vector<32x16xbf16>
    %c0_28 = arith.constant 0 : index
    %c0_29 = arith.constant 0 : index
    %22 = vector.load %arg12[%c0_28, %c0_29] : memref<16x32xbf16, #tpu.memory_space<vmem>>, vector<16x32xbf16>
    %c0_30 = arith.constant 0 : index
    %c0_31 = arith.constant 0 : index
    %23 = vector.load %arg13[%c0_30, %c0_31] : memref<1x32xf32, #tpu.memory_space<vmem>>, vector<1x32xf32>
    %c0_32 = arith.constant 0 : index
    %c0_33 = arith.constant 0 : index
    %24 = vector.load %arg14[%c0_32, %c0_33] : memref<1x32xf32, #tpu.memory_space<vmem>>, vector<1x32xf32>
    %c0_34 = arith.constant 0 : index
    %c0_35 = arith.constant 0 : index
    %25 = vector.load %arg15[%c0_34, %c0_35] : memref<32x16xbf16, #tpu.memory_space<vmem>>, vector<32x16xbf16>
    %26 = vector.extract_strided_slice %7 {offsets = [0, 0], sizes = [2, 32], strides = [1, 1]} : vector<4x32xf32> to vector<2x32xf32>
    %27 = vector.extract_strided_slice %13 {offsets = [0, 0], sizes = [2, 32], strides = [1, 1]} : vector<4x32xf32> to vector<2x32xf32>
    %28 = arith.truncf %26 : vector<2x32xf32> to vector<2x32xbf16>
    %cst_36 = arith.constant dense<0.000000e+00> : vector<2x32xf32>
    %29 = tpu.matmul %28, %14, %cst_36 {dimension_numbers = #tpu.dot_dimension_numbers<[1], [0], [0], [1], [0, 0, 1, 1], [], []>} : vector<2x32xbf16>, vector<32x32xbf16>, vector<2x32xf32> -> vector<2x32xf32>
    %cst_37 = arith.constant dense<0.000000e+00> : vector<32xf32>
    %30 = vector.multi_reduction <add>, %29, %cst_37 [0] : vector<2x32xf32> to vector<32xf32>
    %31 = vector.shape_cast %30 : vector<32xf32> to vector<1x32xf32>
    %cst_38 = arith.constant 2.000000e+00 : f32
    %32 = vector.broadcast %cst_38 : f32 to vector<1x32xf32>
    %33 = arith.divf %31, %32 : vector<1x32xf32>
    %34 = vector.broadcast %33 : vector<1x32xf32> to vector<2x32xf32>
    %35 = arith.subf %29, %34 : vector<2x32xf32>
    %36 = arith.mulf %35, %35 : vector<2x32xf32>
    %cst_39 = arith.constant dense<0.000000e+00> : vector<32xf32>
    %37 = vector.multi_reduction <add>, %36, %cst_39 [0] : vector<2x32xf32> to vector<32xf32>
    %38 = vector.shape_cast %37 : vector<32xf32> to vector<1x32xf32>
    %cst_40 = arith.constant 2.000000e+00 : f32
    %39 = vector.broadcast %cst_40 : f32 to vector<1x32xf32>
    %40 = arith.divf %38, %39 : vector<1x32xf32>
    %41 = vector.broadcast %33 : vector<1x32xf32> to vector<2x32xf32>
    %42 = arith.subf %29, %41 : vector<2x32xf32>
    %cst_41 = arith.constant 9.99999974E-6 : f32
    %43 = vector.broadcast %cst_41 : f32 to vector<1x32xf32>
    %44 = arith.addf %40, %43 : vector<1x32xf32>
    %45 = math.rsqrt %44 : vector<1x32xf32>
    %46 = vector.broadcast %45 : vector<1x32xf32> to vector<2x32xf32>
    %47 = arith.mulf %42, %46 : vector<2x32xf32>
    %48 = vector.broadcast %15 : vector<1x32xf32> to vector<2x32xf32>
    %49 = arith.mulf %47, %48 : vector<2x32xf32>
    %50 = vector.broadcast %16 : vector<1x32xf32> to vector<2x32xf32>
    %51 = arith.addf %49, %50 : vector<2x32xf32>
    %cst_42 = arith.constant 0.000000e+00 : f32
    %52 = vector.broadcast %cst_42 : f32 to vector<2x32xf32>
    %53 = arith.maximumf %51, %52 : vector<2x32xf32>
    %54 = arith.truncf %53 : vector<2x32xf32> to vector<2x32xbf16>
    %cst_43 = arith.constant dense<0.000000e+00> : vector<2x16xf32>
    %55 = tpu.matmul %54, %17, %cst_43 {dimension_numbers = #tpu.dot_dimension_numbers<[1], [0], [0], [1], [0, 0, 1, 1], [], []>} : vector<2x32xbf16>, vector<32x16xbf16>, vector<2x16xf32> -> vector<2x16xf32>
    %cst_44 = arith.constant dense<0.000000e+00> : vector<16xf32>
    %56 = vector.multi_reduction <add>, %55, %cst_44 [0] : vector<2x16xf32> to vector<16xf32>
    %57 = vector.shape_cast %56 : vector<16xf32> to vector<1x16xf32>
    %cst_45 = arith.constant 2.000000e+00 : f32
    %58 = vector.broadcast %cst_45 : f32 to vector<1x16xf32>
    %59 = arith.divf %57, %58 : vector<1x16xf32>
    %60 = vector.broadcast %59 : vector<1x16xf32> to vector<2x16xf32>
    %61 = arith.subf %55, %60 : vector<2x16xf32>
    %62 = arith.mulf %61, %61 : vector<2x16xf32>
    %cst_46 = arith.constant dense<0.000000e+00> : vector<16xf32>
    %63 = vector.multi_reduction <add>, %62, %cst_46 [0] : vector<2x16xf32> to vector<16xf32>
    %64 = vector.shape_cast %63 : vector<16xf32> to vector<1x16xf32>
    %cst_47 = arith.constant 2.000000e+00 : f32
    %65 = vector.broadcast %cst_47 : f32 to vector<1x16xf32>
    %66 = arith.divf %64, %65 : vector<1x16xf32>
    %67 = vector.broadcast %59 : vector<1x16xf32> to vector<2x16xf32>
    %68 = arith.subf %55, %67 : vector<2x16xf32>
    %cst_48 = arith.constant 9.99999974E-6 : f32
    %69 = vector.broadcast %cst_48 : f32 to vector<1x16xf32>
    %70 = arith.addf %66, %69 : vector<1x16xf32>
    %71 = math.rsqrt %70 : vector<1x16xf32>
    %72 = vector.broadcast %71 : vector<1x16xf32> to vector<2x16xf32>
    %73 = arith.mulf %68, %72 : vector<2x16xf32>
    %74 = arith.truncf %73 : vector<2x16xf32> to vector<2x16xbf16>
    %cst_49 = arith.constant dense<0.000000e+00> : vector<2x32xf32>
    %75 = tpu.matmul %74, %22, %cst_49 {dimension_numbers = #tpu.dot_dimension_numbers<[1], [0], [0], [1], [0, 0, 1, 1], [], []>} : vector<2x16xbf16>, vector<16x32xbf16>, vector<2x32xf32> -> vector<2x32xf32>
    %cst_50 = arith.constant dense<0.000000e+00> : vector<32xf32>
    %76 = vector.multi_reduction <add>, %75, %cst_50 [0] : vector<2x32xf32> to vector<32xf32>
    %77 = vector.shape_cast %76 : vector<32xf32> to vector<1x32xf32>
    %cst_51 = arith.constant 2.000000e+00 : f32
    %78 = vector.broadcast %cst_51 : f32 to vector<1x32xf32>
    %79 = arith.divf %77, %78 : vector<1x32xf32>
    %80 = vector.broadcast %79 : vector<1x32xf32> to vector<2x32xf32>
    %81 = arith.subf %75, %80 : vector<2x32xf32>
    %82 = arith.mulf %81, %81 : vector<2x32xf32>
    %cst_52 = arith.constant dense<0.000000e+00> : vector<32xf32>
    %83 = vector.multi_reduction <add>, %82, %cst_52 [0] : vector<2x32xf32> to vector<32xf32>
    %84 = vector.shape_cast %83 : vector<32xf32> to vector<1x32xf32>
    %cst_53 = arith.constant 2.000000e+00 : f32
    %85 = vector.broadcast %cst_53 : f32 to vector<1x32xf32>
    %86 = arith.divf %84, %85 : vector<1x32xf32>
    %87 = vector.broadcast %79 : vector<1x32xf32> to vector<2x32xf32>
    %88 = arith.subf %75, %87 : vector<2x32xf32>
    %cst_54 = arith.constant 9.99999974E-6 : f32
    %89 = vector.broadcast %cst_54 : f32 to vector<1x32xf32>
    %90 = arith.addf %86, %89 : vector<1x32xf32>
    %91 = math.rsqrt %90 : vector<1x32xf32>
    %92 = vector.broadcast %91 : vector<1x32xf32> to vector<2x32xf32>
    %93 = arith.mulf %88, %92 : vector<2x32xf32>
    %94 = vector.broadcast %23 : vector<1x32xf32> to vector<2x32xf32>
    %95 = arith.mulf %93, %94 : vector<2x32xf32>
    %96 = vector.broadcast %24 : vector<1x32xf32> to vector<2x32xf32>
    %97 = arith.addf %95, %96 : vector<2x32xf32>
    %cst_55 = arith.constant 0.000000e+00 : f32
    %98 = vector.broadcast %cst_55 : f32 to vector<2x32xf32>
    %99 = arith.maximumf %97, %98 : vector<2x32xf32>
    %100 = arith.truncf %99 : vector<2x32xf32> to vector<2x32xbf16>
    %cst_56 = arith.constant dense<0.000000e+00> : vector<2x16xf32>
    %101 = tpu.matmul %100, %25, %cst_56 {dimension_numbers = #tpu.dot_dimension_numbers<[1], [0], [0], [1], [0, 0, 1, 1], [], []>} : vector<2x32xbf16>, vector<32x16xbf16>, vector<2x16xf32> -> vector<2x16xf32>
    %102 = arith.truncf %27 : vector<2x32xf32> to vector<2x32xbf16>
    %cst_57 = arith.constant dense<0.000000e+00> : vector<2x32xf32>
    %103 = tpu.matmul %102, %18, %cst_57 {dimension_numbers = #tpu.dot_dimension_numbers<[1], [0], [0], [1], [0, 0, 1, 1], [], []>} : vector<2x32xbf16>, vector<32x32xbf16>, vector<2x32xf32> -> vector<2x32xf32>
    %cst_58 = arith.constant dense<0.000000e+00> : vector<32xf32>
    %104 = vector.multi_reduction <add>, %103, %cst_58 [0] : vector<2x32xf32> to vector<32xf32>
    %105 = vector.shape_cast %104 : vector<32xf32> to vector<1x32xf32>
    %cst_59 = arith.constant 2.000000e+00 : f32
    %106 = vector.broadcast %cst_59 : f32 to vector<1x32xf32>
    %107 = arith.divf %105, %106 : vector<1x32xf32>
    %108 = vector.broadcast %107 : vector<1x32xf32> to vector<2x32xf32>
    %109 = arith.subf %103, %108 : vector<2x32xf32>
    %110 = arith.mulf %109, %109 : vector<2x32xf32>
    %cst_60 = arith.constant dense<0.000000e+00> : vector<32xf32>
    %111 = vector.multi_reduction <add>, %110, %cst_60 [0] : vector<2x32xf32> to vector<32xf32>
    %112 = vector.shape_cast %111 : vector<32xf32> to vector<1x32xf32>
    %cst_61 = arith.constant 2.000000e+00 : f32
    %113 = vector.broadcast %cst_61 : f32 to vector<1x32xf32>
    %114 = arith.divf %112, %113 : vector<1x32xf32>
    %115 = vector.broadcast %107 : vector<1x32xf32> to vector<2x32xf32>
    %116 = arith.subf %103, %115 : vector<2x32xf32>
    %cst_62 = arith.constant 9.99999974E-6 : f32
    %117 = vector.broadcast %cst_62 : f32 to vector<1x32xf32>
    %118 = arith.addf %114, %117 : vector<1x32xf32>
    %119 = math.rsqrt %118 : vector<1x32xf32>
    %120 = vector.broadcast %119 : vector<1x32xf32> to vector<2x32xf32>
    %121 = arith.mulf %116, %120 : vector<2x32xf32>
    %122 = vector.broadcast %19 : vector<1x32xf32> to vector<2x32xf32>
    %123 = arith.mulf %121, %122 : vector<2x32xf32>
    %124 = vector.broadcast %20 : vector<1x32xf32> to vector<2x32xf32>
    %125 = arith.addf %123, %124 : vector<2x32xf32>
    %cst_63 = arith.constant 0.000000e+00 : f32
    %126 = vector.broadcast %cst_63 : f32 to vector<2x32xf32>
    %127 = arith.maximumf %125, %126 : vector<2x32xf32>
    %128 = arith.truncf %127 : vector<2x32xf32> to vector<2x32xbf16>
    %cst_64 = arith.constant dense<0.000000e+00> : vector<2x16xf32>
    %129 = tpu.matmul %128, %21, %cst_64 {dimension_numbers = #tpu.dot_dimension_numbers<[1], [0], [0], [1], [0, 0, 1, 1], [], []>} : vector<2x32xbf16>, vector<32x16xbf16>, vector<2x16xf32> -> vector<2x16xf32>
    %cst_65 = arith.constant dense<0.000000e+00> : vector<16xf32>
    %130 = vector.multi_reduction <add>, %129, %cst_65 [0] : vector<2x16xf32> to vector<16xf32>
    %131 = vector.shape_cast %130 : vector<16xf32> to vector<1x16xf32>
    %cst_66 = arith.constant 2.000000e+00 : f32
    %132 = vector.broadcast %cst_66 : f32 to vector<1x16xf32>
    %133 = arith.divf %131, %132 : vector<1x16xf32>
    %134 = vector.broadcast %133 : vector<1x16xf32> to vector<2x16xf32>
    %135 = arith.subf %129, %134 : vector<2x16xf32>
    %136 = arith.mulf %135, %135 : vector<2x16xf32>
    %cst_67 = arith.constant dense<0.000000e+00> : vector<16xf32>
    %137 = vector.multi_reduction <add>, %136, %cst_67 [0] : vector<2x16xf32> to vector<16xf32>
    %138 = vector.shape_cast %137 : vector<16xf32> to vector<1x16xf32>
    %cst_68 = arith.constant 2.000000e+00 : f32
    %139 = vector.broadcast %cst_68 : f32 to vector<1x16xf32>
    %140 = arith.divf %138, %139 : vector<1x16xf32>
    %141 = vector.broadcast %133 : vector<1x16xf32> to vector<2x16xf32>
    %142 = arith.subf %129, %141 : vector<2x16xf32>
    %cst_69 = arith.constant 9.99999974E-6 : f32
    %143 = vector.broadcast %cst_69 : f32 to vector<1x16xf32>
    %144 = arith.addf %140, %143 : vector<1x16xf32>
    %145 = math.rsqrt %144 : vector<1x16xf32>
    %146 = vector.broadcast %145 : vector<1x16xf32> to vector<2x16xf32>
    %147 = arith.mulf %142, %146 : vector<2x16xf32>
    %148 = vector.extract_strided_slice %7 {offsets = [2, 0], sizes = [2, 32], strides = [1, 1]} : vector<4x32xf32> to vector<2x32xf32>
    %149 = vector.extract_strided_slice %13 {offsets = [2, 0], sizes = [2, 32], strides = [1, 1]} : vector<4x32xf32> to vector<2x32xf32>
    %150 = arith.truncf %148 : vector<2x32xf32> to vector<2x32xbf16>
    %cst_70 = arith.constant dense<0.000000e+00> : vector<2x32xf32>
    %151 = tpu.matmul %150, %14, %cst_70 {dimension_numbers = #tpu.dot_dimension_numbers<[1], [0], [0], [1], [0, 0, 1, 1], [], []>} : vector<2x32xbf16>, vector<32x32xbf16>, vector<2x32xf32> -> vector<2x32xf32>
    %cst_71 = arith.constant dense<0.000000e+00> : vector<32xf32>
    %152 = vector.multi_reduction <add>, %151, %cst_71 [0] : vector<2x32xf32> to vector<32xf32>
    %153 = vector.shape_cast %152 : vector<32xf32> to vector<1x32xf32>
    %cst_72 = arith.constant 2.000000e+00 : f32
    %154 = vector.broadcast %cst_72 : f32 to vector<1x32xf32>
    %155 = arith.divf %153, %154 : vector<1x32xf32>
    %156 = vector.broadcast %155 : vector<1x32xf32> to vector<2x32xf32>
    %157 = arith.subf %151, %156 : vector<2x32xf32>
    %158 = arith.mulf %157, %157 : vector<2x32xf32>
    %cst_73 = arith.constant dense<0.000000e+00> : vector<32xf32>
    %159 = vector.multi_reduction <add>, %158, %cst_73 [0] : vector<2x32xf32> to vector<32xf32>
    %160 = vector.shape_cast %159 : vector<32xf32> to vector<1x32xf32>
    %cst_74 = arith.constant 2.000000e+00 : f32
    %161 = vector.broadcast %cst_74 : f32 to vector<1x32xf32>
    %162 = arith.divf %160, %161 : vector<1x32xf32>
    %163 = vector.broadcast %155 : vector<1x32xf32> to vector<2x32xf32>
    %164 = arith.subf %151, %163 : vector<2x32xf32>
    %cst_75 = arith.constant 9.99999974E-6 : f32
    %165 = vector.broadcast %cst_75 : f32 to vector<1x32xf32>
    %166 = arith.addf %162, %165 : vector<1x32xf32>
    %167 = math.rsqrt %166 : vector<1x32xf32>
    %168 = vector.broadcast %167 : vector<1x32xf32> to vector<2x32xf32>
    %169 = arith.mulf %164, %168 : vector<2x32xf32>
    %170 = vector.broadcast %15 : vector<1x32xf32> to vector<2x32xf32>
    %171 = arith.mulf %169, %170 : vector<2x32xf32>
    %172 = vector.broadcast %16 : vector<1x32xf32> to vector<2x32xf32>
    %173 = arith.addf %171, %172 : vector<2x32xf32>
    %cst_76 = arith.constant 0.000000e+00 : f32
    %174 = vector.broadcast %cst_76 : f32 to vector<2x32xf32>
    %175 = arith.maximumf %173, %174 : vector<2x32xf32>
    %176 = arith.truncf %175 : vector<2x32xf32> to vector<2x32xbf16>
    %cst_77 = arith.constant dense<0.000000e+00> : vector<2x16xf32>
    %177 = tpu.matmul %176, %17, %cst_77 {dimension_numbers = #tpu.dot_dimension_numbers<[1], [0], [0], [1], [0, 0, 1, 1], [], []>} : vector<2x32xbf16>, vector<32x16xbf16>, vector<2x16xf32> -> vector<2x16xf32>
    %cst_78 = arith.constant dense<0.000000e+00> : vector<16xf32>
    %178 = vector.multi_reduction <add>, %177, %cst_78 [0] : vector<2x16xf32> to vector<16xf32>
    %179 = vector.shape_cast %178 : vector<16xf32> to vector<1x16xf32>
    %cst_79 = arith.constant 2.000000e+00 : f32
    %180 = vector.broadcast %cst_79 : f32 to vector<1x16xf32>
    %181 = arith.divf %179, %180 : vector<1x16xf32>
    %182 = vector.broadcast %181 : vector<1x16xf32> to vector<2x16xf32>
    %183 = arith.subf %177, %182 : vector<2x16xf32>
    %184 = arith.mulf %183, %183 : vector<2x16xf32>
    %cst_80 = arith.constant dense<0.000000e+00> : vector<16xf32>
    %185 = vector.multi_reduction <add>, %184, %cst_80 [0] : vector<2x16xf32> to vector<16xf32>
    %186 = vector.shape_cast %185 : vector<16xf32> to vector<1x16xf32>
    %cst_81 = arith.constant 2.000000e+00 : f32
    %187 = vector.broadcast %cst_81 : f32 to vector<1x16xf32>
    %188 = arith.divf %186, %187 : vector<1x16xf32>
    %189 = vector.broadcast %181 : vector<1x16xf32> to vector<2x16xf32>
    %190 = arith.subf %177, %189 : vector<2x16xf32>
    %cst_82 = arith.constant 9.99999974E-6 : f32
    %191 = vector.broadcast %cst_82 : f32 to vector<1x16xf32>
    %192 = arith.addf %188, %191 : vector<1x16xf32>
    %193 = math.rsqrt %192 : vector<1x16xf32>
    %194 = vector.broadcast %193 : vector<1x16xf32> to vector<2x16xf32>
    %195 = arith.mulf %190, %194 : vector<2x16xf32>
    %196 = arith.truncf %195 : vector<2x16xf32> to vector<2x16xbf16>
    %cst_83 = arith.constant dense<0.000000e+00> : vector<2x32xf32>
    %197 = tpu.matmul %196, %22, %cst_83 {dimension_numbers = #tpu.dot_dimension_numbers<[1], [0], [0], [1], [0, 0, 1, 1], [], []>} : vector<2x16xbf16>, vector<16x32xbf16>, vector<2x32xf32> -> vector<2x32xf32>
    %cst_84 = arith.constant dense<0.000000e+00> : vector<32xf32>
    %198 = vector.multi_reduction <add>, %197, %cst_84 [0] : vector<2x32xf32> to vector<32xf32>
    %199 = vector.shape_cast %198 : vector<32xf32> to vector<1x32xf32>
    %cst_85 = arith.constant 2.000000e+00 : f32
    %200 = vector.broadcast %cst_85 : f32 to vector<1x32xf32>
    %201 = arith.divf %199, %200 : vector<1x32xf32>
    %202 = vector.broadcast %201 : vector<1x32xf32> to vector<2x32xf32>
    %203 = arith.subf %197, %202 : vector<2x32xf32>
    %204 = arith.mulf %203, %203 : vector<2x32xf32>
    %cst_86 = arith.constant dense<0.000000e+00> : vector<32xf32>
    %205 = vector.multi_reduction <add>, %204, %cst_86 [0] : vector<2x32xf32> to vector<32xf32>
    %206 = vector.shape_cast %205 : vector<32xf32> to vector<1x32xf32>
    %cst_87 = arith.constant 2.000000e+00 : f32
    %207 = vector.broadcast %cst_87 : f32 to vector<1x32xf32>
    %208 = arith.divf %206, %207 : vector<1x32xf32>
    %209 = vector.broadcast %201 : vector<1x32xf32> to vector<2x32xf32>
    %210 = arith.subf %197, %209 : vector<2x32xf32>
    %cst_88 = arith.constant 9.99999974E-6 : f32
    %211 = vector.broadcast %cst_88 : f32 to vector<1x32xf32>
    %212 = arith.addf %208, %211 : vector<1x32xf32>
    %213 = math.rsqrt %212 : vector<1x32xf32>
    %214 = vector.broadcast %213 : vector<1x32xf32> to vector<2x32xf32>
    %215 = arith.mulf %210, %214 : vector<2x32xf32>
    %216 = vector.broadcast %23 : vector<1x32xf32> to vector<2x32xf32>
    %217 = arith.mulf %215, %216 : vector<2x32xf32>
    %218 = vector.broadcast %24 : vector<1x32xf32> to vector<2x32xf32>
    %219 = arith.addf %217, %218 : vector<2x32xf32>
    %cst_89 = arith.constant 0.000000e+00 : f32
    %220 = vector.broadcast %cst_89 : f32 to vector<2x32xf32>
    %221 = arith.maximumf %219, %220 : vector<2x32xf32>
    %222 = arith.truncf %221 : vector<2x32xf32> to vector<2x32xbf16>
    %cst_90 = arith.constant dense<0.000000e+00> : vector<2x16xf32>
    %223 = tpu.matmul %222, %25, %cst_90 {dimension_numbers = #tpu.dot_dimension_numbers<[1], [0], [0], [1], [0, 0, 1, 1], [], []>} : vector<2x32xbf16>, vector<32x16xbf16>, vector<2x16xf32> -> vector<2x16xf32>
    %224 = arith.truncf %149 : vector<2x32xf32> to vector<2x32xbf16>
    %cst_91 = arith.constant dense<0.000000e+00> : vector<2x32xf32>
    %225 = tpu.matmul %224, %18, %cst_91 {dimension_numbers = #tpu.dot_dimension_numbers<[1], [0], [0], [1], [0, 0, 1, 1], [], []>} : vector<2x32xbf16>, vector<32x32xbf16>, vector<2x32xf32> -> vector<2x32xf32>
    %cst_92 = arith.constant dense<0.000000e+00> : vector<32xf32>
    %226 = vector.multi_reduction <add>, %225, %cst_92 [0] : vector<2x32xf32> to vector<32xf32>
    %227 = vector.shape_cast %226 : vector<32xf32> to vector<1x32xf32>
    %cst_93 = arith.constant 2.000000e+00 : f32
    %228 = vector.broadcast %cst_93 : f32 to vector<1x32xf32>
    %229 = arith.divf %227, %228 : vector<1x32xf32>
    %230 = vector.broadcast %229 : vector<1x32xf32> to vector<2x32xf32>
    %231 = arith.subf %225, %230 : vector<2x32xf32>
    %232 = arith.mulf %231, %231 : vector<2x32xf32>
    %cst_94 = arith.constant dense<0.000000e+00> : vector<32xf32>
    %233 = vector.multi_reduction <add>, %232, %cst_94 [0] : vector<2x32xf32> to vector<32xf32>
    %234 = vector.shape_cast %233 : vector<32xf32> to vector<1x32xf32>
    %cst_95 = arith.constant 2.000000e+00 : f32
    %235 = vector.broadcast %cst_95 : f32 to vector<1x32xf32>
    %236 = arith.divf %234, %235 : vector<1x32xf32>
    %237 = vector.broadcast %229 : vector<1x32xf32> to vector<2x32xf32>
    %238 = arith.subf %225, %237 : vector<2x32xf32>
    %cst_96 = arith.constant 9.99999974E-6 : f32
    %239 = vector.broadcast %cst_96 : f32 to vector<1x32xf32>
    %240 = arith.addf %236, %239 : vector<1x32xf32>
    %241 = math.rsqrt %240 : vector<1x32xf32>
    %242 = vector.broadcast %241 : vector<1x32xf32> to vector<2x32xf32>
    %243 = arith.mulf %238, %242 : vector<2x32xf32>
    %244 = vector.broadcast %19 : vector<1x32xf32> to vector<2x32xf32>
    %245 = arith.mulf %243, %244 : vector<2x32xf32>
    %246 = vector.broadcast %20 : vector<1x32xf32> to vector<2x32xf32>
    %247 = arith.addf %245, %246 : vector<2x32xf32>
    %cst_97 = arith.constant 0.000000e+00 : f32
    %248 = vector.broadcast %cst_97 : f32 to vector<2x32xf32>
    %249 = arith.maximumf %247, %248 : vector<2x32xf32>
    %250 = arith.truncf %249 : vector<2x32xf32> to vector<2x32xbf16>
    %cst_98 = arith.constant dense<0.000000e+00> : vector<2x16xf32>
    %251 = tpu.matmul %250, %21, %cst_98 {dimension_numbers = #tpu.dot_dimension_numbers<[1], [0], [0], [1], [0, 0, 1, 1], [], []>} : vector<2x32xbf16>, vector<32x16xbf16>, vector<2x16xf32> -> vector<2x16xf32>
    %cst_99 = arith.constant dense<0.000000e+00> : vector<16xf32>
    %252 = vector.multi_reduction <add>, %251, %cst_99 [0] : vector<2x16xf32> to vector<16xf32>
    %253 = vector.shape_cast %252 : vector<16xf32> to vector<1x16xf32>
    %cst_100 = arith.constant 2.000000e+00 : f32
    %254 = vector.broadcast %cst_100 : f32 to vector<1x16xf32>
    %255 = arith.divf %253, %254 : vector<1x16xf32>
    %256 = vector.broadcast %255 : vector<1x16xf32> to vector<2x16xf32>
    %257 = arith.subf %251, %256 : vector<2x16xf32>
    %258 = arith.mulf %257, %257 : vector<2x16xf32>
    %cst_101 = arith.constant dense<0.000000e+00> : vector<16xf32>
    %259 = vector.multi_reduction <add>, %258, %cst_101 [0] : vector<2x16xf32> to vector<16xf32>
    %260 = vector.shape_cast %259 : vector<16xf32> to vector<1x16xf32>
    %cst_102 = arith.constant 2.000000e+00 : f32
    %261 = vector.broadcast %cst_102 : f32 to vector<1x16xf32>
    %262 = arith.divf %260, %261 : vector<1x16xf32>
    %263 = vector.broadcast %255 : vector<1x16xf32> to vector<2x16xf32>
    %264 = arith.subf %251, %263 : vector<2x16xf32>
    %cst_103 = arith.constant 9.99999974E-6 : f32
    %265 = vector.broadcast %cst_103 : f32 to vector<1x16xf32>
    %266 = arith.addf %262, %265 : vector<1x16xf32>
    %267 = math.rsqrt %266 : vector<1x16xf32>
    %268 = vector.broadcast %267 : vector<1x16xf32> to vector<2x16xf32>
    %269 = arith.mulf %264, %268 : vector<2x16xf32>
    %270 = arith.mulf %101, %101 : vector<2x16xf32>
    %cst_104 = arith.constant dense<0.000000e+00> : vector<2xf32>
    %271 = vector.multi_reduction <add>, %270, %cst_104 [1] : vector<2x16xf32> to vector<2xf32>
    %272 = vector.shape_cast %271 : vector<2xf32> to vector<2x1xf32>
    %273 = math.sqrt %272 : vector<2x1xf32>
    %cst_105 = arith.constant 9.99999996E-13 : f32
    %274 = vector.broadcast %cst_105 : f32 to vector<2x1xf32>
    %275 = arith.maximumf %273, %274 : vector<2x1xf32>
    %276 = vector.broadcast %275 : vector<2x1xf32> to vector<2x16xf32>
    %277 = arith.divf %101, %276 : vector<2x16xf32>
    %278 = arith.mulf %269, %269 : vector<2x16xf32>
    %cst_106 = arith.constant dense<0.000000e+00> : vector<2xf32>
    %279 = vector.multi_reduction <add>, %278, %cst_106 [1] : vector<2x16xf32> to vector<2xf32>
    %280 = vector.shape_cast %279 : vector<2xf32> to vector<2x1xf32>
    %281 = math.sqrt %280 : vector<2x1xf32>
    %cst_107 = arith.constant 9.99999996E-13 : f32
    %282 = vector.broadcast %cst_107 : f32 to vector<2x1xf32>
    %283 = arith.maximumf %281, %282 : vector<2x1xf32>
    %284 = vector.broadcast %283 : vector<2x1xf32> to vector<2x16xf32>
    %285 = arith.divf %269, %284 : vector<2x16xf32>
    %cst_108 = arith.constant dense<0.000000e+00> : vector<2x2xf32>
    %286 = tpu.matmul %277, %285, %cst_108 {dimension_numbers = #tpu.dot_dimension_numbers<[1], [1], [0], [0], [0, 0, 1, 0], [], []>} : vector<2x16xf32>, vector<2x16xf32>, vector<2x2xf32> -> vector<2x2xf32>
    %cst_109 = arith.constant 1.000000e+00 : f32
    %287 = vector.broadcast %cst_109 : f32 to vector<2x2xf32>
    %288 = arith.divf %286, %287 : vector<2x2xf32>
    %cst_110 = arith.constant dense<0xFF800000> : vector<2xf32>
    %289 = vector.multi_reduction <maximumf>, %288, %cst_110 [1] : vector<2x2xf32> to vector<2xf32>
    %290 = vector.shape_cast %289 : vector<2xf32> to vector<2x1xf32>
    %291 = vector.broadcast %290 : vector<2x1xf32> to vector<2x2xf32>
    %292 = arith.subf %288, %291 : vector<2x2xf32>
    %293 = math.exp %292 : vector<2x2xf32>
    %cst_111 = arith.constant dense<0.000000e+00> : vector<2xf32>
    %294 = vector.multi_reduction <add>, %293, %cst_111 [1] : vector<2x2xf32> to vector<2xf32>
    %295 = vector.shape_cast %294 : vector<2xf32> to vector<2x1xf32>
    %296 = math.log %295 : vector<2x1xf32>
    %297 = arith.addf %290, %296 : vector<2x1xf32>
    %298 = arith.mulf %277, %285 : vector<2x16xf32>
    %cst_112 = arith.constant dense<0.000000e+00> : vector<2xf32>
    %299 = vector.multi_reduction <add>, %298, %cst_112 [1] : vector<2x16xf32> to vector<2xf32>
    %300 = vector.shape_cast %299 : vector<2xf32> to vector<2x1xf32>
    %cst_113 = arith.constant 1.000000e+00 : f32
    %301 = vector.broadcast %cst_113 : f32 to vector<2x1xf32>
    %302 = arith.divf %300, %301 : vector<2x1xf32>
    %303 = arith.subf %297, %302 : vector<2x1xf32>
    %304 = vector.shape_cast %303 : vector<2x1xf32> to vector<1x2x1xf32>
    %cst_114 = arith.constant dense<0.000000e+00> : vector<1xf32>
    %305 = vector.multi_reduction <add>, %304, %cst_114 [1, 2] : vector<1x2x1xf32> to vector<1xf32>
    %306 = vector.shape_cast %305 : vector<1xf32> to vector<1x1x1xf32>
    %307 = vector.extract %306[0, 0, 0] : f32 from vector<1x1x1xf32>
    %cst_115 = arith.constant 2.000000e+00 : f32
    %308 = arith.divf %307, %cst_115 : f32
    %cst_116 = arith.constant 2.000000e+00 : f32
    %309 = arith.mulf %308, %cst_116 : f32
    %310 = arith.mulf %223, %223 : vector<2x16xf32>
    %cst_117 = arith.constant dense<0.000000e+00> : vector<2xf32>
    %311 = vector.multi_reduction <add>, %310, %cst_117 [1] : vector<2x16xf32> to vector<2xf32>
    %312 = vector.shape_cast %311 : vector<2xf32> to vector<2x1xf32>
    %313 = math.sqrt %312 : vector<2x1xf32>
    %cst_118 = arith.constant 9.99999996E-13 : f32
    %314 = vector.broadcast %cst_118 : f32 to vector<2x1xf32>
    %315 = arith.maximumf %313, %314 : vector<2x1xf32>
    %316 = vector.broadcast %315 : vector<2x1xf32> to vector<2x16xf32>
    %317 = arith.divf %223, %316 : vector<2x16xf32>
    %318 = arith.mulf %147, %147 : vector<2x16xf32>
    %cst_119 = arith.constant dense<0.000000e+00> : vector<2xf32>
    %319 = vector.multi_reduction <add>, %318, %cst_119 [1] : vector<2x16xf32> to vector<2xf32>
    %320 = vector.shape_cast %319 : vector<2xf32> to vector<2x1xf32>
    %321 = math.sqrt %320 : vector<2x1xf32>
    %cst_120 = arith.constant 9.99999996E-13 : f32
    %322 = vector.broadcast %cst_120 : f32 to vector<2x1xf32>
    %323 = arith.maximumf %321, %322 : vector<2x1xf32>
    %324 = vector.broadcast %323 : vector<2x1xf32> to vector<2x16xf32>
    %325 = arith.divf %147, %324 : vector<2x16xf32>
    %cst_121 = arith.constant dense<0.000000e+00> : vector<2x2xf32>
    %326 = tpu.matmul %317, %325, %cst_121 {dimension_numbers = #tpu.dot_dimension_numbers<[1], [1], [0], [0], [0, 0, 1, 0], [], []>} : vector<2x16xf32>, vector<2x16xf32>, vector<2x2xf32> -> vector<2x2xf32>
    %cst_122 = arith.constant 1.000000e+00 : f32
    %327 = vector.broadcast %cst_122 : f32 to vector<2x2xf32>
    %328 = arith.divf %326, %327 : vector<2x2xf32>
    %cst_123 = arith.constant dense<0xFF800000> : vector<2xf32>
    %329 = vector.multi_reduction <maximumf>, %328, %cst_123 [1] : vector<2x2xf32> to vector<2xf32>
    %330 = vector.shape_cast %329 : vector<2xf32> to vector<2x1xf32>
    %331 = vector.broadcast %330 : vector<2x1xf32> to vector<2x2xf32>
    %332 = arith.subf %328, %331 : vector<2x2xf32>
    %333 = math.exp %332 : vector<2x2xf32>
    %cst_124 = arith.constant dense<0.000000e+00> : vector<2xf32>
    %334 = vector.multi_reduction <add>, %333, %cst_124 [1] : vector<2x2xf32> to vector<2xf32>
    %335 = vector.shape_cast %334 : vector<2xf32> to vector<2x1xf32>
    %336 = math.log %335 : vector<2x1xf32>
    %337 = arith.addf %330, %336 : vector<2x1xf32>
    %338 = arith.mulf %317, %325 : vector<2x16xf32>
    %cst_125 = arith.constant dense<0.000000e+00> : vector<2xf32>
    %339 = vector.multi_reduction <add>, %338, %cst_125 [1] : vector<2x16xf32> to vector<2xf32>
    %340 = vector.shape_cast %339 : vector<2xf32> to vector<2x1xf32>
    %cst_126 = arith.constant 1.000000e+00 : f32
    %341 = vector.broadcast %cst_126 : f32 to vector<2x1xf32>
    %342 = arith.divf %340, %341 : vector<2x1xf32>
    %343 = arith.subf %337, %342 : vector<2x1xf32>
    %344 = vector.shape_cast %343 : vector<2x1xf32> to vector<1x2x1xf32>
    %cst_127 = arith.constant dense<0.000000e+00> : vector<1xf32>
    %345 = vector.multi_reduction <add>, %344, %cst_127 [1, 2] : vector<1x2x1xf32> to vector<1xf32>
    %346 = vector.shape_cast %345 : vector<1xf32> to vector<1x1x1xf32>
    %347 = vector.extract %346[0, 0, 0] : f32 from vector<1x1x1xf32>
    %cst_128 = arith.constant 2.000000e+00 : f32
    %348 = arith.divf %347, %cst_128 : f32
    %cst_129 = arith.constant 2.000000e+00 : f32
    %349 = arith.mulf %348, %cst_129 : f32
    %350 = arith.addf %309, %349 : f32
    %c0_130 = arith.constant 0 : index
    %c0_131 = arith.constant 0 : index
    %351 = memref.load %arg16[%c0_130, %c0_131] : memref<1x1xf32, #tpu.memory_space<smem>>
    memref.store %350, %arg16[%c0_130, %c0_131] : memref<1x1xf32, #tpu.memory_space<smem>>
    return
  }
}

</mosaic_0001>

<bundles_post_ra>
// kernel: moco_forward.1
= control target key start
LH: loop header
LB: loop body
LE: loop exit
PB: predicated region body
PF: predicated region fallthrough
CT: control target
= control target key end

     0   :  { %s5849_s0 = inlined_call_operand.vmem [shape: bf16[1024,32], index: 0, kind: input, shape index: {}]   ;;  %s5850_s1 = inlined_call_operand.vmem [shape: bf16[4,1024], index: 1, kind: input, shape index: {}]   ;;  %s5851_s2 = inlined_call_operand.vmem [shape: bf16[32,32], index: 2, kind: input, shape index: {}]   ;;  %s5852_s3 = inlined_call_operand.vmem [shape: bf16[32,32], index: 3, kind: input, shape index: {}]   ;;  %s5853_s4 = inlined_call_operand.vmem [shape: f32[1,32], index: 4, kind: input, shape index: {}]   ;;  %s5854_s5 = inlined_call_operand.vmem [shape: f32[1,32], index: 5, kind: input, shape index: {}]   ;;  %s5855_s6 = inlined_call_operand.vmem [shape: bf16[32,16], index: 6, kind: input, shape index: {}]   ;;  %s5856_s7 = inlined_call_operand.vmem [shape: bf16[32,32], index: 7, kind: input, shape index: {}]   ;;  %s5857_s8 = inlined_call_operand.vmem [shape: bf16[32,32], index: 8, kind: input, shape index: {}]   ;;  %s5858_s9 = inlined_call_operand.vmem [shape: f32[1,32], index: 9, kind: input, shape index: {}]   ;;  %s5859_s10 = inlined_call_operand.vmem [shape: f32[1,32], index: 10, kind: input, shape index: {}]   ;;  %s5860_s11 = inlined_call_operand.vmem [shape: bf16[32,16], index: 11, kind: input, shape index: {}]   ;;  %s5861_s12 = inlined_call_operand.vmem [shape: bf16[16,32], index: 12, kind: input, shape index: {}]   ;;  %s5862_s13 = inlined_call_operand.vmem [shape: f32[1,32], index: 13, kind: input, shape index: {}]   ;;  %s5863_s14 = inlined_call_operand.vmem [shape: f32[1,32], index: 14, kind: input, shape index: {}]   ;;  %s5864_s15 = inlined_call_operand.vmem [shape: bf16[32,16], index: 15, kind: input, shape index: {}]   ;;  %s5865_s16 = inlined_call_operand.hbm [shape: f32[1,1], index: 16, kind: output, shape index: {}]  }
   0x1   :  { %5867 = sst [smem:[#allocation5_spill]] %s5849_s0 }
   0x2   :  { %v4697_v0 = vld [vmem:[%s5851_s2] sm:$0xff]   ;;  %v4698_v1 = vld [vmem:[%s5851_s2 + $0x8] sm:$0xff]   ;;  %vm521_vm0 = vcmask 261120   ;;  %s5868_s27 = sld [smem:[#allocation5_spill]] }
   0x3   :  { %4323 = vmatprep.subr.bf16.mxu0 %v4697_v0 }
   0x4   :  { %4324 = vmatpush3.bf16.msra.mxu0 %v4697_v0 }
   0x5   :  { %4325 = vmatprep.subr.bf16.mxu0 %v4698_v1 }
   0x8   :  { %v4699_v2 = vld [vmem:[%s5868_s27] sm:$0xff]   ;;  %v4700_v3 = vld [vmem:[%s5868_s27 + $0x8] sm:$0xff]   ;;  %4326 = vmatpush3.bf16.msra.mxu0 %v4698_v1  ;;  %v4701_v4 = vld [vmem:[%s5868_s27 + $0x10] sm:$0xff]  }
   0x9   :  { %4327 = vmatprep.mubr.msk.bf16.mxu0 %vm521_vm0, %v4699_v2  ;;  %v4702_v5 = vld [vmem:[%s5868_s27 + $0x18] sm:$0xff]   ;;  %v4703_v6 = vld [vmem:[%s5868_s27 + $0x20] sm:$0xff]   ;;  %v4704_v7 = vld [vmem:[%s5868_s27 + $0x28] sm:$0xff]  }
   0xa   :  { %v4705_v8 = vld [vmem:[%s5868_s27 + $0x30] sm:$0xff]   ;;  %v4706_v9 = vld [vmem:[%s5868_s27 + $0x38] sm:$0xff]   ;;  %v4707_v10 = vld [vmem:[%s5868_s27 + $0x40] sm:$0xff]  }
   0xb   :  { %4328 = vmatmul.mubr.msk.bf16.vlgmr.msra.gmra.mrb[0].mxu0 %vm521_vm0, %v4700_v3  ;;  %v4708_v11 = vld [vmem:[%s5868_s27 + $0x48] sm:$0xff]   ;;  %v4709_v12 = vld [vmem:[%s5868_s27 + $0x50] sm:$0xff]   ;;  %v4710_v13 = vld [vmem:[%s5868_s27 + $0x58] sm:$0xff]  }
   0xc   :  { %4331 = vmatprep.mubr.msk.bf16.mxu0 %vm521_vm0, %v4701_v4  ;;  %v4711_v14 = vld [vmem:[%s5868_s27 + $0x60] sm:$0xff]   ;;  %v4712_v15 = vld [vmem:[%s5868_s27 + $0x68] sm:$0xff]   ;;  %v4713_v16 = vld [vmem:[%s5868_s27 + $0x70] sm:$0xff]  }
   0xd   :  { %v4714_v17 = vld [vmem:[%s5868_s27 + $0x78] sm:$0xff]   ;;  %v4715_v18 = vld [vmem:[%s5868_s27 + $0x80] sm:$0xff]   ;;  %v4716_v19 = vld [vmem:[%s5868_s27 + $0x88] sm:$0xff]  }
  0x13   :  { %4332 = vmatmul.mubr.msk.bf16.gmra.mrb[4].mxu0 %vm521_vm0, %v4702_v5 }
  0x14   :  { %4335 = vmatprep.mubr.msk.bf16.mxu0 %vm521_vm0, %v4703_v6 }
  0x1b   :  { %4336 = vmatmul.mubr.msk.bf16.gmra.mrb[8].mxu0 %vm521_vm0, %v4704_v7 }
  0x1c   :  { %4339 = vmatprep.mubr.msk.bf16.mxu0 %vm521_vm0, %v4705_v8 }
  0x23   :  { %4340 = vmatmul.mubr.msk.bf16.gmra.mrb[12].mxu0 %vm521_vm0, %v4706_v9 }
  0x24   :  { %4343 = vmatprep.mubr.msk.bf16.mxu0 %vm521_vm0, %v4707_v10 }
  0x2b   :  { %4344 = vmatmul.mubr.msk.bf16.gmra.mrb[16].mxu0 %vm521_vm0, %v4708_v11 }
  0x2c   :  { %4347 = vmatprep.mubr.msk.bf16.mxu0 %vm521_vm0, %v4709_v12 }
  0x33   :  { %4348 = vmatmul.mubr.msk.bf16.gmra.mrb[20].mxu0 %vm521_vm0, %v4710_v13 }
  0x34   :  { %4351 = vmatprep.mubr.msk.bf16.mxu0 %vm521_vm0, %v4711_v14 }
  0x3b   :  { %4352 = vmatmul.mubr.msk.bf16.gmra.mrb[24].mxu0 %vm521_vm0, %v4712_v15 }
  0x3c   :  { %4355 = vmatprep.mubr.msk.bf16.mxu0 %vm521_vm0, %v4713_v16 }
  0x43   :  { %4356 = vmatmul.mubr.msk.bf16.gmra.mrb[28].mxu0 %vm521_vm0, %v4714_v17 }
  0x44   :  { %4359 = vmatprep.mubr.msk.bf16.mxu0 %vm521_vm0, %v4715_v18 }
  0x45   :  { %21 = vsyncpa [#allocation3], 0  ;;  %v4717_v20 = vld [vmem:[%s5868_s27 + $0x90] sm:$0xff]   ;;  %v4718_v21 = vld [vmem:[%s5868_s27 + $0x98] sm:$0xff]   ;;  %v4881_v49 = vmov 1983009808   ;;  %v1457_v51 = vlaneseq }
  0x46   :  { %v4719_v22 = vld [vmem:[%s5868_s27 + $0xa0] sm:$0xff]   ;;  %v4720_v23 = vld [vmem:[%s5868_s27 + $0xa8] sm:$0xff]   ;;  %v4721_v24 = vld [vmem:[%s5868_s27 + $0xb0] sm:$0xff]   ;;  %v1455_v50 = vunpack.c.l.s4 %v4881_v49  ;;  %vm4883_vm1 = vmmov 0   ;;  %vm2652_vm2 = vcmask 254976   ;;  %vm2746_vm3 = vcmask 123904  }
  0x47   :  { %v4722_v25 = vld [vmem:[%s5868_s27 + $0xb8] sm:$0xff]   ;;  %v4723_v26 = vld [vmem:[%s5868_s27 + $0xc0] sm:$0xff]   ;;  %v4724_v27 = vld [vmem:[%s5868_s27 + $0xc8] sm:$0xff]   ;;  %v1458_v53 = vshrl.u32 %v1457_v51, 7  ;;  %vm2775_vm4 = vcmask 130048   ;;  %vm3564_vm13 = vcmask 9216  }
  0x48   :  { %v4725_v28 = vld [vmem:[%s5868_s27 + $0xd0] sm:$0xff]   ;;  %v4726_v29 = vld [vmem:[%s5868_s27 + $0xd8] sm:$0xff]   ;;  %v4727_v30 = vld [vmem:[%s5868_s27 + $0xe0] sm:$0xff]   ;;  %v1456_v52 = vunpack.c.0.s8 %v1455_v50  ;;  %vm3582_vm14 = vcmask 1024  }
  0x49   :  { %v4728_v31 = vld [vmem:[%s5868_s27 + $0xe8] sm:$0xff]   ;;  %v4729_v32 = vld [vmem:[%s5868_s27 + $0xf0] sm:$0xff]   ;;  %v4730_v33 = vld [vmem:[%s5868_s27 + $0xf8] sm:$0xff]  }
  0x4a   :  { %v4731_v34 = vld [vmem:[%s5868_s27 + $0x100] sm:$0xff]   ;;  %v4732_v35 = vld [vmem:[%s5868_s27 + $0x108] sm:$0xff]   ;;  %v4733_v36 = vld [vmem:[%s5868_s27 + $0x110] sm:$0xff]   ;;  %v5174_v56 = vsub.s32 %v1456_v52, %v1458_v53 }
  0x4b   :  { %4360 = vmatmul.mubr.msk.bf16.gmra.mrb[32].mxu0 %vm521_vm0, %v4716_v19  ;;  %v4734_v37 = vld [vmem:[%s5868_s27 + $0x118] sm:$0xff]   ;;  %v4735_v38 = vld [vmem:[%s5868_s27 + $0x120] sm:$0xff]   ;;  %v4736_v39 = vld [vmem:[%s5868_s27 + $0x128] sm:$0xff]  }
  0x4c   :  { %4363 = vmatprep.mubr.msk.bf16.mxu0 %vm521_vm0, %v4717_v20  ;;  %v4737_v40 = vld [vmem:[%s5868_s27 + $0x130] sm:$0xff]   ;;  %v4738_v41 = vld [vmem:[%s5868_s27 + $0x138] sm:$0xff]   ;;  %v4739_v42 = vld [vmem:[%s5868_s27 + $0x140] sm:$0xff]  }
  0x4d   :  { %v4740_v43 = vld [vmem:[%s5868_s27 + $0x148] sm:$0xff]   ;;  %v4741_v44 = vld [vmem:[%s5868_s27 + $0x150] sm:$0xff]   ;;  %v4742_v45 = vld [vmem:[%s5868_s27 + $0x158] sm:$0xff]  }
  0x4e   :  { %v4743_v46 = vld [vmem:[%s5868_s27 + $0x160] sm:$0xff]   ;;  %v4744_v47 = vld [vmem:[%s5868_s27 + $0x168] sm:$0xff]   ;;  %v4745_v48 = vld [vmem:[%s5868_s27 + $0x170] sm:$0xff]  }
  0x4f   :  { %v5167_v54 = vld [vmem:[%s5868_s27 + $0x178] sm:$0xff]   ;;  %v5172_v55 = vld [vmem:[%s5868_s27 + $0x180] sm:$0xff]   ;;  %v5197_v60 = vld [vmem:[%s5868_s27 + $0x188] sm:$0xff]  }
  0x50   :  { %v5179_v57 = vld [vmem:[%s5850_s1] sm:$0xff]  ;;  %v5202_v61 = vld [vmem:[%s5868_s27 + $0x190] sm:$0xff]   ;;  %v5211_v62 = vld [vmem:[%s5868_s27 + $0x198] sm:$0xff]  }
  0x51   :  { %v5183_v58 = vrot.slane %v5179_v57, %v5174_v56  ;;  %v5216_v63 = vld [vmem:[%s5868_s27 + $0x1a0] sm:$0xff]   ;;  %v5225_v0 = vld [vmem:[%s5868_s27 + $0x1a8] sm:$0xff]   ;;  %v5230_v1 = vld [vmem:[%s5868_s27 + $0x1b0] sm:$0xff]  }
  0x52   :  { %v5239_v4 = vld [vmem:[%s5868_s27 + $0x1b8] sm:$0xff]   ;;  %v5244_v6 = vld [vmem:[%s5868_s27 + $0x1c0] sm:$0xff]   ;;  %v5255_v16 = vld [vmem:[%s5868_s27 + $0x1c8] sm:$0xff]  }
  0x53   :  { %4364 = vmatmul.mubr.msk.bf16.gmra.mrb[36].mxu0 %vm521_vm0, %v4718_v21  ;;  %v5191_v59 = vcombine.high %v5183_v58, %v5183_v58  ;;  %v5260_v18 = vld [vmem:[%s5868_s27 + $0x1d0] sm:$0xff]   ;;  %v5303_v52 = vld [vmem:[%s5868_s27 + $0x1f8] sm:$0xff]  }
  0x54   :  { %4367 = vmatprep.mubr.msk.bf16.mxu0 %vm521_vm0, %v4719_v22 }
  0x55   :  { %1527 = vmatprep.mubr.bf16.mxu1 %v5191_v59 }
  0x5b   :  { %4368 = vmatmul.mubr.msk.bf16.gmra.mrb[40].mxu0 %vm521_vm0, %v4720_v23 }
  0x5c   :  { %4371 = vmatprep.mubr.msk.bf16.mxu0 %vm521_vm0, %v4721_v24 }
  0x63   :  { %4372 = vmatmul.mubr.msk.bf16.gmra.mrb[44].mxu0 %vm521_vm0, %v4722_v25 }
  0x64   :  { %4375 = vmatprep.mubr.msk.bf16.mxu0 %vm521_vm0, %v4723_v26 }
  0x6b   :  { %4376 = vmatmul.mubr.msk.bf16.gmra.mrb[48].mxu0 %vm521_vm0, %v4724_v27 }
  0x6c   :  { %4379 = vmatprep.mubr.msk.bf16.mxu0 %vm521_vm0, %v4725_v28  ;;  %v5271_v28 = vld [vmem:[%s5868_s27 + $0x1d8] sm:$0xff]  }
  0x73   :  { %4380 = vmatmul.mubr.msk.bf16.gmra.mrb[52].mxu0 %vm521_vm0, %v4726_v29 }
  0x74   :  { %4383 = vmatprep.mubr.msk.bf16.mxu0 %vm521_vm0, %v4727_v30  ;;  %v5276_v30 = vld [vmem:[%s5868_s27 + $0x1e0] sm:$0xff]  }
  0x7b   :  { %4384 = vmatmul.mubr.msk.bf16.gmra.mrb[56].mxu0 %vm521_vm0, %v4728_v31 }
  0x7c   :  { %4387 = vmatprep.mubr.msk.bf16.mxu0 %vm521_vm0, %v4729_v32 }
  0x83   :  { %4388 = vmatmul.mubr.msk.bf16.gmra.mrb[60].mxu0 %vm521_vm0, %v4730_v33 }
  0x84   :  { %4391 = vmatprep.mubr.msk.bf16.mxu0 %vm521_vm0, %v4731_v34 }
  0x8b   :  { %4392 = vmatmul.mubr.msk.bf16.gmra.mrb[64].mxu0 %vm521_vm0, %v4732_v35 }
  0x8c   :  { %4395 = vmatprep.mubr.msk.bf16.mxu0 %vm521_vm0, %v4733_v36 }
  0x93   :  { %4396 = vmatmul.mubr.msk.bf16.gmra.mrb[68].mxu0 %vm521_vm0, %v4734_v37 }
  0x94   :  { %4399 = vmatprep.mubr.msk.bf16.mxu0 %vm521_vm0, %v4735_v38 }
  0x9b   :  { %4400 = vmatmul.mubr.msk.bf16.gmra.mrb[72].mxu0 %vm521_vm0, %v4736_v39 }
  0x9c   :  { %4403 = vmatprep.mubr.msk.bf16.mxu0 %vm521_vm0, %v4737_v40  ;;  %v5287_v40 = vld [vmem:[%s5868_s27 + $0x1e8] sm:$0xff]  }
  0xa3   :  { %4404 = vmatmul.mubr.msk.bf16.gmra.mrb[76].mxu0 %vm521_vm0, %v4738_v41 }
  0xa4   :  { %4407 = vmatprep.mubr.msk.bf16.mxu0 %vm521_vm0, %v4739_v42  ;;  %v5292_v42 = vld [vmem:[%s5868_s27 + $0x1f0] sm:$0xff]  }
  0xab   :  { %4408 = vmatmul.mubr.msk.bf16.gmra.mrb[80].mxu0 %vm521_vm0, %v4740_v43 }
  0xac   :  { %4411 = vmatprep.mubr.msk.bf16.mxu0 %vm521_vm0, %v4741_v44 }
  0xb3   :  { %4412 = vmatmul.mubr.msk.bf16.gmra.mrb[84].mxu0 %vm521_vm0, %v4742_v45 }
  0xb4   :  { %4415 = vmatprep.mubr.msk.bf16.mxu0 %vm521_vm0, %v4743_v46 }
  0xbb   :  { %4416 = vmatmul.mubr.msk.bf16.gmra.mrb[88].mxu0 %vm521_vm0, %v4744_v47 }
  0xbc   :  { %4419 = vmatprep.mubr.msk.bf16.mxu0 %vm521_vm0, %v4745_v48 }
  0xc3   :  { %4420 = vmatmul.mubr.msk.bf16.gmra.mrb[92].mxu0 %vm521_vm0, %v5167_v54 }
  0xc4   :  { %4423 = vmatprep.mubr.msk.bf16.mxu0 %vm521_vm0, %v5172_v55 }
  0xcb   :  { %4424 = vmatmul.mubr.msk.bf16.gmra.mrb[96].mxu0 %vm521_vm0, %v5197_v60 }
  0xcc   :  { %4427 = vmatprep.mubr.msk.bf16.mxu0 %vm521_vm0, %v5202_v61 }
  0xd3   :  { %4428 = vmatmul.mubr.msk.bf16.gmra.mrb[100].mxu0 %vm521_vm0, %v5211_v62 }
  0xd4   :  { %4431 = vmatprep.mubr.msk.bf16.mxu0 %vm521_vm0, %v5216_v63 }
  0xdb   :  { %4432 = vmatmul.mubr.msk.bf16.gmra.mrb[104].mxu0 %vm521_vm0, %v5225_v0 }
  0xdc   :  { %4435 = vmatprep.mubr.msk.bf16.mxu0 %vm521_vm0, %v5230_v1 }
  0xde   :  { %v4329_v2 = vpop.f32.mrb[0].mxu0 }
  0xdf   :  { %v748_v3 = vpop.f32.mrb[1].mxu0  ;;  %v1261_v7 = vmax.f32 %v4329_v2, 0.0 }
  0xe0   :  { %v4330_v5 = vpop.f32.mrb[2].mxu0  ;;  %v1259_v10 = vmax.f32 %v748_v3, 0.0 }
  0xe1   :  { %v1262_v8 = vmax.f32 %v4330_v5, 0.0  ;;  %v751_v9 = vpop.f32.mrb[3].mxu0 }
  0xe2   :  { %v1260_v11 = vmax.f32 %v751_v9, 0.0 }
  0xe3   :  { %v5246_v12 = vpack.c.bf16 %v1262_v8, %v1261_v7  ;;  %4436 = vmatmul.mubr.msk.bf16.gmra.mrb[108].mxu0 %vm521_vm0, %v5239_v4 }
  0xe4   :  { %4439 = vmatprep.mubr.msk.bf16.mxu0 %vm521_vm0, %v5244_v6  ;;  %v1387_v13 = vpack.c.bf16 %v1260_v11, %v1259_v10 }
  0xe6   :  { %v4333_v14 = vpop.f32.mrb[4].mxu0 }
  0xe7   :  { %v764_v15 = vpop.f32.mrb[5].mxu0  ;;  %v1265_v19 = vmax.f32 %v4333_v14, 0.0 }
  0xe8   :  { %v4334_v17 = vpop.f32.mrb[6].mxu0  ;;  %v1263_v22 = vmax.f32 %v764_v15, 0.0 }
  0xe9   :  { %v1266_v20 = vmax.f32 %v4334_v17, 0.0  ;;  %v767_v21 = vpop.f32.mrb[7].mxu0 }
  0xea   :  { %v1264_v23 = vmax.f32 %v767_v21, 0.0 }
  0xeb   :  { %v5262_v24 = vpack.c.bf16 %v1266_v20, %v1265_v19  ;;  %4440 = vmatmul.mubr.msk.bf16.gmra.mrb[112].mxu0 %vm521_vm0, %v5255_v16 }
  0xec   :  { %v1389_v25 = vpack.c.bf16 %v1264_v23, %v1263_v22  ;;  %4443 = vmatprep.mubr.msk.bf16.mxu0 %vm521_vm0, %v5260_v18 }
  0xee   :  { %v4337_v26 = vpop.f32.mrb[8].mxu0 }
  0xef   :  { %v780_v27 = vpop.f32.mrb[9].mxu0  ;;  %v1269_v31 = vmax.f32 %v4337_v26, 0.0 }
  0xf0   :  { %v4338_v29 = vpop.f32.mrb[10].mxu0  ;;  %v1267_v34 = vmax.f32 %v780_v27, 0.0 }
  0xf1   :  { %v1270_v32 = vmax.f32 %v4338_v29, 0.0  ;;  %v783_v33 = vpop.f32.mrb[11].mxu0 }
  0xf2   :  { %v1268_v35 = vmax.f32 %v783_v33, 0.0 }
  0xf3   :  { %v5278_v36 = vpack.c.bf16 %v1270_v32, %v1269_v31  ;;  %4444 = vmatmul.mubr.msk.bf16.gmra.mrb[116].mxu0 %vm521_vm0, %v5271_v28 }
  0xf4   :  { %v1391_v37 = vpack.c.bf16 %v1268_v35, %v1267_v34  ;;  %4447 = vmatprep.mubr.msk.bf16.mxu0 %vm521_vm0, %v5276_v30 }
  0xf6   :  { %v4341_v38 = vpop.f32.mrb[12].mxu0 }
  0xf7   :  { %v796_v39 = vpop.f32.mrb[13].mxu0  ;;  %v1273_v43 = vmax.f32 %v4341_v38, 0.0 }
  0xf8   :  { %v4342_v41 = vpop.f32.mrb[14].mxu0  ;;  %v1271_v46 = vmax.f32 %v796_v39, 0.0 }
  0xf9   :  { %v1274_v44 = vmax.f32 %v4342_v41, 0.0  ;;  %v799_v45 = vpop.f32.mrb[15].mxu0 }
  0xfa   :  { %v1272_v47 = vmax.f32 %v799_v45, 0.0 }
  0xfb   :  { %v5294_v48 = vpack.c.bf16 %v1274_v44, %v1273_v43  ;;  %4448 = vmatmul.mubr.msk.bf16.gmra.mrb[120].mxu0 %vm521_vm0, %v5287_v40 }
  0xfc   :  { %v1393_v49 = vpack.c.bf16 %v1272_v47, %v1271_v46  ;;  %4451 = vmatprep.mubr.msk.bf16.mxu0 %vm521_vm0, %v5292_v42 }
  0xfe   :  { %v4345_v50 = vpop.f32.mrb[16].mxu0 }
  0xff   :  { %v812_v51 = vpop.f32.mrb[17].mxu0  ;;  %v1277_v2 = vmax.f32 %v4345_v50, 0.0  ;;  %v1453_v50 = vcombine.high %v5179_v57, %v5179_v57 }
 0x100   :  { %v4346_v53 = vpop.f32.mrb[18].mxu0  ;;  %v1275_v7 = vmax.f32 %v812_v51, 0.0 }
 0x101   :  { %v1278_v3 = vmax.f32 %v4346_v53, 0.0  ;;  %v815_v5 = vpop.f32.mrb[19].mxu0 }
 0x102   :  { %v1276_v8 = vmax.f32 %v815_v5, 0.0 }
 0x103   :  { %v1396_v9 = vpack.c.bf16 %v1278_v3, %v1277_v2  ;;  %4452 = vmatmul.mubr.msk.bf16.gmra.mrb[124].mxu0 %vm521_vm0, %v5303_v52 }
 0x104   :  { %v1395_v10 = vpack.c.bf16 %v1276_v8, %v1275_v7  ;;  %2440 = vmatprep.mubr.bf16.mxu0 %v5191_v59 }
 0x106   :  { %v4349_v11 = vpop.f32.mrb[20].mxu0  ;;  %4043 = vmatprep.subr.bf16.mxu1 %v1395_v10 }
 0x107   :  { %v828_v14 = vpop.f32.mrb[21].mxu0  ;;  %4044 = vmatpush3.bf16.msra.mxu1 %v1387_v13  ;;  %v1281_v17 = vmax.f32 %v4349_v11, 0.0 }
 0x108   :  { %v4350_v15 = vpop.f32.mrb[22].mxu0  ;;  %4045 = vmatprep.subr.bf16.mxu1 %v1396_v9  ;;  %v1279_v21 = vmax.f32 %v828_v14, 0.0 }
 0x109   :  { %v1282_v19 = vmax.f32 %v4350_v15, 0.0  ;;  %v831_v20 = vpop.f32.mrb[23].mxu0 }
 0x10a   :  { %v1280_v22 = vmax.f32 %v831_v20, 0.0 }
 0x10b   :  { %v1398_v23 = vpack.c.bf16 %v1282_v19, %v1281_v17  ;;  %4046 = vmatpush3.bf16.msra.mxu1 %v5246_v12 }
 0x10c   :  { %v1397_v26 = vpack.c.bf16 %v1280_v22, %v1279_v21 }
 0x10e   :  { %v4353_v27 = vpop.f32.mrb[24].mxu0  ;;  %4047 = vmatprep.subr.bf16.mxu1 %v1397_v26 }
 0x10f   :  { %v844_v29 = vpop.f32.mrb[25].mxu0  ;;  %4048 = vmatpush3.bf16.msra.mxu1 %v1389_v25  ;;  %v1285_v31 = vmax.f32 %v4353_v27, 0.0 }
 0x110   :  { %v4354_v59 = vpop.f32.mrb[26].mxu0  ;;  %4049 = vmatprep.subr.bf16.mxu1 %v1398_v23  ;;  %v1283_v33 = vmax.f32 %v844_v29, 0.0 }
 0x111   :  { %v1286_v32 = vmax.f32 %v4354_v59, 0.0  ;;  %v847_v13 = vpop.f32.mrb[27].mxu0 }
 0x112   :  { %v1284_v34 = vmax.f32 %v847_v13, 0.0 }
 0x113   :  { %v1400_v35 = vpack.c.bf16 %v1286_v32, %v1285_v31  ;;  %4050 = vmatpush3.bf16.msra.mxu1 %v5262_v24 }
 0x114   :  { %v1399_v38 = vpack.c.bf16 %v1284_v34, %v1283_v33 }
 0x116   :  { %v4357_v39 = vpop.f32.mrb[28].mxu0  ;;  %4051 = vmatprep.subr.bf16.mxu1 %v1399_v38 }
 0x117   :  { %v860_v41 = vpop.f32.mrb[29].mxu0  ;;  %4052 = vmatpush3.bf16.msra.mxu1 %v1391_v37  ;;  %v1289_v43 = vmax.f32 %v4357_v39, 0.0  ;;  %v5314_v37 = vrot.slane %v1453_v50, %v5174_v56 }
 0x118   :  { %v4358_v12 = vpop.f32.mrb[30].mxu0  ;;  %4053 = vmatprep.subr.bf16.mxu1 %v1400_v35  ;;  %v1287_v45 = vmax.f32 %v860_v41, 0.0 }
 0x119   :  { %v1290_v44 = vmax.f32 %v4358_v12, 0.0  ;;  %v863_v25 = vpop.f32.mrb[31].mxu0  ;;  %v5319_v57 = vcombine.high %v5314_v37, %v5314_v37 }
 0x11a   :  { %v1288_v46 = vmax.f32 %v863_v25, 0.0 }
 0x11b   :  { %v1402_v47 = vpack.c.bf16 %v1290_v44, %v1289_v43  ;;  %4054 = vmatpush3.bf16.msra.mxu1 %v5278_v36 }
 0x11c   :  { %v1401_v51 = vpack.c.bf16 %v1288_v46, %v1287_v45 }
 0x11e   :  { %v4361_v24 = vpop.f32.mrb[32].mxu0  ;;  %4055 = vmatprep.subr.bf16.mxu1 %v1401_v51 }
 0x11f   :  { %v876_v53 = vpop.f32.mrb[33].mxu0  ;;  %4056 = vmatpush3.bf16.msra.mxu1 %v1393_v49  ;;  %v1293_v3 = vmax.f32 %v4361_v24, 0.0 }
 0x120   :  { %v4362_v2 = vpop.f32.mrb[34].mxu0  ;;  %4057 = vmatprep.subr.bf16.mxu1 %v1402_v47  ;;  %v1291_v8 = vmax.f32 %v876_v53, 0.0 }
 0x121   :  { %v1294_v5 = vmax.f32 %v4362_v2, 0.0  ;;  %v879_v7 = vpop.f32.mrb[35].mxu0 }
 0x122   :  { %v1292_v9 = vmax.f32 %v879_v7, 0.0 }
 0x123   :  { %v1404_v10 = vpack.c.bf16 %v1294_v5, %v1293_v3  ;;  %4058 = vmatpush3.bf16.msra.mxu1 %v5294_v48 }
 0x124   :  { %v1403_v36 = vpack.c.bf16 %v1292_v9, %v1291_v8 }
 0x126   :  { %v4365_v11 = vpop.f32.mrb[36].mxu0  ;;  %1528 = vmatmul.mubr.bf16.vlgmr.msra.gmra.mrb[0].mxu1 %v5183_v58 }
 0x127   :  { %v892_v49 = vpop.f32.mrb[37].mxu0  ;;  %1567 = vmatprep.mubr.bf16.mxu1 %v5319_v57  ;;  %v1297_v15 = vmax.f32 %v4365_v11, 0.0 }
 0x128   :  { %v4366_v14 = vpop.f32.mrb[38].mxu0  ;;  %v1295_v20 = vmax.f32 %v892_v49, 0.0 }
 0x129   :  { %v1298_v17 = vmax.f32 %v4366_v14, 0.0  ;;  %v895_v19 = vpop.f32.mrb[39].mxu0 }
 0x12a   :  { %v1296_v21 = vmax.f32 %v895_v19, 0.0 }
 0x12b   :  { %v1406_v22 = vpack.c.bf16 %v1298_v17, %v1297_v15 }
 0x12c   :  { %v1405_v23 = vpack.c.bf16 %v1296_v21, %v1295_v20 }
 0x12e   :  { %v4369_v48 = vpop.f32.mrb[40].mxu0 }
 0x12f   :  { %v908_v26 = vpop.f32.mrb[41].mxu0  ;;  %v1301_v29 = vmax.f32 %v4369_v48, 0.0 }
 0x130   :  { %v4370_v27 = vpop.f32.mrb[42].mxu0  ;;  %v1299_v32 = vmax.f32 %v908_v26, 0.0 }
 0x131   :  { %v1302_v59 = vmax.f32 %v4370_v27, 0.0  ;;  %v911_v31 = vpop.f32.mrb[43].mxu0 }
 0x132   :  { %v1300_v13 = vmax.f32 %v911_v31, 0.0 }
 0x133   :  { %v1408_v33 = vpack.c.bf16 %v1302_v59, %v1301_v29 }
 0x134   :  { %v1407_v34 = vpack.c.bf16 %v1300_v13, %v1299_v32 }
 0x136   :  { %v4373_v35 = vpop.f32.mrb[44].mxu0 }
 0x137   :  { %v924_v38 = vpop.f32.mrb[45].mxu0  ;;  %v1305_v41 = vmax.f32 %v4373_v35, 0.0 }
 0x138   :  { %v4374_v39 = vpop.f32.mrb[46].mxu0  ;;  %v1303_v44 = vmax.f32 %v924_v38, 0.0 }
 0x139   :  { %v1306_v12 = vmax.f32 %v4374_v39, 0.0  ;;  %v927_v43 = vpop.f32.mrb[47].mxu0 }
 0x13a   :  { %v1304_v25 = vmax.f32 %v927_v43, 0.0 }
 0x13b   :  { %v5323_v45 = vpack.c.bf16 %v1306_v12, %v1305_v41 }
 0x13c   :  { %v1409_v46 = vpack.c.bf16 %v1304_v25, %v1303_v44 }
 0x13e   :  { %v4377_v47 = vpop.f32.mrb[48].mxu0 }
 0x13f   :  { %v940_v50 = vpop.f32.mrb[49].mxu0  ;;  %v1309_v24 = vmax.f32 %v4377_v47, 0.0 }
 0x140   :  { %v4378_v51 = vpop.f32.mrb[50].mxu0  ;;  %v1307_v3 = vmax.f32 %v940_v50, 0.0 }
 0x141   :  { %v1310_v53 = vmax.f32 %v4378_v51, 0.0  ;;  %v943_v2 = vpop.f32.mrb[51].mxu0  ;;  %v5328_v51 = vld [vmem:[%s5850_s1 + $0x8] sm:$0xff] }
 0x142   :  { %v1308_v5 = vmax.f32 %v943_v2, 0.0 }
 0x143   :  { %v1412_v7 = vpack.c.bf16 %v1310_v53, %v1309_v24 }
 0x144   :  { %v1411_v8 = vpack.c.bf16 %v1308_v5, %v1307_v3 }
 0x146   :  { %v4381_v9 = vpop.f32.mrb[52].mxu0  ;;  %4065 = vmatprep.subr.bf16.mxu1 %v1411_v8 }
 0x147   :  { %v956_v11 = vpop.f32.mrb[53].mxu0  ;;  %4066 = vmatpush3.bf16.msra.mxu1 %v1403_v36  ;;  %v1313_v14 = vmax.f32 %v4381_v9, 0.0 }
 0x148   :  { %v4382_v49 = vpop.f32.mrb[54].mxu0  ;;  %4067 = vmatprep.subr.bf16.mxu1 %v1412_v7  ;;  %v1311_v19 = vmax.f32 %v956_v11, 0.0 }
 0x149   :  { %v1314_v15 = vmax.f32 %v4382_v49, 0.0  ;;  %v959_v17 = vpop.f32.mrb[55].mxu0 }
 0x14a   :  { %v1312_v20 = vmax.f32 %v959_v17, 0.0 }
 0x14b   :  { %v1414_v21 = vpack.c.bf16 %v1314_v15, %v1313_v14  ;;  %4068 = vmatpush3.bf16.msra.mxu1 %v1404_v10 }
 0x14c   :  { %v1413_v48 = vpack.c.bf16 %v1312_v20, %v1311_v19 }
 0x14e   :  { %v4385_v26 = vpop.f32.mrb[56].mxu0  ;;  %4069 = vmatprep.subr.bf16.mxu1 %v1413_v48 }
 0x14f   :  { %v972_v27 = vpop.f32.mrb[57].mxu0  ;;  %4070 = vmatpush3.bf16.msra.mxu1 %v1405_v23  ;;  %v1317_v59 = vmax.f32 %v4385_v26, 0.0 }
 0x150   :  { %v4386_v29 = vpop.f32.mrb[58].mxu0  ;;  %4071 = vmatprep.subr.bf16.mxu1 %v1414_v21  ;;  %v1315_v36 = vmax.f32 %v972_v27, 0.0 }
 0x151   :  { %v1318_v31 = vmax.f32 %v4386_v29, 0.0  ;;  %v975_v32 = vpop.f32.mrb[59].mxu0 }
 0x152   :  { %v1316_v13 = vmax.f32 %v975_v32, 0.0 }
 0x153   :  { %v1416_v35 = vpack.c.bf16 %v1318_v31, %v1317_v59  ;;  %4072 = vmatpush3.bf16.msra.mxu1 %v1406_v22 }
 0x154   :  { %v1415_v38 = vpack.c.bf16 %v1316_v13, %v1315_v36 }
 0x156   :  { %v4389_v39 = vpop.f32.mrb[60].mxu0  ;;  %4073 = vmatprep.subr.bf16.mxu1 %v1415_v38 }
 0x157   :  { %v988_v41 = vpop.f32.mrb[61].mxu0  ;;  %4074 = vmatpush3.bf16.msra.mxu1 %v1407_v34  ;;  %v1321_v12 = vmax.f32 %v4389_v39, 0.0  ;;  %v5332_v34 = vrot.slane %v5328_v51, %v5174_v56 }
 0x158   :  { %v4390_v10 = vpop.f32.mrb[62].mxu0  ;;  %4075 = vmatprep.subr.bf16.mxu1 %v1416_v35  ;;  %v1319_v23 = vmax.f32 %v988_v41, 0.0 }
 0x159   :  { %v1322_v43 = vmax.f32 %v4390_v10, 0.0  ;;  %v991_v44 = vpop.f32.mrb[63].mxu0  ;;  %v5337_v9 = vcombine.high %v5332_v34, %v5332_v34 }
 0x15a   :  { %v1320_v25 = vmax.f32 %v991_v44, 0.0 }
 0x15b   :  { %v1418_v47 = vpack.c.bf16 %v1322_v43, %v1321_v12  ;;  %4076 = vmatpush3.bf16.msra.mxu1 %v1408_v33 }
 0x15c   :  { %v1417_v50 = vpack.c.bf16 %v1320_v25, %v1319_v23 }
 0x15e   :  { %v4393_v22 = vpop.f32.mrb[64].mxu0  ;;  %4077 = vmatprep.subr.bf16.mxu1 %v1417_v50 }
 0x15f   :  { %v1004_v24 = vpop.f32.mrb[65].mxu0  ;;  %4078 = vmatpush3.bf16.msra.mxu1 %v1409_v46  ;;  %v1325_v2 = vmax.f32 %v4393_v22, 0.0 }
 0x160   :  { %v4394_v53 = vpop.f32.mrb[66].mxu0  ;;  %4079 = vmatprep.subr.bf16.mxu1 %v1418_v47  ;;  %v1323_v33 = vmax.f32 %v1004_v24, 0.0 }
 0x161   :  { %v1326_v3 = vmax.f32 %v4394_v53, 0.0  ;;  %v1007_v5 = vpop.f32.mrb[67].mxu0 }
 0x162   :  { %v1324_v7 = vmax.f32 %v1007_v5, 0.0 }
 0x163   :  { %v1420_v8 = vpack.c.bf16 %v1326_v3, %v1325_v2  ;;  %4080 = vmatpush3.bf16.msra.mxu1 %v5323_v45 }
 0x164   :  { %v1419_v11 = vpack.c.bf16 %v1324_v7, %v1323_v33 }
 0x166   :  { %v4397_v46 = vpop.f32.mrb[68].mxu0  ;;  %1568 = vmatmul.mubr.bf16.vlgmr.msra.gmra.mrb[4].mxu1 %v5314_v37 }
 0x167   :  { %v1020_v49 = vpop.f32.mrb[69].mxu0  ;;  %1607 = vmatprep.mubr.bf16.mxu1 %v5337_v9  ;;  %v1329_v15 = vmax.f32 %v4397_v46, 0.0 }
 0x168   :  { %v4398_v14 = vpop.f32.mrb[70].mxu0  ;;  %v1327_v20 = vmax.f32 %v1020_v49, 0.0 }
 0x169   :  { %v1330_v17 = vmax.f32 %v4398_v14, 0.0  ;;  %v1023_v19 = vpop.f32.mrb[71].mxu0 }
 0x16a   :  { %v1328_v21 = vmax.f32 %v1023_v19, 0.0 }
 0x16b   :  { %v1422_v48 = vpack.c.bf16 %v1330_v17, %v1329_v15 }
 0x16c   :  { %v1421_v26 = vpack.c.bf16 %v1328_v21, %v1327_v20 }
 0x16e   :  { %v4401_v45 = vpop.f32.mrb[72].mxu0 }
 0x16f   :  { %v1036_v27 = vpop.f32.mrb[73].mxu0  ;;  %v1333_v59 = vmax.f32 %v4401_v45, 0.0 }
 0x170   :  { %v4402_v29 = vpop.f32.mrb[74].mxu0  ;;  %v1331_v36 = vmax.f32 %v1036_v27, 0.0 }
 0x171   :  { %v1334_v31 = vmax.f32 %v4402_v29, 0.0  ;;  %v1039_v32 = vpop.f32.mrb[75].mxu0 }
 0x172   :  { %v1332_v13 = vmax.f32 %v1039_v32, 0.0 }
 0x173   :  { %v1424_v35 = vpack.c.bf16 %v1334_v31, %v1333_v59 }
 0x174   :  { %v1423_v38 = vpack.c.bf16 %v1332_v13, %v1331_v36 }
 0x176   :  { %v4405_v39 = vpop.f32.mrb[76].mxu0 }
 0x177   :  { %v1052_v41 = vpop.f32.mrb[77].mxu0  ;;  %v1337_v12 = vmax.f32 %v4405_v39, 0.0 }
 0x178   :  { %v4406_v10 = vpop.f32.mrb[78].mxu0  ;;  %v1335_v23 = vmax.f32 %v1052_v41, 0.0 }
 0x179   :  { %v1338_v43 = vmax.f32 %v4406_v10, 0.0  ;;  %v1055_v44 = vpop.f32.mrb[79].mxu0 }
 0x17a   :  { %v1336_v25 = vmax.f32 %v1055_v44, 0.0 }
 0x17b   :  { %v5341_v47 = vpack.c.bf16 %v1338_v43, %v1337_v12 }
 0x17c   :  { %v1425_v50 = vpack.c.bf16 %v1336_v25, %v1335_v23 }
 0x17e   :  { %v4409_v22 = vpop.f32.mrb[80].mxu0 }
 0x17f   :  { %v1068_v24 = vpop.f32.mrb[81].mxu0  ;;  %v1341_v2 = vmax.f32 %v4409_v22, 0.0 }
 0x180   :  { %v4410_v53 = vpop.f32.mrb[82].mxu0  ;;  %v1339_v33 = vmax.f32 %v1068_v24, 0.0 }
 0x181   :  { %v1342_v3 = vmax.f32 %v4410_v53, 0.0  ;;  %v1071_v5 = vpop.f32.mrb[83].mxu0 }
 0x182   :  { %v1340_v7 = vmax.f32 %v1071_v5, 0.0 }
 0x183   :  { %v1428_v46 = vpack.c.bf16 %v1342_v3, %v1341_v2  ;;  %v1470_v3 = vcombine.high %v5328_v51, %v5328_v51 }
 0x184   :  { %v1427_v49 = vpack.c.bf16 %v1340_v7, %v1339_v33 }
 0x185   :  { %v5346_v7 = vrot.slane %v1470_v3, %v5174_v56 }
 0x186   :  { %v4413_v14 = vpop.f32.mrb[84].mxu0  ;;  %4087 = vmatprep.subr.bf16.mxu1 %v1427_v49 }
 0x187   :  { %v1084_v15 = vpop.f32.mrb[85].mxu0  ;;  %4088 = vmatpush3.bf16.msra.mxu1 %v1419_v11  ;;  %v1345_v19 = vmax.f32 %v4413_v14, 0.0  ;;  %v5351_v51 = vcombine.high %v5346_v7, %v5346_v7 }
 0x188   :  { %v4414_v17 = vpop.f32.mrb[86].mxu0  ;;  %4089 = vmatprep.subr.bf16.mxu1 %v1428_v46  ;;  %v1343_v45 = vmax.f32 %v1084_v15, 0.0 }
 0x189   :  { %v1346_v20 = vmax.f32 %v4414_v17, 0.0  ;;  %v1087_v21 = vpop.f32.mrb[87].mxu0 }
 0x18a   :  { %v1344_v27 = vmax.f32 %v1087_v21, 0.0 }
 0x18b   :  { %v1430_v29 = vpack.c.bf16 %v1346_v20, %v1345_v19  ;;  %4090 = vmatpush3.bf16.msra.mxu1 %v1420_v8 }
 0x18c   :  { %v1429_v59 = vpack.c.bf16 %v1344_v27, %v1343_v45 }
 0x18e   :  { %v4417_v31 = vpop.f32.mrb[88].mxu0  ;;  %4091 = vmatprep.subr.bf16.mxu1 %v1429_v59 }
 0x18f   :  { %v1100_v32 = vpop.f32.mrb[89].mxu0  ;;  %4092 = vmatpush3.bf16.msra.mxu1 %v1421_v26  ;;  %v1349_v13 = vmax.f32 %v4417_v31, 0.0 }
 0x190   :  { %v4418_v36 = vpop.f32.mrb[90].mxu0  ;;  %4093 = vmatprep.subr.bf16.mxu1 %v1430_v29  ;;  %v1347_v11 = vmax.f32 %v1100_v32, 0.0 }
 0x191   :  { %v1350_v39 = vmax.f32 %v4418_v36, 0.0  ;;  %v1103_v41 = vpop.f32.mrb[91].mxu0 }
 0x192   :  { %v1348_v10 = vmax.f32 %v1103_v41, 0.0 }
 0x193   :  { %v1432_v12 = vpack.c.bf16 %v1350_v39, %v1349_v13  ;;  %4094 = vmatpush3.bf16.msra.mxu1 %v1422_v48 }
 0x194   :  { %v1431_v43 = vpack.c.bf16 %v1348_v10, %v1347_v11 }
 0x196   :  { %v4421_v44 = vpop.f32.mrb[92].mxu0  ;;  %4095 = vmatprep.subr.bf16.mxu1 %v1431_v43 }
 0x197   :  { %v1116_v23 = vpop.f32.mrb[93].mxu0  ;;  %4096 = vmatpush3.bf16.msra.mxu1 %v1423_v38  ;;  %v1353_v25 = vmax.f32 %v4421_v44, 0.0 }
 0x198   :  { %v4422_v8 = vpop.f32.mrb[94].mxu0  ;;  %4097 = vmatprep.subr.bf16.mxu1 %v1432_v12  ;;  %v1351_v26 = vmax.f32 %v1116_v23, 0.0 }
 0x199   :  { %v1354_v22 = vmax.f32 %v4422_v8, 0.0  ;;  %v1119_v24 = vpop.f32.mrb[95].mxu0 }
 0x19a   :  { %v1352_v53 = vmax.f32 %v1119_v24, 0.0 }
 0x19b   :  { %v1434_v2 = vpack.c.bf16 %v1354_v22, %v1353_v25  ;;  %4098 = vmatpush3.bf16.msra.mxu1 %v1424_v35 }
 0x19c   :  { %v1433_v5 = vpack.c.bf16 %v1352_v53, %v1351_v26 }
 0x19e   :  { %v4425_v33 = vpop.f32.mrb[96].mxu0  ;;  %4099 = vmatprep.subr.bf16.mxu1 %v1433_v5 }
 0x19f   :  { %v1132_v48 = vpop.f32.mrb[97].mxu0  ;;  %4100 = vmatpush3.bf16.msra.mxu1 %v1425_v50  ;;  %v1357_v46 = vmax.f32 %v4425_v33, 0.0 }
 0x1a0   :  { %v4426_v38 = vpop.f32.mrb[98].mxu0  ;;  %4101 = vmatprep.subr.bf16.mxu1 %v1434_v2  ;;  %v1355_v15 = vmax.f32 %v1132_v48, 0.0 }
 0x1a1   :  { %v1358_v49 = vmax.f32 %v4426_v38, 0.0  ;;  %v1135_v14 = vpop.f32.mrb[99].mxu0 }
 0x1a2   :  { %v1356_v17 = vmax.f32 %v1135_v14, 0.0 }
 0x1a3   :  { %v1436_v19 = vpack.c.bf16 %v1358_v49, %v1357_v46  ;;  %4102 = vmatpush3.bf16.msra.mxu1 %v5341_v47 }
 0x1a4   :  { %v1435_v35 = vpack.c.bf16 %v1356_v17, %v1355_v15 }
 0x1a6   :  { %v4429_v20 = vpop.f32.mrb[100].mxu0  ;;  %1608 = vmatmul.mubr.bf16.vlgmr.msra.gmra.mrb[8].mxu1 %v5332_v34 }
 0x1a7   :  { %v1148_v56 = vpop.f32.mrb[101].mxu0  ;;  %1647 = vmatprep.mubr.bf16.mxu1 %v5351_v51  ;;  %v1361_v21 = vmax.f32 %v4429_v20, 0.0 }
 0x1a8   :  { %v4430_v50 = vpop.f32.mrb[102].mxu0  ;;  %v1359_v29 = vmax.f32 %v1148_v56, 0.0 }
 0x1a9   :  { %v1362_v45 = vmax.f32 %v4430_v50, 0.0  ;;  %v1151_v27 = vpop.f32.mrb[103].mxu0 }
 0x1aa   :  { %v1360_v59 = vmax.f32 %v1151_v27, 0.0 }
 0x1ab   :  { %v1438_v31 = vpack.c.bf16 %v1362_v45, %v1361_v21 }
 0x1ac   :  { %v1437_v32 = vpack.c.bf16 %v1360_v59, %v1359_v29 }
 0x1ae   :  { %v4433_v47 = vpop.f32.mrb[104].mxu0 }
 0x1af   :  { %v1164_v36 = vpop.f32.mrb[105].mxu0  ;;  %v1365_v39 = vmax.f32 %v4433_v47, 0.0 }
 0x1b0   :  { %v4434_v13 = vpop.f32.mrb[106].mxu0  ;;  %v1363_v10 = vmax.f32 %v1164_v36, 0.0 }
 0x1b1   :  { %v1366_v41 = vmax.f32 %v4434_v13, 0.0  ;;  %v1167_v11 = vpop.f32.mrb[107].mxu0 }
 0x1b2   :  { %v1364_v12 = vmax.f32 %v1167_v11, 0.0 }
 0x1b3   :  { %v1440_v43 = vpack.c.bf16 %v1366_v41, %v1365_v39 }
 0x1b4   :  { %v1439_v44 = vpack.c.bf16 %v1364_v12, %v1363_v10 }
 0x1b6   :  { %v4437_v23 = vpop.f32.mrb[108].mxu0 }
 0x1b7   :  { %v1180_v8 = vpop.f32.mrb[109].mxu0  ;;  %v1369_v22 = vmax.f32 %v4437_v23, 0.0 }
 0x1b8   :  { %v4438_v25 = vpop.f32.mrb[110].mxu0  ;;  %v1367_v53 = vmax.f32 %v1180_v8, 0.0 }
 0x1b9   :  { %v1370_v24 = vmax.f32 %v4438_v25, 0.0  ;;  %v1183_v26 = vpop.f32.mrb[111].mxu0 }
 0x1ba   :  { %v1368_v2 = vmax.f32 %v1183_v26, 0.0 }
 0x1bb   :  { %v1442_v3 = vpack.c.bf16 %v1370_v24, %v1369_v22 }
 0x1bc   :  { %v1441_v5 = vpack.c.bf16 %v1368_v2, %v1367_v53 }
 0x1be   :  { %v4441_v33 = vpop.f32.mrb[112].mxu0 }
 0x1bf   :  { %v1196_v48 = vpop.f32.mrb[113].mxu0  ;;  %v1373_v46 = vmax.f32 %v4441_v33, 0.0 }
 0x1c0   :  { %v4442_v38 = vpop.f32.mrb[114].mxu0  ;;  %v1371_v15 = vmax.f32 %v1196_v48, 0.0 }
 0x1c1   :  { %v1374_v49 = vmax.f32 %v4442_v38, 0.0  ;;  %v1199_v14 = vpop.f32.mrb[115].mxu0 }
 0x1c2   :  { %v1372_v17 = vmax.f32 %v1199_v14, 0.0  ;;  %v4825_v14 = vld [vmem:[%s5868_s27 + $0x18] sm:$0xff]  }
 0x1c3   :  { %v1444_v20 = vpack.c.bf16 %v1374_v49, %v1373_v46 }
 0x1c4   :  { %v1443_v56 = vpack.c.bf16 %v1372_v17, %v1371_v15  ;;  %v4826_v15 = vld [vmem:[%s5868_s27 + $0x20] sm:$0xff]  }
 0x1c6   :  { %v4445_v50 = vpop.f32.mrb[116].mxu0  ;;  %4109 = vmatprep.subr.bf16.mxu1 %v1443_v56 }
 0x1c7   :  { %v1212_v21 = vpop.f32.mrb[117].mxu0  ;;  %4110 = vmatpush3.bf16.msra.mxu1 %v1435_v35  ;;  %v1377_v27 = vmax.f32 %v4445_v50, 0.0 }
 0x1c8   :  { %v4446_v45 = vpop.f32.mrb[118].mxu0  ;;  %4111 = vmatprep.subr.bf16.mxu1 %v1444_v20  ;;  %v1375_v47 = vmax.f32 %v1212_v21, 0.0 }
 0x1c9   :  { %v1378_v29 = vmax.f32 %v4446_v45, 0.0  ;;  %v1215_v59 = vpop.f32.mrb[119].mxu0  ;;  %v4827_v45 = vld [vmem:[%s5868_s27 + $0x28] sm:$0xff]  }
 0x1ca   :  { %v1376_v36 = vmax.f32 %v1215_v59, 0.0  ;;  %v4830_v59 = vld [vmem:[%s5868_s27 + $0x40] sm:$0xff]  }
 0x1cb   :  { %v1446_v13 = vpack.c.bf16 %v1378_v29, %v1377_v27  ;;  %4112 = vmatpush3.bf16.msra.mxu1 %v1436_v19  ;;  %v4828_v27 = vld [vmem:[%s5868_s27 + $0x30] sm:$0xff]   ;;  %v4829_v29 = vld [vmem:[%s5868_s27 + $0x38] sm:$0xff]  }
 0x1cc   :  { %v1445_v39 = vpack.c.bf16 %v1376_v36, %v1375_v47  ;;  %v4831_v47 = vld [vmem:[%s5868_s27 + $0x48] sm:$0xff]   ;;  %v4832_v36 = vld [vmem:[%s5868_s27 + $0x50] sm:$0xff]  }
 0x1ce   :  { %v4449_v41 = vpop.f32.mrb[120].mxu0  ;;  %4113 = vmatprep.subr.bf16.mxu1 %v1445_v39  ;;  %v4834_v39 = vld [vmem:[%s5868_s27 + $0x60] sm:$0xff]  }
 0x1cf   :  { %v1228_v11 = vpop.f32.mrb[121].mxu0  ;;  %4114 = vmatpush3.bf16.msra.mxu1 %v1437_v32  ;;  %v1381_v12 = vmax.f32 %v4449_v41, 0.0  ;;  %v4835_v41 = vld [vmem:[%s5868_s27 + $0x68] sm:$0xff]  }
 0x1d0   :  { %v4450_v10 = vpop.f32.mrb[122].mxu0  ;;  %4115 = vmatprep.subr.bf16.mxu1 %v1446_v13  ;;  %v1379_v35 = vmax.f32 %v1228_v11, 0.0  ;;  %v4833_v13 = vld [vmem:[%s5868_s27 + $0x58] sm:$0xff]   ;;  %v4836_v11 = vld [vmem:[%s5868_s27 + $0x70] sm:$0xff]  }
 0x1d1   :  { %v1382_v23 = vmax.f32 %v4450_v10, 0.0  ;;  %v1231_v8 = vpop.f32.mrb[123].mxu0  ;;  %v4837_v10 = vld [vmem:[%s5868_s27 + $0x78] sm:$0xff]  }
 0x1d2   :  { %v1380_v25 = vmax.f32 %v1231_v8, 0.0  ;;  %v4840_v8 = vld [vmem:[%s5868_s27 + $0x90] sm:$0xff]  }
 0x1d3   :  { %v1448_v22 = vpack.c.bf16 %v1382_v23, %v1381_v12  ;;  %4116 = vmatpush3.bf16.msra.mxu1 %v1438_v31  ;;  %v4765_v31 = vld [vmem:[%s5856_s7] sm:$0xff]   ;;  %v4839_v23 = vld [vmem:[%s5868_s27 + $0x88] sm:$0xff]  }
 0x1d4   :  { %v1447_v24 = vpack.c.bf16 %v1380_v25, %v1379_v35  ;;  %v4838_v12 = vld [vmem:[%s5868_s27 + $0x80] sm:$0xff]   ;;  %v4841_v35 = vld [vmem:[%s5868_s27 + $0x98] sm:$0xff]  }
 0x1d5   :  { %v4842_v25 = vld [vmem:[%s5868_s27 + $0xa0] sm:$0xff]  }
 0x1d6   :  { %v4453_v26 = vpop.f32.mrb[124].mxu0  ;;  %4117 = vmatprep.subr.bf16.mxu1 %v1447_v24 }
 0x1d7   :  { %v1244_v53 = vpop.f32.mrb[125].mxu0  ;;  %4118 = vmatpush3.bf16.msra.mxu1 %v1439_v44  ;;  %v1385_v2 = vmax.f32 %v4453_v26, 0.0  ;;  %v4766_v44 = vld [vmem:[%s5856_s7 + $0x8] sm:$0xff]  }
 0x1d8   :  { %v4454_v19 = vpop.f32.mrb[126].mxu0  ;;  %4119 = vmatprep.subr.bf16.mxu1 %v1448_v22  ;;  %v1383_v32 = vmax.f32 %v1244_v53, 0.0 }
 0x1d9   :  { %v1386_v33 = vmax.f32 %v4454_v19, 0.0  ;;  %v1247_v48 = vpop.f32.mrb[127].mxu0 }
 0x1da   :  { %v1384_v38 = vmax.f32 %v1247_v48, 0.0  ;;  %v4844_v48 = vld [vmem:[%s5868_s27 + $0xb0] sm:$0xff]  }
 0x1db   :  { %v1450_v46 = vpack.c.bf16 %v1386_v33, %v1385_v2  ;;  %4120 = vmatpush3.bf16.msra.mxu1 %v1440_v43  ;;  %v4822_v43 = vld [vmem:[%s5868_s27] sm:$0xff]   ;;  %v4843_v33 = vld [vmem:[%s5868_s27 + $0xa8] sm:$0xff]  }
 0x1dc   :  { %v1449_v49 = vpack.c.bf16 %v1384_v38, %v1383_v32  ;;  %v4845_v32 = vld [vmem:[%s5868_s27 + $0xb8] sm:$0xff]   ;;  %v4846_v38 = vld [vmem:[%s5868_s27 + $0xc0] sm:$0xff]  }
 0x1de   :  { %4121 = vmatprep.subr.bf16.mxu1 %v1449_v49  ;;  %v4848_v49 = vld [vmem:[%s5868_s27 + $0xd0] sm:$0xff]  }
 0x1df   :  { %4122 = vmatpush3.bf16.msra.mxu1 %v1441_v5  ;;  %v4824_v5 = vld [vmem:[%s5868_s27 + $0x10] sm:$0xff]  }
 0x1e0   :  { %4123 = vmatprep.subr.bf16.mxu1 %v1450_v46  ;;  %v4847_v46 = vld [vmem:[%s5868_s27 + $0xc8] sm:$0xff]  }
 0x1e3   :  { %4124 = vmatpush3.bf16.msra.mxu1 %v1442_v3  ;;  %v4823_v3 = vld [vmem:[%s5868_s27 + $0x8] sm:$0xff]  }
 0x1e4   :  { %4455 = vmatprep.subr.bf16.mxu1 %v4765_v31 }
 0x1e6   :  { %1648 = vmatmul.mubr.bf16.vlgmr.msra.gmra.mrb[12].mxu1 %v5346_v7 }
 0x1e7   :  { %4456 = vmatpush3.bf16.msra.mxu1 %v4765_v31  ;;  %4459 = vmatprep.mubr.msk.bf16.mxu1 %vm521_vm0, %v4822_v43  ;;  %v4849_v31 = vld [vmem:[%s5868_s27 + $0xd8] sm:$0xff]   ;;  %v4851_v43 = vld [vmem:[%s5868_s27 + $0xe8] sm:$0xff]  }
 0x1e8   :  { %4457 = vmatprep.subr.bf16.mxu1 %v4766_v44 }
 0x1eb   :  { %4458 = vmatpush3.bf16.msra.mxu1 %v4766_v44  ;;  %v4850_v44 = vld [vmem:[%s5868_s27 + $0xe0] sm:$0xff]  }
 0x1ee   :  { %4460 = vmatmul.mubr.msk.bf16.vlgmr.msra.gmra.mrb[16].mxu1 %vm521_vm0, %v4823_v3  ;;  %v4852_v3 = vld [vmem:[%s5868_s27 + $0xf0] sm:$0xff]  }
 0x1ef   :  { %4463 = vmatprep.mubr.msk.bf16.mxu1 %vm521_vm0, %v4824_v5  ;;  %v4853_v5 = vld [vmem:[%s5868_s27 + $0xf8] sm:$0xff]  }
 0x1f6   :  { %4464 = vmatmul.mubr.msk.bf16.gmra.mrb[20].mxu1 %vm521_vm0, %v4825_v14  ;;  %v4854_v14 = vld [vmem:[%s5868_s27 + $0x100] sm:$0xff]  }
 0x1f7   :  { %4467 = vmatprep.mubr.msk.bf16.mxu1 %vm521_vm0, %v4826_v15  ;;  %v4855_v15 = vld [vmem:[%s5868_s27 + $0x108] sm:$0xff]  }
 0x1f9   :  { %v4059_v17 = vpop.f32.mrb[0].mxu1 }
 0x1fa   :  { %v4060_v20 = vpop.f32.mrb[1].mxu1 }
 0x1fb   :  { %v4061_v56 = vadd.f32 %v4060_v20, %v4059_v17  ;;  %v4062_v50 = vpop.f32.mrb[2].mxu1  ;;  %v4856_v17 = vld [vmem:[%s5868_s27 + $0x110] sm:$0xff]   ;;  %v4857_v20 = vld [vmem:[%s5868_s27 + $0x118] sm:$0xff]  }
 0x1fc   :  { %v4063_v21 = vpop.f32.mrb[3].mxu1 }
 0x1fe   :  { %4468 = vmatmul.mubr.msk.bf16.gmra.mrb[24].mxu1 %vm521_vm0, %v4827_v45 }
 0x1ff   :  { %4471 = vmatprep.mubr.msk.bf16.mxu1 %vm521_vm0, %v4828_v27 }
 0x206   :  { %4472 = vmatmul.mubr.msk.bf16.gmra.mrb[28].mxu1 %vm521_vm0, %v4829_v29 }
 0x207   :  { %4475 = vmatprep.mubr.msk.bf16.mxu1 %vm521_vm0, %v4830_v59 }
 0x20e   :  { %4476 = vmatmul.mubr.msk.bf16.gmra.mrb[32].mxu1 %vm521_vm0, %v4831_v47  ;;  %v4859_v47 = vld [vmem:[%s5868_s27 + $0x128] sm:$0xff]  }
 0x20f   :  { %4479 = vmatprep.mubr.msk.bf16.mxu1 %vm521_vm0, %v4832_v36  ;;  %v4860_v36 = vld [vmem:[%s5868_s27 + $0x130] sm:$0xff]  }
 0x216   :  { %4480 = vmatmul.mubr.msk.bf16.gmra.mrb[36].mxu1 %vm521_vm0, %v4833_v13  ;;  %v4861_v13 = vld [vmem:[%s5868_s27 + $0x138] sm:$0xff]  }
 0x217   :  { %4483 = vmatprep.mubr.msk.bf16.mxu1 %vm521_vm0, %v4834_v39  ;;  %v4862_v39 = vld [vmem:[%s5868_s27 + $0x140] sm:$0xff]  }
 0x21e   :  { %4484 = vmatmul.mubr.msk.bf16.gmra.mrb[40].mxu1 %vm521_vm0, %v4835_v41  ;;  %v4863_v41 = vld [vmem:[%s5868_s27 + $0x148] sm:$0xff]  }
 0x21f   :  { %4487 = vmatprep.mubr.msk.bf16.mxu1 %vm521_vm0, %v4836_v11  ;;  %v4864_v11 = vld [vmem:[%s5868_s27 + $0x150] sm:$0xff]  }
 0x226   :  { %4488 = vmatmul.mubr.msk.bf16.gmra.mrb[44].mxu1 %vm521_vm0, %v4837_v10  ;;  %v4865_v10 = vld [vmem:[%s5868_s27 + $0x158] sm:$0xff]  }
 0x227   :  { %4491 = vmatprep.mubr.msk.bf16.mxu1 %vm521_vm0, %v4838_v12  ;;  %v4866_v12 = vld [vmem:[%s5868_s27 + $0x160] sm:$0xff]  }
 0x22e   :  { %4492 = vmatmul.mubr.msk.bf16.gmra.mrb[48].mxu1 %vm521_vm0, %v4839_v23  ;;  %v4867_v23 = vld [vmem:[%s5868_s27 + $0x168] sm:$0xff]  }
 0x22f   :  { %4495 = vmatprep.mubr.msk.bf16.mxu1 %vm521_vm0, %v4840_v8  ;;  %v4868_v8 = vld [vmem:[%s5868_s27 + $0x170] sm:$0xff]  }
 0x236   :  { %4496 = vmatmul.mubr.msk.bf16.gmra.mrb[52].mxu1 %vm521_vm0, %v4841_v35 }
 0x237   :  { %4499 = vmatprep.mubr.msk.bf16.mxu1 %vm521_vm0, %v4842_v25 }
 0x239   :  { %v4081_v22 = vpop.f32.mrb[4].mxu1 }
 0x23a   :  { %v4082_v24 = vpop.f32.mrb[5].mxu1 }
 0x23b   :  { %v4083_v26 = vadd.f32 %v4082_v24, %v4081_v22  ;;  %v4084_v53 = vpop.f32.mrb[6].mxu1 }
 0x23c   :  { %v4085_v19 = vpop.f32.mrb[7].mxu1 }
 0x23d   :  { %v1570_v2 = vadd.f32 %v4083_v26, %v4061_v56  ;;  %v4858_v56 = vld [vmem:[%s5868_s27 + $0x120] sm:$0xff]  }
 0x23e   :  { %4500 = vmatmul.mubr.msk.bf16.gmra.mrb[56].mxu1 %vm521_vm0, %v4843_v33 }
 0x23f   :  { %4503 = vmatprep.mubr.msk.bf16.mxu1 %vm521_vm0, %v4844_v48 }
 0x246   :  { %4504 = vmatmul.mubr.msk.bf16.gmra.mrb[60].mxu1 %vm521_vm0, %v4845_v32 }
 0x247   :  { %4507 = vmatprep.mubr.msk.bf16.mxu1 %vm521_vm0, %v4846_v38 }
 0x24e   :  { %4508 = vmatmul.mubr.msk.bf16.gmra.mrb[64].mxu1 %vm521_vm0, %v4847_v46 }
 0x24f   :  { %4511 = vmatprep.mubr.msk.bf16.mxu1 %vm521_vm0, %v4848_v49 }
 0x256   :  { %4512 = vmatmul.mubr.msk.bf16.gmra.mrb[68].mxu1 %vm521_vm0, %v4849_v31 }
 0x257   :  { %4515 = vmatprep.mubr.msk.bf16.mxu1 %vm521_vm0, %v4850_v44 }
 0x25e   :  { %4516 = vmatmul.mubr.msk.bf16.gmra.mrb[72].mxu1 %vm521_vm0, %v4851_v43 }
 0x25f   :  { %4519 = vmatprep.mubr.msk.bf16.mxu1 %vm521_vm0, %v4852_v3 }
 0x266   :  { %4520 = vmatmul.mubr.msk.bf16.gmra.mrb[76].mxu1 %vm521_vm0, %v4853_v5 }
 0x267   :  { %4523 = vmatprep.mubr.msk.bf16.mxu1 %vm521_vm0, %v4854_v14 }
 0x26e   :  { %4524 = vmatmul.mubr.msk.bf16.gmra.mrb[80].mxu1 %vm521_vm0, %v4855_v15 }
 0x26f   :  { %4527 = vmatprep.mubr.msk.bf16.mxu1 %vm521_vm0, %v4856_v17 }
 0x276   :  { %4528 = vmatmul.mubr.msk.bf16.gmra.mrb[84].mxu1 %vm521_vm0, %v4857_v20 }
 0x277   :  { %4531 = vmatprep.mubr.msk.bf16.mxu1 %vm521_vm0, %v4858_v56 }
 0x279   :  { %v4103_v50 = vpop.f32.mrb[8].mxu1 }
 0x27a   :  { %v4104_v21 = vpop.f32.mrb[9].mxu1 }
 0x27b   :  { %v4105_v45 = vadd.f32 %v4104_v21, %v4103_v50  ;;  %v4106_v27 = vpop.f32.mrb[10].mxu1 }
 0x27c   :  { %v4107_v29 = vpop.f32.mrb[11].mxu1 }
 0x27d   :  { %v1610_v59 = vadd.f32 %v4105_v45, %v1570_v2 }
 0x27e   :  { %4532 = vmatmul.mubr.msk.bf16.gmra.mrb[88].mxu1 %vm521_vm0, %v4859_v47 }
 0x27f   :  { %4535 = vmatprep.mubr.msk.bf16.mxu1 %vm521_vm0, %v4860_v36 }
 0x286   :  { %4536 = vmatmul.mubr.msk.bf16.gmra.mrb[92].mxu1 %vm521_vm0, %v4861_v13 }
 0x287   :  { %4539 = vmatprep.mubr.msk.bf16.mxu1 %vm521_vm0, %v4862_v39 }
 0x28e   :  { %4540 = vmatmul.mubr.msk.bf16.gmra.mrb[96].mxu1 %vm521_vm0, %v4863_v41 }
 0x28f   :  { %4543 = vmatprep.mubr.msk.bf16.mxu1 %vm521_vm0, %v4864_v11 }
 0x296   :  { %4544 = vmatmul.mubr.msk.bf16.gmra.mrb[100].mxu1 %vm521_vm0, %v4865_v10 }
 0x297   :  { %4547 = vmatprep.mubr.msk.bf16.mxu1 %vm521_vm0, %v4866_v12 }
 0x29e   :  { %4548 = vmatmul.mubr.msk.bf16.gmra.mrb[104].mxu1 %vm521_vm0, %v4867_v23 }
 0x29f   :  { %4551 = vmatprep.mubr.msk.bf16.mxu1 %vm521_vm0, %v4868_v8 }
 0x2a6   :  { %4552 = vmatmul.mubr.msk.bf16.gmra.mrb[108].mxu1 %vm521_vm0, %v5167_v54 }
 0x2a7   :  { %4555 = vmatprep.mubr.msk.bf16.mxu1 %vm521_vm0, %v5172_v55 }
 0x2ae   :  { %4556 = vmatmul.mubr.msk.bf16.gmra.mrb[112].mxu1 %vm521_vm0, %v5197_v60 }
 0x2af   :  { %4559 = vmatprep.mubr.msk.bf16.mxu1 %vm521_vm0, %v5202_v61 }
 0x2b6   :  { %4560 = vmatmul.mubr.msk.bf16.gmra.mrb[116].mxu1 %vm521_vm0, %v5211_v62 }
 0x2b7   :  { %4563 = vmatprep.mubr.msk.bf16.mxu1 %vm521_vm0, %v5216_v63 }
 0x2b9   :  { %v4125_v35 = vpop.f32.mrb[12].mxu1 }
 0x2ba   :  { %v4126_v25 = vpop.f32.mrb[13].mxu1 }
 0x2bb   :  { %v4127_v22 = vadd.f32 %v4126_v25, %v4125_v35  ;;  %v4128_v24 = vpop.f32.mrb[14].mxu1 }
 0x2bc   :  { %v4129_v54 = vpop.f32.mrb[15].mxu1 }
 0x2bd   :  { %v5562_v26 = vadd.f32 %v4127_v22, %v1610_v59 }
 0x2be   :  { %4564 = vmatmul.mubr.msk.bf16.gmra.mrb[120].mxu1 %vm521_vm0, %v5225_v0 }
 0x2bf   :  { %4567 = vmatprep.mubr.msk.bf16.mxu1 %vm521_vm0, %v5230_v1 }
 0x2c1   :  { %v4461_v55 = vpop.f32.mrb[16].mxu1 }
 0x2c2   :  { %v1705_v60 = vpop.f32.mrb[17].mxu1  ;;  %v2218_v62 = vmax.f32 %v4461_v55, 0.0 }
 0x2c3   :  { %v4462_v61 = vpop.f32.mrb[18].mxu1  ;;  %v2216_v63 = vmax.f32 %v1705_v60, 0.0 }
 0x2c4   :  { %v2219_v53 = vmax.f32 %v4462_v61, 0.0  ;;  %v1708_v19 = vpop.f32.mrb[19].mxu1 }
 0x2c5   :  { %v2217_v2 = vmax.f32 %v1708_v19, 0.0 }
 0x2c6   :  { %v5568_v33 = vpack.c.bf16 %v2219_v53, %v2218_v62  ;;  %4568 = vmatmul.mubr.msk.bf16.gmra.mrb[124].mxu1 %vm521_vm0, %v5239_v4 }
 0x2c7   :  { %v2344_v48 = vpack.c.bf16 %v2217_v2, %v2216_v63  ;;  %4571 = vmatprep.mubr.msk.bf16.mxu1 %vm521_vm0, %v5244_v6 }
 0x2c9   :  { %v4465_v0 = vpop.f32.mrb[20].mxu1 }
 0x2ca   :  { %v1721_v32 = vpop.f32.mrb[21].mxu1  ;;  %v2222_v38 = vmax.f32 %v4465_v0, 0.0 }
 0x2cb   :  { %v4466_v1 = vpop.f32.mrb[22].mxu1  ;;  %v2220_v31 = vmax.f32 %v1721_v32, 0.0 }
 0x2cc   :  { %v2223_v46 = vmax.f32 %v4466_v1, 0.0  ;;  %v1724_v49 = vpop.f32.mrb[23].mxu1 }
 0x2cd   :  { %v2221_v44 = vmax.f32 %v1724_v49, 0.0 }
 0x2ce   :  { %v5574_v43 = vpack.c.bf16 %v2223_v46, %v2222_v38  ;;  %4572 = vmatmul.mubr.msk.bf16.gmra.mrb[128].mxu1 %vm521_vm0, %v5255_v16 }
 0x2cf   :  { %v2346_v3 = vpack.c.bf16 %v2221_v44, %v2220_v31  ;;  %4575 = vmatprep.mubr.msk.bf16.mxu1 %vm521_vm0, %v5260_v18 }
 0x2d1   :  { %v4469_v4 = vpop.f32.mrb[24].mxu1 }
 0x2d2   :  { %v1737_v5 = vpop.f32.mrb[25].mxu1  ;;  %v2226_v14 = vmax.f32 %v4469_v4, 0.0 }
 0x2d3   :  { %v4470_v6 = vpop.f32.mrb[26].mxu1  ;;  %v2224_v20 = vmax.f32 %v1737_v5, 0.0 }
 0x2d4   :  { %v2227_v15 = vmax.f32 %v4470_v6, 0.0  ;;  %v1740_v17 = vpop.f32.mrb[27].mxu1 }
 0x2d5   :  { %v2225_v56 = vmax.f32 %v1740_v17, 0.0 }
 0x2d6   :  { %v5580_v50 = vpack.c.bf16 %v2227_v15, %v2226_v14  ;;  %4576 = vmatmul.mubr.msk.bf16.gmra.mrb[132].mxu1 %vm521_vm0, %v5271_v28 }
 0x2d7   :  { %v2348_v21 = vpack.c.bf16 %v2225_v56, %v2224_v20  ;;  %4579 = vmatprep.mubr.msk.bf16.mxu1 %vm521_vm0, %v5276_v30 }
 0x2d9   :  { %v4473_v16 = vpop.f32.mrb[28].mxu1 }
 0x2da   :  { %v1753_v45 = vpop.f32.mrb[29].mxu1  ;;  %v2230_v27 = vmax.f32 %v4473_v16, 0.0 }
 0x2db   :  { %v4474_v18 = vpop.f32.mrb[30].mxu1  ;;  %v2228_v47 = vmax.f32 %v1753_v45, 0.0 }
 0x2dc   :  { %v2231_v29 = vmax.f32 %v4474_v18, 0.0  ;;  %v1756_v59 = vpop.f32.mrb[31].mxu1 }
 0x2dd   :  { %v2229_v36 = vmax.f32 %v1756_v59, 0.0 }
 0x2de   :  { %v5586_v13 = vpack.c.bf16 %v2231_v29, %v2230_v27  ;;  %4580 = vmatmul.mubr.msk.bf16.gmra.mrb[136].mxu1 %vm521_vm0, %v5287_v40 }
 0x2df   :  { %v2350_v39 = vpack.c.bf16 %v2229_v36, %v2228_v47  ;;  %4583 = vmatprep.mubr.msk.bf16.mxu1 %vm521_vm0, %v5292_v42 }
 0x2e1   :  { %v4477_v28 = vpop.f32.mrb[32].mxu1 }
 0x2e2   :  { %v1769_v41 = vpop.f32.mrb[33].mxu1  ;;  %v2234_v11 = vmax.f32 %v4477_v28, 0.0 }
 0x2e3   :  { %v4478_v30 = vpop.f32.mrb[34].mxu1  ;;  %v2232_v23 = vmax.f32 %v1769_v41, 0.0 }
 0x2e4   :  { %v2235_v10 = vmax.f32 %v4478_v30, 0.0  ;;  %v1772_v12 = vpop.f32.mrb[35].mxu1 }
 0x2e5   :  { %v2233_v8 = vmax.f32 %v1772_v12, 0.0 }
 0x2e6   :  { %v2353_v35 = vpack.c.bf16 %v2235_v10, %v2234_v11  ;;  %4584 = vmatmul.mubr.msk.bf16.gmra.mrb[140].mxu1 %vm521_vm0, %v5303_v52 }
 0x2e7   :  { %v2352_v25 = vpack.c.bf16 %v2233_v8, %v2232_v23 }
 0x2e9   :  { %v4481_v22 = vpop.f32.mrb[36].mxu1  ;;  %4197 = vmatprep.subr.bf16.mxu0 %v2352_v25 }
 0x2ea   :  { %v1785_v40 = vpop.f32.mrb[37].mxu1  ;;  %4198 = vmatpush3.bf16.msra.mxu0 %v2344_v48  ;;  %v2238_v42 = vmax.f32 %v4481_v22, 0.0 }
 0x2eb   :  { %v4482_v24 = vpop.f32.mrb[38].mxu1  ;;  %4199 = vmatprep.subr.bf16.mxu0 %v2353_v35  ;;  %v2236_v60 = vmax.f32 %v1785_v40, 0.0 }
 0x2ec   :  { %v2239_v54 = vmax.f32 %v4482_v24, 0.0  ;;  %v1788_v55 = vpop.f32.mrb[39].mxu1 }
 0x2ed   :  { %v2237_v61 = vmax.f32 %v1788_v55, 0.0 }
 0x2ee   :  { %v2355_v62 = vpack.c.bf16 %v2239_v54, %v2238_v42  ;;  %4200 = vmatpush3.bf16.msra.mxu0 %v5568_v33 }
 0x2ef   :  { %v2354_v53 = vpack.c.bf16 %v2237_v61, %v2236_v60 }
 0x2f1   :  { %v4485_v19 = vpop.f32.mrb[40].mxu1  ;;  %4201 = vmatprep.subr.bf16.mxu0 %v2354_v53 }
 0x2f2   :  { %v1801_v63 = vpop.f32.mrb[41].mxu1  ;;  %4202 = vmatpush3.bf16.msra.mxu0 %v2346_v3  ;;  %v2242_v2 = vmax.f32 %v4485_v19, 0.0 }
 0x2f3   :  { %v4486_v52 = vpop.f32.mrb[42].mxu1  ;;  %4203 = vmatprep.subr.bf16.mxu0 %v2355_v62  ;;  %v2240_v32 = vmax.f32 %v1801_v63, 0.0 }
 0x2f4   :  { %v2243_v0 = vmax.f32 %v4486_v52, 0.0  ;;  %v1804_v48 = vpop.f32.mrb[43].mxu1 }
 0x2f5   :  { %v2241_v1 = vmax.f32 %v1804_v48, 0.0 }
 0x2f6   :  { %v2357_v38 = vpack.c.bf16 %v2243_v0, %v2242_v2  ;;  %4204 = vmatpush3.bf16.msra.mxu0 %v5574_v43 }
 0x2f7   :  { %v2356_v46 = vpack.c.bf16 %v2241_v1, %v2240_v32 }
 0x2f9   :  { %v4489_v49 = vpop.f32.mrb[44].mxu1  ;;  %4205 = vmatprep.subr.bf16.mxu0 %v2356_v46 }
 0x2fa   :  { %v1817_v31 = vpop.f32.mrb[45].mxu1  ;;  %4206 = vmatpush3.bf16.msra.mxu0 %v2348_v21  ;;  %v2246_v44 = vmax.f32 %v4489_v49, 0.0 }
 0x2fb   :  { %v4490_v33 = vpop.f32.mrb[46].mxu1  ;;  %4207 = vmatprep.subr.bf16.mxu0 %v2357_v38  ;;  %v2244_v5 = vmax.f32 %v1817_v31, 0.0 }
 0x2fc   :  { %v2247_v4 = vmax.f32 %v4490_v33, 0.0  ;;  %v1820_v3 = vpop.f32.mrb[47].mxu1 }
 0x2fd   :  { %v2245_v6 = vmax.f32 %v1820_v3, 0.0 }
 0x2fe   :  { %v2359_v14 = vpack.c.bf16 %v2247_v4, %v2246_v44  ;;  %4208 = vmatpush3.bf16.msra.mxu0 %v5580_v50 }
 0x2ff   :  { %v2358_v15 = vpack.c.bf16 %v2245_v6, %v2244_v5 }
 0x301   :  { %4209 = vmatprep.subr.bf16.mxu0 %v2358_v15  ;;  %v4493_v17 = vpop.f32.mrb[48].mxu1 }
 0x302   :  { %4210 = vmatpush3.bf16.msra.mxu0 %v2350_v39  ;;  %v1833_v43 = vpop.f32.mrb[49].mxu1  ;;  %v2250_v56 = vmax.f32 %v4493_v17, 0.0 }
 0x303   :  { %4211 = vmatprep.subr.bf16.mxu0 %v2359_v14  ;;  %v4494_v20 = vpop.f32.mrb[50].mxu1  ;;  %v2248_v45 = vmax.f32 %v1833_v43, 0.0 }
 0x304   :  { %v2251_v16 = vmax.f32 %v4494_v20, 0.0  ;;  %v1836_v21 = vpop.f32.mrb[51].mxu1 }
 0x305   :  { %v2249_v18 = vmax.f32 %v1836_v21, 0.0 }
 0x306   :  { %4212 = vmatpush3.bf16.msra.mxu0 %v5586_v13  ;;  %v2361_v27 = vpack.c.bf16 %v2251_v16, %v2250_v56 }
 0x307   :  { %v2360_v29 = vpack.c.bf16 %v2249_v18, %v2248_v45 }
 0x309   :  { %v4497_v59 = vpop.f32.mrb[52].mxu1  ;;  %2441 = vmatmul.mubr.bf16.vlgmr.msra.gmra.mrb[128].mxu0 %v5183_v58 }
 0x30a   :  { %v1849_v50 = vpop.f32.mrb[53].mxu1  ;;  %2480 = vmatprep.mubr.bf16.mxu0 %v5319_v57  ;;  %v2254_v36 = vmax.f32 %v4497_v59, 0.0 }
 0x30b   :  { %v4498_v47 = vpop.f32.mrb[54].mxu1  ;;  %v2252_v41 = vmax.f32 %v1849_v50, 0.0 }
 0x30c   :  { %v2255_v39 = vmax.f32 %v4498_v47, 0.0  ;;  %v1852_v28 = vpop.f32.mrb[55].mxu1 }
 0x30d   :  { %v2253_v30 = vmax.f32 %v1852_v28, 0.0 }
 0x30e   :  { %v2363_v11 = vpack.c.bf16 %v2255_v39, %v2254_v36 }
 0x30f   :  { %v2362_v10 = vpack.c.bf16 %v2253_v30, %v2252_v41 }
 0x311   :  { %v4501_v12 = vpop.f32.mrb[56].mxu1 }
 0x312   :  { %v1865_v23 = vpop.f32.mrb[57].mxu1  ;;  %v2258_v13 = vmax.f32 %v4501_v12, 0.0 }
 0x313   :  { %v4502_v8 = vpop.f32.mrb[58].mxu1  ;;  %v2256_v22 = vmax.f32 %v1865_v23, 0.0 }
 0x314   :  { %v2259_v35 = vmax.f32 %v4502_v8, 0.0  ;;  %v1868_v25 = vpop.f32.mrb[59].mxu1 }
 0x315   :  { %v2257_v40 = vmax.f32 %v1868_v25, 0.0 }
 0x316   :  { %v2365_v58 = vpack.c.bf16 %v2259_v35, %v2258_v13 }
 0x317   :  { %v2364_v24 = vpack.c.bf16 %v2257_v40, %v2256_v22 }
 0x319   :  { %v4505_v42 = vpop.f32.mrb[60].mxu1 }
 0x31a   :  { %v1881_v57 = vpop.f32.mrb[61].mxu1  ;;  %v2262_v55 = vmax.f32 %v4505_v42, 0.0 }
 0x31b   :  { %v4506_v54 = vpop.f32.mrb[62].mxu1  ;;  %v2260_v62 = vmax.f32 %v1881_v57, 0.0 }
 0x31c   :  { %v2263_v60 = vmax.f32 %v4506_v54, 0.0  ;;  %v1884_v61 = vpop.f32.mrb[63].mxu1 }
 0x31d   :  { %v2261_v53 = vmax.f32 %v1884_v61, 0.0 }
 0x31e   :  { %v5600_v19 = vpack.c.bf16 %v2263_v60, %v2262_v55 }
 0x31f   :  { %v2366_v63 = vpack.c.bf16 %v2261_v53, %v2260_v62 }
 0x321   :  { %v4509_v52 = vpop.f32.mrb[64].mxu1 }
 0x322   :  { %v1897_v2 = vpop.f32.mrb[65].mxu1  ;;  %v2266_v48 = vmax.f32 %v4509_v52, 0.0 }
 0x323   :  { %v4510_v0 = vpop.f32.mrb[66].mxu1  ;;  %v2264_v38 = vmax.f32 %v1897_v2, 0.0 }
 0x324   :  { %v2267_v32 = vmax.f32 %v4510_v0, 0.0  ;;  %v1900_v1 = vpop.f32.mrb[67].mxu1 }
 0x325   :  { %v2265_v46 = vmax.f32 %v1900_v1, 0.0 }
 0x326   :  { %v2369_v49 = vpack.c.bf16 %v2267_v32, %v2266_v48 }
 0x327   :  { %v2368_v31 = vpack.c.bf16 %v2265_v46, %v2264_v38 }
 0x329   :  { %v4513_v33 = vpop.f32.mrb[68].mxu1  ;;  %4219 = vmatprep.subr.bf16.mxu0 %v2368_v31 }
 0x32a   :  { %v1913_v44 = vpop.f32.mrb[69].mxu1  ;;  %4220 = vmatpush3.bf16.msra.mxu0 %v2360_v29  ;;  %v2270_v3 = vmax.f32 %v4513_v33, 0.0 }
 0x32b   :  { %v4514_v4 = vpop.f32.mrb[70].mxu1  ;;  %4221 = vmatprep.subr.bf16.mxu0 %v2369_v49  ;;  %v2268_v14 = vmax.f32 %v1913_v44, 0.0 }
 0x32c   :  { %v2271_v5 = vmax.f32 %v4514_v4, 0.0  ;;  %v1916_v6 = vpop.f32.mrb[71].mxu1 }
 0x32d   :  { %v2269_v15 = vmax.f32 %v1916_v6, 0.0 }
 0x32e   :  { %v2371_v17 = vpack.c.bf16 %v2271_v5, %v2270_v3  ;;  %4222 = vmatpush3.bf16.msra.mxu0 %v2361_v27 }
 0x32f   :  { %v2370_v43 = vpack.c.bf16 %v2269_v15, %v2268_v14 }
 0x331   :  { %v4517_v20 = vpop.f32.mrb[72].mxu1  ;;  %4223 = vmatprep.subr.bf16.mxu0 %v2370_v43 }
 0x332   :  { %v1929_v56 = vpop.f32.mrb[73].mxu1  ;;  %4224 = vmatpush3.bf16.msra.mxu0 %v2362_v10  ;;  %v2274_v21 = vmax.f32 %v4517_v20, 0.0 }
 0x333   :  { %v4518_v16 = vpop.f32.mrb[74].mxu1  ;;  %4225 = vmatprep.subr.bf16.mxu0 %v2371_v17  ;;  %v2272_v29 = vmax.f32 %v1929_v56, 0.0 }
 0x334   :  { %v2275_v45 = vmax.f32 %v4518_v16, 0.0  ;;  %v1932_v18 = vpop.f32.mrb[75].mxu1 }
 0x335   :  { %v2273_v59 = vmax.f32 %v1932_v18, 0.0 }
 0x336   :  { %v2373_v50 = vpack.c.bf16 %v2275_v45, %v2274_v21  ;;  %4226 = vmatpush3.bf16.msra.mxu0 %v2363_v11 }
 0x337   :  { %v2372_v47 = vpack.c.bf16 %v2273_v59, %v2272_v29 }
 0x339   :  { %v4521_v36 = vpop.f32.mrb[76].mxu1  ;;  %4227 = vmatprep.subr.bf16.mxu0 %v2372_v47 }
 0x33a   :  { %v1945_v39 = vpop.f32.mrb[77].mxu1  ;;  %4228 = vmatpush3.bf16.msra.mxu0 %v2364_v24  ;;  %v2278_v28 = vmax.f32 %v4521_v36, 0.0 }
 0x33b   :  { %v4522_v27 = vpop.f32.mrb[78].mxu1  ;;  %4229 = vmatprep.subr.bf16.mxu0 %v2373_v50  ;;  %v2276_v10 = vmax.f32 %v1945_v39, 0.0 }
 0x33c   :  { %v2279_v41 = vmax.f32 %v4522_v27, 0.0  ;;  %v1948_v30 = vpop.f32.mrb[79].mxu1 }
 0x33d   :  { %v2277_v12 = vmax.f32 %v1948_v30, 0.0 }
 0x33e   :  { %v2375_v23 = vpack.c.bf16 %v2279_v41, %v2278_v28  ;;  %4230 = vmatpush3.bf16.msra.mxu0 %v2365_v58  ;;  %v4882_v58 = vmov 0.0  }
 0x33f   :  { %v2374_v8 = vpack.c.bf16 %v2277_v12, %v2276_v10  ;;  %4617 = vmatprep.subr.bf16.mxu1 %v4882_v58  ;;  %4621 = vmatprep.mubr.msk.bf16.mxu1 %vm4883_vm1, %v4882_v58 }
 0x341   :  { %v4525_v13 = vpop.f32.mrb[80].mxu1  ;;  %4231 = vmatprep.subr.bf16.mxu0 %v2374_v8 }
 0x342   :  { %v1961_v35 = vpop.f32.mrb[81].mxu1  ;;  %4232 = vmatpush3.bf16.msra.mxu0 %v2366_v63  ;;  %v2282_v25 = vmax.f32 %v4525_v13, 0.0 }
 0x343   :  { %v4526_v11 = vpop.f32.mrb[82].mxu1  ;;  %4233 = vmatprep.subr.bf16.mxu0 %v2375_v23  ;;  %v2280_v24 = vmax.f32 %v1961_v35, 0.0 }
 0x344   :  { %v2283_v22 = vmax.f32 %v4526_v11, 0.0  ;;  %v1964_v40 = vpop.f32.mrb[83].mxu1 }
 0x345   :  { %v2281_v42 = vmax.f32 %v1964_v40, 0.0 }
 0x346   :  { %v2377_v57 = vpack.c.bf16 %v2283_v22, %v2282_v25  ;;  %4234 = vmatpush3.bf16.msra.mxu0 %v5600_v19 }
 0x347   :  { %v2376_v54 = vpack.c.bf16 %v2281_v42, %v2280_v24 }
 0x349   :  { %v4529_v55 = vpop.f32.mrb[84].mxu1  ;;  %2481 = vmatmul.mubr.bf16.vlgmr.msra.gmra.mrb[132].mxu0 %v5314_v37 }
 0x34a   :  { %v1977_v60 = vpop.f32.mrb[85].mxu1  ;;  %2520 = vmatprep.mubr.bf16.mxu0 %v5337_v9  ;;  %v2286_v62 = vmax.f32 %v4529_v55, 0.0 }
 0x34b   :  { %v4530_v61 = vpop.f32.mrb[86].mxu1  ;;  %v2284_v52 = vmax.f32 %v1977_v60, 0.0 }
 0x34c   :  { %v2287_v53 = vmax.f32 %v4530_v61, 0.0  ;;  %v1980_v63 = vpop.f32.mrb[87].mxu1 }
 0x34d   :  { %v2285_v2 = vmax.f32 %v1980_v63, 0.0 }
 0x34e   :  { %v2379_v0 = vpack.c.bf16 %v2287_v53, %v2286_v62 }
 0x34f   :  { %v2378_v48 = vpack.c.bf16 %v2285_v2, %v2284_v52 }
 0x351   :  { %v4533_v19 = vpop.f32.mrb[88].mxu1 }
 0x352   :  { %v1993_v37 = vpop.f32.mrb[89].mxu1  ;;  %v2290_v1 = vmax.f32 %v4533_v19, 0.0 }
 0x353   :  { %v4534_v32 = vpop.f32.mrb[90].mxu1  ;;  %v2288_v49 = vmax.f32 %v1993_v37, 0.0 }
 0x354   :  { %v2291_v38 = vmax.f32 %v4534_v32, 0.0  ;;  %v1996_v46 = vpop.f32.mrb[91].mxu1 }
 0x355   :  { %v2289_v9 = vmax.f32 %v1996_v46, 0.0 }
 0x356   :  { %v2381_v31 = vpack.c.bf16 %v2291_v38, %v2290_v1 }
 0x357   :  { %v2380_v33 = vpack.c.bf16 %v2289_v9, %v2288_v49 }
 0x359   :  { %v4537_v44 = vpop.f32.mrb[92].mxu1 }
 0x35a   :  { %v2009_v4 = vpop.f32.mrb[93].mxu1  ;;  %v2294_v5 = vmax.f32 %v4537_v44, 0.0 }
 0x35b   :  { %v4538_v3 = vpop.f32.mrb[94].mxu1  ;;  %v2292_v15 = vmax.f32 %v2009_v4, 0.0 }
 0x35c   :  { %v2295_v6 = vmax.f32 %v4538_v3, 0.0  ;;  %v2012_v14 = vpop.f32.mrb[95].mxu1 }
 0x35d   :  { %v2293_v17 = vmax.f32 %v2012_v14, 0.0 }
 0x35e   :  { %v5608_v43 = vpack.c.bf16 %v2295_v6, %v2294_v5 }
 0x35f   :  { %v2382_v20 = vpack.c.bf16 %v2293_v17, %v2292_v15 }
 0x361   :  { %v4541_v56 = vpop.f32.mrb[96].mxu1 }
 0x362   :  { %v2025_v16 = vpop.f32.mrb[97].mxu1  ;;  %v2298_v45 = vmax.f32 %v4541_v56, 0.0 }
 0x363   :  { %v4542_v21 = vpop.f32.mrb[98].mxu1  ;;  %v2296_v59 = vmax.f32 %v2025_v16, 0.0 }
 0x364   :  { %v2299_v18 = vmax.f32 %v4542_v21, 0.0  ;;  %v2028_v29 = vpop.f32.mrb[99].mxu1 }
 0x365   :  { %v2297_v50 = vmax.f32 %v2028_v29, 0.0 }
 0x366   :  { %v2385_v47 = vpack.c.bf16 %v2299_v18, %v2298_v45 }
 0x367   :  { %v2384_v36 = vpack.c.bf16 %v2297_v50, %v2296_v59 }
 0x369   :  { %v4545_v39 = vpop.f32.mrb[100].mxu1  ;;  %4241 = vmatprep.subr.bf16.mxu0 %v2384_v36 }
 0x36a   :  { %v2041_v27 = vpop.f32.mrb[101].mxu1  ;;  %4242 = vmatpush3.bf16.msra.mxu0 %v2376_v54  ;;  %v2302_v41 = vmax.f32 %v4545_v39, 0.0 }
 0x36b   :  { %v4546_v28 = vpop.f32.mrb[102].mxu1  ;;  %4243 = vmatprep.subr.bf16.mxu0 %v2385_v47  ;;  %v2300_v12 = vmax.f32 %v2041_v27, 0.0 }
 0x36c   :  { %v2303_v30 = vmax.f32 %v4546_v28, 0.0  ;;  %v2044_v10 = vpop.f32.mrb[103].mxu1 }
 0x36d   :  { %v2301_v23 = vmax.f32 %v2044_v10, 0.0 }
 0x36e   :  { %v2387_v8 = vpack.c.bf16 %v2303_v30, %v2302_v41  ;;  %4244 = vmatpush3.bf16.msra.mxu0 %v2377_v57 }
 0x36f   :  { %v2386_v13 = vpack.c.bf16 %v2301_v23, %v2300_v12 }
 0x371   :  { %v4549_v35 = vpop.f32.mrb[104].mxu1  ;;  %4245 = vmatprep.subr.bf16.mxu0 %v2386_v13 }
 0x372   :  { %v2057_v11 = vpop.f32.mrb[105].mxu1  ;;  %4246 = vmatpush3.bf16.msra.mxu0 %v2378_v48  ;;  %v2306_v22 = vmax.f32 %v4549_v35, 0.0 }
 0x373   :  { %v4550_v25 = vpop.f32.mrb[106].mxu1  ;;  %4247 = vmatprep.subr.bf16.mxu0 %v2387_v8  ;;  %v2304_v42 = vmax.f32 %v2057_v11, 0.0 }
 0x374   :  { %v2307_v40 = vmax.f32 %v4550_v25, 0.0  ;;  %v2060_v24 = vpop.f32.mrb[107].mxu1 }
 0x375   :  { %v2305_v54 = vmax.f32 %v2060_v24, 0.0 }
 0x376   :  { %v2389_v55 = vpack.c.bf16 %v2307_v40, %v2306_v22  ;;  %4248 = vmatpush3.bf16.msra.mxu0 %v2379_v0 }
 0x377   :  { %v2388_v60 = vpack.c.bf16 %v2305_v54, %v2304_v42 }
 0x379   :  { %v4553_v61 = vpop.f32.mrb[108].mxu1  ;;  %4249 = vmatprep.subr.bf16.mxu0 %v2388_v60 }
 0x37a   :  { %v2073_v62 = vpop.f32.mrb[109].mxu1  ;;  %4250 = vmatpush3.bf16.msra.mxu0 %v2380_v33  ;;  %v2310_v53 = vmax.f32 %v4553_v61, 0.0 }
 0x37b   :  { %v4554_v57 = vpop.f32.mrb[110].mxu1  ;;  %4251 = vmatprep.subr.bf16.mxu0 %v2389_v55  ;;  %v2308_v2 = vmax.f32 %v2073_v62, 0.0 }
 0x37c   :  { %v2311_v63 = vmax.f32 %v4554_v57, 0.0  ;;  %v2076_v52 = vpop.f32.mrb[111].mxu1 }
 0x37d   :  { %v2309_v48 = vmax.f32 %v2076_v52, 0.0 }
 0x37e   :  { %v2391_v19 = vpack.c.bf16 %v2311_v63, %v2310_v53  ;;  %4252 = vmatpush3.bf16.msra.mxu0 %v2381_v31 }
 0x37f   :  { %v2390_v37 = vpack.c.bf16 %v2309_v48, %v2308_v2 }
 0x381   :  { %v4557_v32 = vpop.f32.mrb[112].mxu1  ;;  %4253 = vmatprep.subr.bf16.mxu0 %v2390_v37 }
 0x382   :  { %v2089_v1 = vpop.f32.mrb[113].mxu1  ;;  %4254 = vmatpush3.bf16.msra.mxu0 %v2382_v20  ;;  %v2314_v38 = vmax.f32 %v4557_v32, 0.0 }
 0x383   :  { %v4558_v0 = vpop.f32.mrb[114].mxu1  ;;  %4255 = vmatprep.subr.bf16.mxu0 %v2391_v19  ;;  %v2312_v9 = vmax.f32 %v2089_v1, 0.0 }
 0x384   :  { %v2315_v46 = vmax.f32 %v4558_v0, 0.0  ;;  %v2092_v49 = vpop.f32.mrb[115].mxu1 }
 0x385   :  { %v2313_v33 = vmax.f32 %v2092_v49, 0.0 }
 0x386   :  { %v2393_v44 = vpack.c.bf16 %v2315_v46, %v2314_v38  ;;  %4256 = vmatpush3.bf16.msra.mxu0 %v5608_v43 }
 0x387   :  { %v2392_v4 = vpack.c.bf16 %v2313_v33, %v2312_v9 }
 0x389   :  { %v4561_v3 = vpop.f32.mrb[116].mxu1  ;;  %2521 = vmatmul.mubr.bf16.vlgmr.msra.gmra.mrb[136].mxu0 %v5332_v34 }
 0x38a   :  { %v2105_v31 = vpop.f32.mrb[117].mxu1  ;;  %2560 = vmatprep.mubr.bf16.mxu0 %v5351_v51  ;;  %v2318_v6 = vmax.f32 %v4561_v3, 0.0 }
 0x38b   :  { %v4562_v5 = vpop.f32.mrb[118].mxu1  ;;  %v2316_v17 = vmax.f32 %v2105_v31, 0.0 }
 0x38c   :  { %v2319_v14 = vmax.f32 %v4562_v5, 0.0  ;;  %v2108_v15 = vpop.f32.mrb[119].mxu1 }
 0x38d   :  { %v2317_v20 = vmax.f32 %v2108_v15, 0.0 }
 0x38e   :  { %v2395_v56 = vpack.c.bf16 %v2319_v14, %v2318_v6 }
 0x38f   :  { %v2394_v16 = vpack.c.bf16 %v2317_v20, %v2316_v17 }
 0x391   :  { %v4565_v21 = vpop.f32.mrb[120].mxu1 }
 0x392   :  { %v2121_v45 = vpop.f32.mrb[121].mxu1  ;;  %v2322_v29 = vmax.f32 %v4565_v21, 0.0  ;;  %v4768_v21 = vld [vmem:[%s5852_s3 + $0x8] sm:$0xff]  }
 0x393   :  { %v4566_v18 = vpop.f32.mrb[122].mxu1  ;;  %v2320_v50 = vmax.f32 %v2121_v45, 0.0  ;;  %v2596_v45 = vpack.c.bf16 %v5562_v26, %v5562_v26 }
 0x394   :  { %v2323_v43 = vmax.f32 %v4566_v18, 0.0  ;;  %v2124_v59 = vpop.f32.mrb[123].mxu1 }
 0x395   :  { %v2321_v47 = vmax.f32 %v2124_v59, 0.0 }
 0x396   :  { %v2397_v34 = vpack.c.bf16 %v2323_v43, %v2322_v29 }
 0x397   :  { %v2396_v36 = vpack.c.bf16 %v2321_v47, %v2320_v50  ;;  %v5633_v50 = vld [vmem:[%s5857_s8] sm:$0xff]  }
 0x398   :  { %4618 = vmatpush3.bf16.msra.mxu1 %v5633_v50 }
 0x399   :  { %v4569_v39 = vpop.f32.mrb[124].mxu1  ;;  %4619 = vmatprep.subr.bf16.mxu1 %v4882_v58 }
 0x39a   :  { %v2137_v51 = vpop.f32.mrb[125].mxu1  ;;  %v2326_v28 = vmax.f32 %v4569_v39, 0.0 }
 0x39b   :  { %v4570_v27 = vpop.f32.mrb[126].mxu1  ;;  %v2324_v10 = vmax.f32 %v2137_v51, 0.0  ;;  %v5640_v51 = vld [vmem:[%s5857_s8 + $0x8] sm:$0xff]   ;;  %s4869_s8 = scalar_lea.hbm %s5865_s16, 16 }
 0x39c   :  { %v2327_v41 = vmax.f32 %v4570_v27, 0.0  ;;  %v2140_v30 = vpop.f32.mrb[127].mxu1  ;;  %4620 = vmatpush3.bf16.msra.mxu1 %v5640_v51  ;;  %p4870_p0 = scmp.ne.s32.totalorder %s5865_s16, %s4869_s8  ;;  %p4873_p1 = scmp.lt.u32.totalorder %s4869_s8, %s5865_s16 }
 0x39d   :  { %v2325_v12 = vmax.f32 %v2140_v30, 0.0  ;;  %4633 = vmatprep.subr.bf16.mxu1 %v4882_v58 }
 0x39e   :  { %v2399_v23 = vpack.c.bf16 %v2327_v41, %v2326_v28  ;;  %v5647_v28 = vld [vmem:[%s5855_s6] sm:$0xff]   ;;  %v5654_v41 = vld [vmem:[%s5855_s6 + $0x8] sm:$0xff]   ;;  %p4875_p2 = pnand %p4873_p1, %p4870_p0 }
 0x39f   :  { %v2398_v8 = vpack.c.bf16 %v2325_v12, %v2324_v10 }
 0x3a1   :  { %v4573_v13 = vpop.f32.mrb[128].mxu1 }
 0x3a2   :  { %v2153_v35 = vpop.f32.mrb[129].mxu1  ;;  %v2330_v25 = vmax.f32 %v4573_v13, 0.0 }
 0x3a3   :  { %v4574_v11 = vpop.f32.mrb[130].mxu1  ;;  %v2328_v24 = vmax.f32 %v2153_v35, 0.0 }
 0x3a4   :  { %v2331_v22 = vmax.f32 %v4574_v11, 0.0  ;;  %v2156_v40 = vpop.f32.mrb[131].mxu1 }
 0x3a5   :  { %v2329_v42 = vmax.f32 %v2156_v40, 0.0 }
 0x3a6   :  { %v2401_v54 = vpack.c.bf16 %v2331_v22, %v2330_v25 }
 0x3a7   :  { %v2400_v55 = vpack.c.bf16 %v2329_v42, %v2328_v24 }
 0x3a9   :  { %v4577_v60 = vpop.f32.mrb[132].mxu1  ;;  %4263 = vmatprep.subr.bf16.mxu0 %v2400_v55 }
 0x3aa   :  { %v2169_v61 = vpop.f32.mrb[133].mxu1  ;;  %4264 = vmatpush3.bf16.msra.mxu0 %v2392_v4  ;;  %v2334_v57 = vmax.f32 %v4577_v60, 0.0 }
 0x3ab   :  { %v4578_v62 = vpop.f32.mrb[134].mxu1  ;;  %4265 = vmatprep.subr.bf16.mxu0 %v2401_v54  ;;  %v2332_v52 = vmax.f32 %v2169_v61, 0.0 }
 0x3ac   :  { %v2335_v53 = vmax.f32 %v4578_v62, 0.0  ;;  %v2172_v63 = vpop.f32.mrb[135].mxu1 }
 0x3ad   :  { %v2333_v2 = vmax.f32 %v2172_v63, 0.0  ;;  %v3081_v63 = vrot.slane %v2596_v45, 1 }
 0x3ae   :  { %v2403_v48 = vpack.c.bf16 %v2335_v53, %v2334_v57  ;;  %4266 = vmatpush3.bf16.msra.mxu0 %v2393_v44 }
 0x3af   :  { %v2402_v19 = vpack.c.bf16 %v2333_v2, %v2332_v52 }
 0x3b1   :  { %v4581_v37 = vpop.f32.mrb[136].mxu1  ;;  %4267 = vmatprep.subr.bf16.mxu0 %v2402_v19 }
 0x3b2   :  { %v2185_v32 = vpop.f32.mrb[137].mxu1  ;;  %4268 = vmatpush3.bf16.msra.mxu0 %v2394_v16  ;;  %v2338_v0 = vmax.f32 %v4581_v37, 0.0 }
 0x3b3   :  { %v4582_v1 = vpop.f32.mrb[138].mxu1  ;;  %4269 = vmatprep.subr.bf16.mxu0 %v2403_v48  ;;  %v2336_v49 = vmax.f32 %v2185_v32, 0.0 }
 0x3b4   :  { %v2339_v38 = vmax.f32 %v4582_v1, 0.0  ;;  %v2188_v46 = vpop.f32.mrb[139].mxu1 }
 0x3b5   :  { %v2337_v9 = vmax.f32 %v2188_v46, 0.0 }
 0x3b6   :  { %v2405_v33 = vpack.c.bf16 %v2339_v38, %v2338_v0  ;;  %4270 = vmatpush3.bf16.msra.mxu0 %v2395_v56  ;;  %v4767_v56 = vld [vmem:[%s5852_s3] sm:$0xff]  }
 0x3b7   :  { %v2404_v4 = vpack.c.bf16 %v2337_v9, %v2336_v49 }
 0x3b9   :  { %v4585_v3 = vpop.f32.mrb[140].mxu1  ;;  %4271 = vmatprep.subr.bf16.mxu0 %v2404_v4 }
 0x3ba   :  { %v2201_v31 = vpop.f32.mrb[141].mxu1  ;;  %4272 = vmatpush3.bf16.msra.mxu0 %v2396_v36  ;;  %v2342_v5 = vmax.f32 %v4585_v3, 0.0 }
 0x3bb   :  { %v4586_v44 = vpop.f32.mrb[142].mxu1  ;;  %4273 = vmatprep.subr.bf16.mxu0 %v2405_v33  ;;  %v2340_v15 = vmax.f32 %v2201_v31, 0.0 }
 0x3bc   :  { %v2343_v6 = vmax.f32 %v4586_v44, 0.0  ;;  %v2204_v14 = vpop.f32.mrb[143].mxu1 }
 0x3bd   :  { %v2341_v17 = vmax.f32 %v2204_v14, 0.0  ;;  %v5679_v14 = vld [vmem:[%s5854_s5] ss:$0 sm:$0xff] }
 0x3be   :  { %v2407_v20 = vpack.c.bf16 %v2343_v6, %v2342_v5  ;;  %4274 = vmatpush3.bf16.msra.mxu0 %v2397_v34  ;;  %v5674_v5 = vld [vmem:[%s5853_s4] ss:$0 sm:$0xff] }
 0x3bf   :  { %v2406_v16 = vpack.c.bf16 %v2341_v17, %v2340_v15 }
 0x3c1   :  { %4275 = vmatprep.subr.bf16.mxu0 %v2406_v16 }
 0x3c2   :  { %4276 = vmatpush3.bf16.msra.mxu0 %v2398_v8 }
 0x3c3   :  { %4277 = vmatprep.subr.bf16.mxu0 %v2407_v20 }
 0x3c6   :  { %4278 = vmatpush3.bf16.msra.mxu0 %v2399_v23 }
 0x3c7   :  { %4587 = vmatprep.subr.bf16.mxu0 %v4882_v58 }
 0x3c9   :  { %2561 = vmatmul.mubr.bf16.vlgmr.msra.gmra.mrb[140].mxu0 %v5346_v7 }
 0x3ca   :  { %4588 = vmatpush3.bf16.msra.mxu0 %v4767_v56  ;;  %4591 = vmatprep.mubr.msk.bf16.mxu0 %vm4883_vm1, %v4882_v58 }
 0x3cb   :  { %4589 = vmatprep.subr.bf16.mxu0 %v4882_v58 }
 0x3ce   :  { %4590 = vmatpush3.bf16.msra.mxu0 %v4768_v21 }
 0x3cf   :  { %4595 = vmatprep.subr.bf16.mxu0 %v4882_v58 }
 0x3d1   :  { %4592 = vmatmul.mubr.msk.bf16.vlgmr.msra.gmra.mrb[144].mxu0 %vm521_vm0, %v2596_v45 }
 0x3d2   :  { %4599 = vmatprep.mubr.msk.bf16.mxu0 %vm4883_vm1, %v4882_v58  ;;  %4596 = vmatpush3.bf16.msra.mxu0 %v5647_v28 }
 0x3d3   :  { %4597 = vmatprep.subr.bf16.mxu0 %v4882_v58 }
 0x3d6   :  { %4598 = vmatpush3.bf16.msra.mxu0 %v5654_v41 }
 0x3d7   :  { %4603 = vmatprep.subr.bf16.mxu0 %v4882_v58 }
 0x3dc   :  { %v4213_v7 = vpop.f32.mrb[128].mxu0 }
 0x3dd   :  { %v4214_v18 = vpop.f32.mrb[129].mxu0 }
 0x3de   :  { %v4215_v29 = vadd.f32 %v4214_v18, %v4213_v7  ;;  %v4216_v43 = vpop.f32.mrb[130].mxu0 }
 0x3df   :  { %v4217_v59 = vpop.f32.mrb[131].mxu0 }
 0x41c   :  { %v4235_v47 = vpop.f32.mrb[132].mxu0 }
 0x41d   :  { %v4236_v34 = vpop.f32.mrb[133].mxu0 }
 0x41e   :  { %v4237_v26 = vadd.f32 %v4236_v34, %v4235_v47  ;;  %v4238_v36 = vpop.f32.mrb[134].mxu0 }
 0x41f   :  { %v4239_v39 = vpop.f32.mrb[135].mxu0 }
 0x420   :  { %v2483_v27 = vadd.f32 %v4237_v26, %v4215_v29 }
 0x45c   :  { %v4257_v30 = vpop.f32.mrb[136].mxu0 }
 0x45d   :  { %v4258_v10 = vpop.f32.mrb[137].mxu0 }
 0x45e   :  { %v4259_v12 = vadd.f32 %v4258_v10, %v4257_v30  ;;  %v4260_v23 = vpop.f32.mrb[138].mxu0 }
 0x45f   :  { %v4261_v8 = vpop.f32.mrb[139].mxu0 }
 0x460   :  { %v2523_v13 = vadd.f32 %v4259_v12, %v2483_v27 }
 0x49c   :  { %v4279_v35 = vpop.f32.mrb[140].mxu0 }
 0x49d   :  { %v4280_v11 = vpop.f32.mrb[141].mxu0 }
 0x49e   :  { %v4281_v25 = vadd.f32 %v4280_v11, %v4279_v35  ;;  %v4282_v22 = vpop.f32.mrb[142].mxu0 }
 0x49f   :  { %v4283_v40 = vpop.f32.mrb[143].mxu0 }
 0x4a0   :  { %v2563_v24 = vadd.f32 %v4281_v25, %v2523_v13 }
 0x4a2   :  { %v5658_v42 = vpack.c.bf16 %v2563_v24, %v2563_v24 }
 0x4a4   :  { %v2646_v54 = vpop.f32.mrb[144].mxu0  ;;  %4622 = vmatmul.mubr.msk.bf16.vlgmr.msra.gmra.mrb[144].mxu1 %vm521_vm0, %v5658_v42 }
 0x4a5   :  { %v2653_v55 = vsel %vm2652_vm2, %v2646_v54, 0.0  ;;  %v4593_v60 = vpop.f32.mrb[145].mxu0  ;;  %4634 = vmatpush3.bf16.msra.mxu1 %v4767_v56  ;;  %4637 = vmatprep.mubr.msk.bf16.mxu1 %vm4883_vm1, %v4882_v58  ;;  %v4773_v56 = vld [vmem:[%s5861_s12] sm:$0xff]  }
 0x4a6   :  { %v2654_v61 = vrot.slane %v2653_v55, 4  ;;  %v2649_v62 = vpop.f32.mrb[146].mxu0  ;;  %4635 = vmatprep.subr.bf16.mxu1 %v4882_v58 }
 0x4a7   :  { %v4594_v57 = vpop.f32.mrb[147].mxu0 }
 0x4a8   :  { %v2655_v53 = vadd.f32 %v2654_v61, %v2653_v55 }
 0x4a9   :  { %4636 = vmatpush3.bf16.msra.mxu1 %v4768_v21 }
 0x4aa   :  { %v2656_v52 = vrot.slane %v2655_v53, 2  ;;  %4649 = vmatprep.subr.bf16.mxu1 %v4882_v58 }
 0x4ac   :  { %v2657_v2 = vadd.f32 %v2656_v52, %v2655_v53  ;;  %4638 = vmatmul.mubr.msk.bf16.vlgmr.msra.gmra.mrb[148].mxu1 %vm521_vm0, %v3081_v63 }
 0x4ad   :  { %4651 = vmatprep.mubr.msk.bf16.mxu1 %vm4883_vm1, %v4882_v58  ;;  %4650 = vmatpush3.bf16.msra.mxu1 %v4773_v56 }
 0x4ae   :  { %v2658_v48 = vrot.slane %v2657_v2, 1  ;;  %4663 = vmatprep.subr.bf16.mxu1 %v4882_v58 }
 0x4b0   :  { %v2659_v19 = vadd.f32 %v2658_v48, %v2657_v2  ;;  %v5699_v2 = vld [vmem:[%s5864_s15] sm:$0xff]   ;;  %v5706_v48 = vld [vmem:[%s5864_s15 + $0x8] sm:$0xff]  }
 0x4b2   :  { %v2661_v37 = vmul.f32 0.5, %v2659_v19 }
 0x4b4   :  { %v2662_v32 = vsub.f32 %v2646_v54, %v2661_v37 }
 0x4b6   :  { %v2663_v1 = vmul.f32 %v2662_v32, %v2662_v32 }
 0x4b8   :  { %v2664_v0 = vsel %vm2652_vm2, %v2663_v1, 0.0 }
 0x4b9   :  { %v2665_v38 = vrot.slane %v2664_v0, 4 }
 0x4bb   :  { %v2666_v46 = vadd.f32 %v2665_v38, %v2664_v0 }
 0x4bd   :  { %v2667_v49 = vrot.slane %v2666_v46, 2 }
 0x4bf   :  { %v2668_v9 = vadd.f32 %v2667_v49, %v2666_v46 }
 0x4c1   :  { %v2669_v33 = vrot.slane %v2668_v9, 1 }
 0x4c3   :  { %v2670_v4 = vadd.f32 %v2669_v33, %v2668_v9 }
 0x4c5   :  { %v2671_v3 = vmul.f32 0.5, %v2670_v4 }
 0x4c7   :  { %v2672_v31 = vadd.f32 1e-05, %v2671_v3 }
 0x4c9   :  { %4778 = vrsqrt.f32 %v2672_v31 }
 0x4d3   :  { %v4779_v44 = vpop.eup %4778 }
 0x4d4   :  { %v2674_v6 = vmul.f32 %v4779_v44, %v2662_v32 }
 0x4d6   :  { %v2681_v15 = vmul.f32 %v5674_v5, %v2674_v6 }
 0x4d8   :  { %v2688_v17 = vadd.f32 %v5679_v14, %v2681_v15 }
 0x4da   :  { %v2689_v20 = vmax.f32 %v2688_v17, 0.0 }
 0x4dc   :  { %v2690_v16 = vpack.c.bf16 %v2689_v20, %v2689_v20 }
 0x4de   :  { %4600 = vmatmul.mubr.msk.bf16.vlgmr.msra.gmra.mrb[148].mxu0 %vm521_vm0, %v2690_v16 }
 0x4df   :  { %4605 = vmatprep.mubr.msk.bf16.mxu0 %vm4883_vm1, %v4882_v58  ;;  %4604 = vmatpush3.bf16.msra.mxu0 %v4773_v56 }
 0x4e0   :  { %4609 = vmatprep.subr.bf16.mxu0 %v4882_v58 }
 0x577   :  { %v2961_v21 = vpop.f32.mrb[144].mxu1 }
 0x578   :  { %v4623_v45 = vpop.f32.mrb[145].mxu1  ;;  %v2967_v19 = vsel %vm2652_vm2, %v2961_v21, 0.0 }
 0x579   :  { %v2964_v7 = vpop.f32.mrb[146].mxu1  ;;  %v2968_v37 = vrot.slane %v2967_v19, 4 }
 0x57a   :  { %v4624_v18 = vpop.f32.mrb[147].mxu1 }
 0x57b   :  { %v2969_v32 = vadd.f32 %v2968_v37, %v2967_v19 }
 0x57d   :  { %v2970_v0 = vrot.slane %v2969_v32, 2 }
 0x57f   :  { %v3119_v29 = vpop.f32.mrb[148].mxu1  ;;  %v2971_v46 = vadd.f32 %v2970_v0, %v2969_v32 }
 0x580   :  { %v4639_v43 = vpop.f32.mrb[149].mxu1  ;;  %v3125_v1 = vsel %vm2652_vm2, %v3119_v29, 0.0 }
 0x581   :  { %v3122_v59 = vpop.f32.mrb[150].mxu1  ;;  %v3126_v38 = vrot.slane %v3125_v1, 4  ;;  %v2972_v9 = vrot.slane %v2971_v46, 1 }
 0x582   :  { %v4640_v47 = vpop.f32.mrb[151].mxu1 }
 0x583   :  { %v3127_v49 = vadd.f32 %v3126_v38, %v3125_v1  ;;  %v2973_v4 = vadd.f32 %v2972_v9, %v2971_v46 }
 0x585   :  { %v3128_v33 = vrot.slane %v3127_v49, 2  ;;  %v2974_v31 = vmul.f32 0.5, %v2973_v4 }
 0x587   :  { %v3129_v3 = vadd.f32 %v3128_v33, %v3127_v49  ;;  %v2975_v6 = vsub.f32 %v2961_v21, %v2974_v31  ;;  %v5719_v33 = vld [vmem:[%s5862_s13] ss:$0 sm:$0xff] }
 0x588   :  { %v5724_v31 = vld [vmem:[%s5858_s9] ss:$0 sm:$0xff] }
 0x589   :  { %v3130_v44 = vrot.slane %v3129_v3, 1  ;;  %v2976_v17 = vmul.f32 %v2975_v6, %v2975_v6 }
 0x58b   :  { %v3131_v15 = vadd.f32 %v3130_v44, %v3129_v3  ;;  %v2977_v16 = vsel %vm2652_vm2, %v2976_v17, 0.0  ;;  %v5729_v44 = vld [vmem:[%s5863_s14] ss:$0 sm:$0xff] }
 0x58c   :  { %v2978_v47 = vrot.slane %v2977_v16, 4 }
 0x58d   :  { %v3132_v20 = vmul.f32 0.5, %v3131_v15 }
 0x58f   :  { %v3133_v56 = vsub.f32 %v3119_v29, %v3132_v20 }
 0x5b1   :  { %v2740_v34 = vpop.f32.mrb[148].mxu0 }
 0x5b2   :  { %v2747_v26 = vsel %vm2746_vm3, %v2740_v34, 0.0  ;;  %v4601_v36 = vpop.f32.mrb[149].mxu0 }
 0x5b3   :  { %v2748_v39 = vrot.slane %v2747_v26, 4  ;;  %v2743_v27 = vpop.f32.mrb[150].mxu0 }
 0x5b4   :  { %v4602_v30 = vpop.f32.mrb[151].mxu0  ;;  %v2979_v27 = vadd.f32 %v2978_v47, %v2977_v16  ;;  %v5750_v47 = vld [vmem:[%s5860_s11 + $0x8] sm:$0xff]  }
 0x5b5   :  { %v2749_v10 = vadd.f32 %v2748_v39, %v2747_v26  ;;  %v3134_v26 = vmul.f32 %v3133_v56, %v3133_v56 }
 0x5b7   :  { %v2750_v12 = vrot.slane %v2749_v10, 2  ;;  %v3135_v21 = vsel %vm2652_vm2, %v3134_v26, 0.0 }
 0x5b9   :  { %v2751_v23 = vadd.f32 %v2750_v12, %v2749_v10  ;;  %v2980_v12 = vrot.slane %v2979_v27, 2 }
 0x5bb   :  { %v2752_v8 = vrot.slane %v2751_v23, 1 }
 0x5bd   :  { %v2753_v13 = vadd.f32 %v2752_v8, %v2751_v23  ;;  %v3136_v23 = vrot.slane %v3135_v21, 4 }
 0x5bf   :  { %v2754_v35 = vmul.f32 0.5, %v2753_v13  ;;  %v2981_v13 = vadd.f32 %v2980_v12, %v2979_v27 }
 0x5c1   :  { %v2755_v11 = vsub.f32 %v2740_v34, %v2754_v35  ;;  %v3137_v35 = vadd.f32 %v3136_v23, %v3135_v21 }
 0x5c3   :  { %v2756_v25 = vmul.f32 %v2755_v11, %v2755_v11 }
 0x5c5   :  { %v2757_v22 = vsel %vm2746_vm3, %v2756_v25, 0.0 }
 0x5c6   :  { %v2758_v40 = vrot.slane %v2757_v22, 4 }
 0x5c8   :  { %v2759_v24 = vadd.f32 %v2758_v40, %v2757_v22  ;;  %v2982_v22 = vrot.slane %v2981_v13, 1  ;;  %v3138_v40 = vrot.slane %v3137_v35, 2 }
 0x5ca   :  { %v2760_v54 = vrot.slane %v2759_v24, 2 }
 0x5cc   :  { %v2761_v55 = vadd.f32 %v2760_v54, %v2759_v24 }
 0x5ce   :  { %v2762_v60 = vrot.slane %v2761_v55, 1 }
 0x5d0   :  { %v2763_v61 = vadd.f32 %v2762_v60, %v2761_v55  ;;  %v2983_v55 = vadd.f32 %v2982_v22, %v2981_v13  ;;  %v3139_v60 = vadd.f32 %v3138_v40, %v3137_v35 }
 0x5d2   :  { %v2764_v62 = vmul.f32 0.5, %v2763_v61 }
 0x5d4   :  { %v2765_v57 = vadd.f32 1e-05, %v2764_v62 }
 0x5d6   :  { %4780 = vrsqrt.f32 %v2765_v57  ;;  %v2984_v57 = vmul.f32 0.5, %v2983_v55 }
 0x5d8   :  { %v2985_v19 = vadd.f32 1e-05, %v2984_v57 }
 0x5da   :  { %4782 = vrsqrt.f32 %v2985_v19 }
 0x5e0   :  { %v4781_v53 = vpop.eup %4780 }
 0x5e1   :  { %v2767_v63 = vmul.f32 %v4781_v53, %v2755_v11  ;;  %v3140_v53 = vrot.slane %v3139_v60, 1 }
 0x5e3   :  { %v2768_v52 = vpack.c.bf16 %v2767_v63, %v2767_v63  ;;  %v3141_v37 = vadd.f32 %v3140_v53, %v3139_v60 }
 0x5e4   :  { %v4783_v49 = vpop.eup %4782 }
 0x5e5   :  { %4606 = vmatmul.mubr.msk.bf16.vlgmr.msra.gmra.mrb[152].mxu0 %vm2775_vm4, %v2768_v52  ;;  %v3142_v0 = vmul.f32 0.5, %v3141_v37  ;;  %v2987_v4 = vmul.f32 %v4783_v49, %v2975_v6  ;;  %v5737_v6 = vld [vmem:[%s5859_s10] ss:$0 sm:$0xff] }
 0x5e6   :  { %4613 = vmatprep.mubr.msk.bf16.mxu0 %vm4883_vm1, %v4882_v58  ;;  %4610 = vmatpush3.bf16.msra.mxu0 %v5699_v2 }
 0x5e7   :  { %4611 = vmatprep.subr.bf16.mxu0 %v4882_v58  ;;  %v3143_v46 = vadd.f32 1e-05, %v3142_v0  ;;  %v2994_v17 = vmul.f32 %v5724_v31, %v2987_v4 }
 0x5ea   :  { %4612 = vmatpush3.bf16.msra.mxu0 %v5706_v48 }
 0x5eb   :  { %4625 = vmatprep.subr.bf16.mxu0 %v4882_v58 }
 0x6b8   :  { %v2813_v45 = vpop.f32.mrb[152].mxu0 }
 0x6b9   :  { %v2819_v7 = vsel %vm2652_vm2, %v2813_v45, 0.0  ;;  %v4607_v18 = vpop.f32.mrb[153].mxu0 }
 0x6ba   :  { %v2820_v43 = vrot.slane %v2819_v7, 4  ;;  %v2816_v59 = vpop.f32.mrb[154].mxu0  ;;  %v3001_v18 = vadd.f32 %v5737_v6, %v2994_v17 }
 0x6bb   :  { %v4608_v34 = vpop.f32.mrb[155].mxu0 }
 0x6bc   :  { %v2821_v36 = vadd.f32 %v2820_v43, %v2819_v7  ;;  %v5742_v7 = vld [vmem:[%s5860_s11] sm:$0xff]   ;;  %v3002_v34 = vmax.f32 %v3001_v18, 0.0 }
 0x6be   :  { %v2822_v39 = vrot.slane %v2821_v36, 2 }
 0x6c0   :  { %v2823_v30 = vadd.f32 %v2822_v39, %v2821_v36 }
 0x6c2   :  { %v2824_v10 = vrot.slane %v2823_v30, 1 }
 0x6c4   :  { %v2825_v8 = vadd.f32 %v2824_v10, %v2823_v30 }
 0x6c6   :  { %v2826_v29 = vmul.f32 0.5, %v2825_v8 }
 0x6c8   :  { %v2827_v11 = vsub.f32 %v2813_v45, %v2826_v29 }
 0x6ca   :  { %v2828_v25 = vmul.f32 %v2827_v11, %v2827_v11 }
 0x6cc   :  { %v2829_v24 = vsel %vm2652_vm2, %v2828_v25, 0.0 }
 0x6cd   :  { %v2830_v54 = vrot.slane %v2829_v24, 4 }
 0x6cf   :  { %v2831_v61 = vadd.f32 %v2830_v54, %v2829_v24 }
 0x6d1   :  { %v2832_v62 = vrot.slane %v2831_v61, 2 }
 0x6d3   :  { %v2833_v63 = vadd.f32 %v2832_v62, %v2831_v61 }
 0x6d5   :  { %v2834_v52 = vrot.slane %v2833_v63, 1 }
 0x6d7   :  { %v2835_v32 = vadd.f32 %v2834_v52, %v2833_v63 }
 0x6d9   :  { %v2836_v1 = vmul.f32 0.5, %v2835_v32 }
 0x6db   :  { %v2837_v38 = vadd.f32 1e-05, %v2836_v1 }
 0x6dd   :  { %4784 = vrsqrt.f32 %v2837_v38 }
 0x6de   :  { %4786 = vrsqrt.f32 %v3143_v46 }
 0x6e7   :  { %v4785_v9 = vpop.eup %4784 }
 0x6e8   :  { %v2839_v3 = vmul.f32 %v4785_v9, %v2827_v11  ;;  %v4787_v16 = vpop.eup %4786 }
 0x6e9   :  { %v3145_v43 = vmul.f32 %v4787_v16, %v3133_v56  ;;  %v3003_v56 = vpack.c.bf16 %v3002_v34, %v3002_v34 }
 0x6ea   :  { %v2846_v15 = vmul.f32 %v5719_v33, %v2839_v3 }
 0x6eb   :  { %v3146_v26 = vmul.f32 %v5674_v5, %v3145_v43 }
 0x6ec   :  { %v2853_v20 = vadd.f32 %v5729_v44, %v2846_v15 }
 0x6ed   :  { %v3147_v36 = vadd.f32 %v5679_v14, %v3146_v26 }
 0x6ee   :  { %v2854_v45 = vmax.f32 %v2853_v20, 0.0 }
 0x6ef   :  { %v3148_v39 = vmax.f32 %v3147_v36, 0.0 }
 0x6f0   :  { %v2855_v59 = vpack.c.bf16 %v2854_v45, %v2854_v45 }
 0x6f1   :  { %v3149_v5 = vpack.c.bf16 %v3148_v39, %v3148_v39 }
 0x6f2   :  { %4614 = vmatmul.mubr.msk.bf16.vlgmr.msra.gmra.mrb[156].mxu0 %vm521_vm0, %v2855_v59 }
 0x6f3   :  { %4626 = vmatpush3.bf16.msra.mxu0 %v5742_v7  ;;  %4629 = vmatprep.mubr.msk.bf16.mxu0 %vm4883_vm1, %v4882_v58 }
 0x6f4   :  { %4627 = vmatprep.subr.bf16.mxu0 %v4882_v58 }
 0x6f7   :  { %4628 = vmatpush3.bf16.msra.mxu0 %v5750_v47 }
 0x6f8   :  { %4641 = vmatprep.subr.bf16.mxu0 %v4882_v58 }
 0x6fa   :  { %4630 = vmatmul.mubr.msk.bf16.vlgmr.msra.gmra.mrb[160].mxu0 %vm521_vm0, %v3003_v56 }
 0x6fb   :  { %4642 = vmatpush3.bf16.msra.mxu0 %v5647_v28  ;;  %4645 = vmatprep.mubr.msk.bf16.mxu0 %vm4883_vm1, %v4882_v58 }
 0x6fc   :  { %4643 = vmatprep.subr.bf16.mxu0 %v4882_v58 }
 0x6ff   :  { %4644 = vmatpush3.bf16.msra.mxu0 %v5654_v41 }
 0x700   :  { %4655 = vmatprep.subr.bf16.mxu0 %v4882_v58 }
 0x702   :  { %4646 = vmatmul.mubr.msk.bf16.vlgmr.msra.gmra.mrb[164].mxu0 %vm521_vm0, %v3149_v5 }
 0x703   :  { %4656 = vmatpush3.bf16.msra.mxu0 %v5699_v2  ;;  %4659 = vmatprep.mubr.msk.bf16.mxu0 %vm4883_vm1, %v4882_v58 }
 0x704   :  { %4657 = vmatprep.subr.bf16.mxu0 %v4882_v58 }
 0x707   :  { %4658 = vmatpush3.bf16.msra.mxu0 %v5706_v48 }
 0x708   :  { %4671 = vmatprep.subr.bf16.mxu0 %v4882_v58 }
 0x7c5   :  { %v5773_v28 = vpop.f32.mrb[156].mxu0 }
 0x7c6   :  { %v4615_v14 = vpop.f32.mrb[157].mxu0 }
 0x7c7   :  { %v2908_v41 = vpop.f32.mrb[158].mxu0 }
 0x7c8   :  { %v4616_v27 = vpop.f32.mrb[159].mxu0 }
 0x7cd   :  { %v3053_v21 = vpop.f32.mrb[160].mxu0 }
 0x7ce   :  { %v3059_v30 = vsel %vm2746_vm3, %v3053_v21, 0.0  ;;  %v4631_v10 = vpop.f32.mrb[161].mxu0 }
 0x7cf   :  { %v3060_v12 = vrot.slane %v3059_v30, 4  ;;  %v3056_v2 = vpop.f32.mrb[162].mxu0 }
 0x7d0   :  { %v4632_v23 = vpop.f32.mrb[163].mxu0 }
 0x7d1   :  { %v3061_v8 = vadd.f32 %v3060_v12, %v3059_v30 }
 0x7d3   :  { %v3062_v29 = vrot.slane %v3061_v8, 2 }
 0x7d5   :  { %v3063_v13 = vadd.f32 %v3062_v29, %v3061_v8  ;;  %v3187_v35 = vpop.f32.mrb[164].mxu0 }
 0x7d6   :  { %v3193_v48 = vsel %vm2746_vm3, %v3187_v35, 0.0  ;;  %v4647_v11 = vpop.f32.mrb[165].mxu0 }
 0x7d7   :  { %v3064_v25 = vrot.slane %v3063_v13, 1  ;;  %v3194_v22 = vrot.slane %v3193_v48, 4  ;;  %v3190_v40 = vpop.f32.mrb[166].mxu0 }
 0x7d8   :  { %v4648_v24 = vpop.f32.mrb[167].mxu0 }
 0x7d9   :  { %v3065_v54 = vadd.f32 %v3064_v25, %v3063_v13  ;;  %v3195_v55 = vadd.f32 %v3194_v22, %v3193_v48 }
 0x7db   :  { %v3066_v60 = vmul.f32 0.5, %v3065_v54  ;;  %v3196_v61 = vrot.slane %v3195_v55, 2 }
 0x7dd   :  { %v3067_v62 = vsub.f32 %v3053_v21, %v3066_v60  ;;  %v3197_v57 = vadd.f32 %v3196_v61, %v3195_v55  ;;  %v3327_v21 = vrot.slane %v5658_v42, 1 }
 0x7df   :  { %v3068_v53 = vmul.f32 %v3067_v62, %v3067_v62  ;;  %v3198_v63 = vrot.slane %v3197_v57, 1 }
 0x7e1   :  { %v3069_v52 = vsel %vm2746_vm3, %v3068_v53, 0.0  ;;  %v3199_v19 = vadd.f32 %v3198_v63, %v3197_v57 }
 0x7e2   :  { %v3070_v37 = vrot.slane %v3069_v52, 4 }
 0x7e3   :  { %v3200_v32 = vmul.f32 0.5, %v3199_v19 }
 0x7e4   :  { %v3071_v1 = vadd.f32 %v3070_v37, %v3069_v52 }
 0x7e5   :  { %v3201_v0 = vsub.f32 %v3187_v35, %v3200_v32 }
 0x7e6   :  { %v3072_v38 = vrot.slane %v3071_v1, 2 }
 0x7e7   :  { %v3202_v46 = vmul.f32 %v3201_v0, %v3201_v0 }
 0x7e8   :  { %v3073_v49 = vadd.f32 %v3072_v38, %v3071_v1 }
 0x7e9   :  { %v3203_v9 = vsel %vm2746_vm3, %v3202_v46, 0.0 }
 0x7ea   :  { %v3074_v4 = vrot.slane %v3073_v49, 1  ;;  %v3204_v3 = vrot.slane %v3203_v9, 4 }
 0x7ec   :  { %v3075_v15 = vadd.f32 %v3074_v4, %v3073_v49  ;;  %v3205_v17 = vadd.f32 %v3204_v3, %v3203_v9 }
 0x7ee   :  { %v3076_v20 = vmul.f32 0.5, %v3075_v15  ;;  %v3206_v16 = vrot.slane %v3205_v17, 2 }
 0x7f0   :  { %v3077_v45 = vadd.f32 1e-05, %v3076_v20  ;;  %v3207_v18 = vadd.f32 %v3206_v16, %v3205_v17 }
 0x7f2   :  { %4788 = vrsqrt.f32 %v3077_v45  ;;  %v3208_v43 = vrot.slane %v3207_v18, 1 }
 0x7f4   :  { %v3209_v59 = vadd.f32 %v3208_v43, %v3207_v18 }
 0x7f6   :  { %v3210_v34 = vmul.f32 0.5, %v3209_v59 }
 0x7f8   :  { %v3211_v26 = vadd.f32 1e-05, %v3210_v34 }
 0x7fa   :  { %4790 = vrsqrt.f32 %v3211_v26 }
 0x7fc   :  { %v4789_v56 = vpop.eup %4788 }
 0x7fd   :  { %v5779_v36 = vmul.f32 %v4789_v56, %v3067_v62 }
 0x7ff   :  { %v3611_v39 = vmul.f32 %v5779_v36, %v5779_v36 }
 0x801   :  { %v3612_v5 = vsel %vm2746_vm3, %v3611_v39, 0.0 }
 0x802   :  { %3613 = vadd.xlane.f32.xlu1 %v3612_v5 }
 0x804   :  { %v4791_v14 = vpop.eup %4790 }
 0x805   :  { %v3213_v41 = vmul.f32 %v4791_v14, %v3201_v0 }
 0x807   :  { %v3214_v27 = vpack.c.bf16 %v3213_v41, %v3213_v41 }
 0x809   :  { %4652 = vmatmul.mubr.msk.bf16.vlgmr.msra.gmra.mrb[152].mxu1 %vm2775_vm4, %v3214_v27 }
 0x80a   :  { %4664 = vmatpush3.bf16.msra.mxu1 %v5633_v50  ;;  %4667 = vmatprep.mubr.msk.bf16.mxu1 %vm4883_vm1, %v4882_v58 }
 0x80b   :  { %4665 = vmatprep.subr.bf16.mxu1 %v4882_v58 }
 0x80e   :  { %4666 = vmatpush3.bf16.msra.mxu1 %v5640_v51 }
 0x80f   :  { %4679 = vmatprep.subr.mxu1 %v4882_v58 }
 0x811   :  { %4668 = vmatmul.mubr.msk.bf16.vlgmr.msra.gmra.mrb[156].mxu1 %vm521_vm0, %v3327_v21 }
 0x812   :  { %4681 = vmatprep.mubr.msk.f32.mxu1 %vm4883_vm1, %v4882_v58 }
 0x8dc   :  { %v3252_v30 = vpop.f32.mrb[152].mxu1 }
 0x8dd   :  { %v3258_v10 = vsel %vm2652_vm2, %v3252_v30, 0.0  ;;  %v4653_v50 = vpop.f32.mrb[153].mxu1 }
 0x8de   :  { %v3259_v12 = vrot.slane %v3258_v10, 4  ;;  %v3255_v2 = vpop.f32.mrb[154].mxu1 }
 0x8df   :  { %v4654_v23 = vpop.f32.mrb[155].mxu1 }
 0x8e0   :  { %v3260_v8 = vadd.f32 %v3259_v12, %v3258_v10 }
 0x8e2   :  { %v3261_v29 = vrot.slane %v3260_v8, 2 }
 0x8e4   :  { %v3262_v13 = vadd.f32 %v3261_v29, %v3260_v8  ;;  %v3365_v51 = vpop.f32.mrb[156].mxu1 }
 0x8e5   :  { %v3371_v42 = vsel %vm2652_vm2, %v3365_v51, 0.0  ;;  %v4669_v35 = vpop.f32.mrb[157].mxu1 }
 0x8e6   :  { %v3263_v48 = vrot.slane %v3262_v13, 1  ;;  %v3372_v11 = vrot.slane %v3371_v42, 4  ;;  %v3368_v25 = vpop.f32.mrb[158].mxu1 }
 0x8e7   :  { %v4670_v22 = vpop.f32.mrb[159].mxu1 }
 0x8e8   :  { %v3264_v40 = vadd.f32 %v3263_v48, %v3262_v13  ;;  %v3373_v24 = vadd.f32 %v3372_v11, %v3371_v42 }
 0x8ea   :  { %v3265_v54 = vmul.f32 0.5, %v3264_v40  ;;  %v3374_v55 = vrot.slane %v3373_v24, 2 }
 0x8ec   :  { %v3266_v60 = vsub.f32 %v3252_v30, %v3265_v54  ;;  %v3375_v61 = vadd.f32 %v3374_v55, %v3373_v24 }
 0x8ee   :  { %v3267_v62 = vmul.f32 %v3266_v60, %v3266_v60  ;;  %v3376_v57 = vrot.slane %v3375_v61, 1 }
 0x8f0   :  { %v3268_v53 = vsel %vm2652_vm2, %v3267_v62, 0.0  ;;  %v3377_v63 = vadd.f32 %v3376_v57, %v3375_v61 }
 0x8f1   :  { %v3269_v52 = vrot.slane %v3268_v53, 4 }
 0x8f2   :  { %v3378_v19 = vmul.f32 0.5, %v3377_v63 }
 0x8f3   :  { %v3270_v37 = vadd.f32 %v3269_v52, %v3268_v53 }
 0x8f4   :  { %v3379_v32 = vsub.f32 %v3365_v51, %v3378_v19 }
 0x8f5   :  { %v3271_v1 = vrot.slane %v3270_v37, 2 }
 0x8f6   :  { %v3380_v0 = vmul.f32 %v3379_v32, %v3379_v32 }
 0x8f7   :  { %v3272_v38 = vadd.f32 %v3271_v1, %v3270_v37 }
 0x8f8   :  { %v3381_v46 = vsel %vm2652_vm2, %v3380_v0, 0.0 }
 0x8f9   :  { %v3273_v49 = vrot.slane %v3272_v38, 1  ;;  %v3382_v9 = vrot.slane %v3381_v46, 4 }
 0x8fb   :  { %v3274_v4 = vadd.f32 %v3273_v49, %v3272_v38  ;;  %v3383_v3 = vadd.f32 %v3382_v9, %v3381_v46  ;;  %v3614_v38 = vpop.xlane.xlu1 %3613 }
 0x8fc   :  { %vm3617_vm5 = vcmp.eq.f32.partialorder %v3614_v38, inf  ;;  %vm3619_vm6 = vcmp.eq.f32.partialorder %v3614_v38, 0.0 }
 0x8fd   :  { %v3275_v15 = vmul.f32 0.5, %v3274_v4  ;;  %v3384_v17 = vrot.slane %v3383_v3, 2 }
 0x8ff   :  { %v3276_v20 = vadd.f32 1e-05, %v3275_v15  ;;  %v3385_v16 = vadd.f32 %v3384_v17, %v3383_v3 }
 0x901   :  { %4792 = vrsqrt.f32 %v3276_v20  ;;  %v3386_v45 = vrot.slane %v3385_v16, 1 }
 0x903   :  { %v3387_v18 = vadd.f32 %v3386_v45, %v3385_v16  ;;  %v3620_v45 = vand.u32 2147483648, %v3614_v38 }
 0x905   :  { %v3388_v43 = vmul.f32 0.5, %v3387_v18 }
 0x907   :  { %v3389_v59 = vadd.f32 1e-05, %v3388_v43 }
 0x909   :  { %4794 = vrsqrt.f32 %v3389_v59 }
 0x90b   :  { %v4793_v34 = vpop.eup %4792 }
 0x90c   :  { %v3278_v26 = vmul.f32 %v4793_v34, %v3266_v60 }
 0x90e   :  { %v3279_v56 = vmul.f32 %v5719_v33, %v3278_v26 }
 0x910   :  { %v3280_v39 = vadd.f32 %v5729_v44, %v3279_v56 }
 0x912   :  { %v3281_v5 = vmax.f32 %v3280_v39, 0.0 }
 0x913   :  { %v4795_v14 = vpop.eup %4794 }
 0x914   :  { %v3282_v41 = vpack.c.bf16 %v3281_v5, %v3281_v5  ;;  %v3391_v27 = vmul.f32 %v4795_v14, %v3379_v32  ;;  %v3460_v32 = vmul.f32 %v5773_v28, %v5773_v28 }
 0x916   :  { %v3392_v21 = vmul.f32 %v5724_v31, %v3391_v27  ;;  %4660 = vmatmul.mubr.msk.bf16.vlgmr.msra.gmra.mrb[168].mxu0 %vm521_vm0, %v3282_v41  ;;  %v3461_v0 = vsel %vm2746_vm3, %v3460_v32, 0.0 }
 0x917   :  { %4672 = vmatpush3.bf16.msra.mxu0 %v5742_v7  ;;  %4675 = vmatprep.mubr.msk.bf16.mxu0 %vm4883_vm1, %v4882_v58 }
 0x918   :  { %v3393_v30 = vadd.f32 %v5737_v6, %v3392_v21  ;;  %4673 = vmatprep.subr.bf16.mxu0 %v4882_v58 }
 0x91a   :  { %v3394_v33 = vmax.f32 %v3393_v30, 0.0 }
 0x91b   :  { %4674 = vmatpush3.bf16.msra.mxu0 %v5750_v47 }
 0x91c   :  { %v3395_v44 = vpack.c.bf16 %v3394_v33, %v3394_v33 }
 0x91e   :  { %4676 = vmatmul.mubr.msk.bf16.vlgmr.msra.gmra.mrb[172].mxu0 %vm521_vm0, %v3395_v44 }
 0x9e9   :  { %v5810_v10 = vpop.f32.mrb[168].mxu0 }
 0x9ea   :  { %v3597_v31 = vmul.f32 %v5810_v10, %v5810_v10  ;;  %v4661_v50 = vpop.f32.mrb[169].mxu0 }
 0x9eb   :  { %v3323_v7 = vpop.f32.mrb[170].mxu0 }
 0x9ec   :  { %v4662_v12 = vpop.f32.mrb[171].mxu0  ;;  %v3598_v2 = vsel %vm2746_vm3, %v3597_v31, 0.0 }
 0x9ed   :  { %3599 = vadd.xlane.f32.xlu1 %v3598_v2 }
 0x9f1   :  { %v3433_v6 = vpop.f32.mrb[172].mxu0 }
 0x9f2   :  { %v3439_v23 = vsel %vm2746_vm3, %v3433_v6, 0.0  ;;  %v4677_v8 = vpop.f32.mrb[173].mxu0 }
 0x9f3   :  { %v3440_v29 = vrot.slane %v3439_v23, 4  ;;  %v3436_v47 = vpop.f32.mrb[174].mxu0 }
 0x9f4   :  { %v4678_v13 = vpop.f32.mrb[175].mxu0 }
 0x9f5   :  { %v3441_v51 = vadd.f32 %v3440_v29, %v3439_v23 }
 0x9f7   :  { %v3442_v42 = vrot.slane %v3441_v51, 2 }
 0x9f9   :  { %v3443_v35 = vadd.f32 %v3442_v42, %v3441_v51 }
 0x9fb   :  { %v3444_v48 = vrot.slane %v3443_v35, 1 }
 0x9fd   :  { %v3445_v11 = vadd.f32 %v3444_v48, %v3443_v35 }
 0x9ff   :  { %v3446_v25 = vmul.f32 0.5, %v3445_v11 }
 0xa01   :  { %v3447_v22 = vsub.f32 %v3433_v6, %v3446_v25 }
 0xa03   :  { %v3448_v40 = vmul.f32 %v3447_v22, %v3447_v22 }
 0xa05   :  { %v3449_v24 = vsel %vm2746_vm3, %v3448_v40, 0.0 }
 0xa06   :  { %v3450_v54 = vrot.slane %v3449_v24, 4 }
 0xa08   :  { %v3451_v55 = vadd.f32 %v3450_v54, %v3449_v24 }
 0xa0a   :  { %v3452_v60 = vrot.slane %v3451_v55, 2 }
 0xa0c   :  { %v3453_v61 = vadd.f32 %v3452_v60, %v3451_v55 }
 0xa0e   :  { %v3454_v62 = vrot.slane %v3453_v61, 1 }
 0xa10   :  { %v3455_v57 = vadd.f32 %v3454_v62, %v3453_v61 }
 0xa12   :  { %v3456_v53 = vmul.f32 0.5, %v3455_v57 }
 0xa14   :  { %v3457_v63 = vadd.f32 1e-05, %v3456_v53 }
 0xa16   :  { %4796 = vrsqrt.f32 %v3457_v63 }
 0xa17   :  { %4798 = vrsqrt.f32 %v3614_v38 }
 0xa20   :  { %v4797_v52 = vpop.eup %4796 }
 0xa21   :  { %v3459_v19 = vmul.f32 %v4797_v52, %v3447_v22  ;;  %v4799_v9 = vpop.eup %4798 }
 0xa22   :  { %v3616_v15 = vmul.f32 %v4799_v9, %v3614_v38 }
 0xa23   :  { %v3474_v37 = vmul.f32 %v3459_v19, %v3459_v19 }
 0xa24   :  { %v3618_v16 = vsel %vm3617_vm5, %v3614_v38, %v3616_v15 }
 0xa25   :  { %v3475_v1 = vsel %vm2746_vm3, %v3474_v37, 0.0  ;;  %v3621_v59 = vsel %vm3619_vm6, %v3620_v45, %v3618_v16 }
 0xa26   :  { %3476 = vadd.xlane.f32.xlu0 %v3475_v1  ;;  %v3622_v27 = vmax.f32 %v3621_v59, 1e-12 }
 0xa2a   :  { %3462 = vadd.xlane.f32.xlu0 %v3461_v0 }
 0xa7a   :  { %v3600_v46 = vpop.xlane.xlu1 %3599 }
 0xa7b   :  { %4800 = vrsqrt.f32 %v3600_v46  ;;  %vm3603_vm7 = vcmp.eq.f32.partialorder %v3600_v46, inf  ;;  %v3606_v39 = vand.u32 2147483648, %v3600_v46  ;;  %vm3605_vm10 = vcmp.eq.f32.partialorder %v3600_v46, 0.0 }
 0xa85   :  { %v4801_v3 = vpop.eup %4800 }
 0xa86   :  { %v3602_v17 = vmul.f32 %v4801_v3, %v3600_v46 }
 0xa88   :  { %v3604_v34 = vsel %vm3603_vm7, %v3600_v46, %v3602_v17 }
 0xa89   :  { %v3607_v21 = vsel %vm3605_vm10, %v3606_v39, %v3604_v34 }
 0xa8a   :  { %v3608_v31 = vmax.f32 %v3607_v21, 1e-12 }
 0xab3   :  { %v3477_v49 = vpop.xlane.xlu0 %3476 }
 0xab4   :  { %4802 = vrsqrt.f32 %v3477_v49  ;;  %vm3480_vm8 = vcmp.eq.f32.partialorder %v3477_v49, inf  ;;  %v3483_v43 = vand.u32 2147483648, %v3477_v49  ;;  %vm3482_vm9 = vcmp.eq.f32.partialorder %v3477_v49, 0.0 }
 0xab7   :  { %v3463_v4 = vpop.xlane.xlu0 %3462 }
 0xab8   :  { %4804 = vrsqrt.f32 %v3463_v4  ;;  %vm3466_vm11 = vcmp.eq.f32.partialorder %v3463_v4, inf  ;;  %v3469_v30 = vand.u32 2147483648, %v3463_v4  ;;  %vm3468_vm12 = vcmp.eq.f32.partialorder %v3463_v4, 0.0 }
 0xabe   :  { %v4803_v20 = vpop.eup %4802 }
 0xabf   :  { %v3479_v18 = vmul.f32 %v4803_v20, %v3477_v49 }
 0xac1   :  { %v3481_v26 = vsel %vm3480_vm8, %v3477_v49, %v3479_v18 }
 0xac2   :  { %v4805_v56 = vpop.eup %4804  ;;  %v3484_v5 = vsel %vm3482_vm9, %v3483_v43, %v3481_v26 }
 0xac3   :  { %v3485_v14 = vmax.f32 %v3484_v5, 1e-12  ;;  %v3465_v41 = vmul.f32 %v4805_v56, %v3463_v4 }
 0xac5   :  { %4806 = vrcp.f32 %v3485_v14  ;;  %v3467_v33 = vsel %vm3466_vm11, %v3463_v4, %v3465_v41 }
 0xac6   :  { %v3470_v44 = vsel %vm3468_vm12, %v3469_v30, %v3467_v33  ;;  %4808 = vrcp.f32 %v3622_v27 }
 0xac7   :  { %v3471_v50 = vmax.f32 %v3470_v44, 1e-12 }
 0xac9   :  { %4810 = vrcp.f32 %v3471_v50 }
 0xaca   :  { %4812 = vrcp.f32 %v3608_v31 }
 0xacf   :  { %v4807_v7 = vpop.eup %4806 }
 0xad0   :  { %v3487_v12 = vmul.f32 %v4807_v7, %v3459_v19  ;;  %v4809_v2 = vpop.eup %4808 }
 0xad1   :  { %v3624_v29 = vmul.f32 %v4809_v2, %v5779_v36 }
 0xad2   :  { %4680 = vmatpush3.xpose.msk.msra.mxu1 %vm2775_vm4, %v3487_v12 }
 0xad3   :  { %v4811_v6 = vpop.eup %4810  ;;  %4684 = vmatprep.subr.mxu1 %v4882_v58 }
 0xad4   :  { %v3473_v23 = vmul.f32 %v4811_v6, %v5773_v28  ;;  %v4813_v8 = vpop.eup %4812 }
 0xad5   :  { %v3610_v13 = vmul.f32 %v4813_v8, %v5810_v10 }
 0xad6   :  { %4682 = vmatmul.mubr.msk.f32.vlgmr.msra.gmra.mrb[160].mxu1 %vm2775_vm4, %v3473_v23  ;;  %v3577_v47 = vmul.f32 %v3487_v12, %v3473_v23 }
 0xad7   :  { %4685 = vmatpush3.xpose.msk.msra.mxu1 %vm2775_vm4, %v3624_v29  ;;  %4686 = vmatprep.mubr.msk.f32.mxu1 %vm4883_vm1, %v4882_v58  ;;  %v3713_v62 = vmul.f32 %v3624_v29, %v3610_v13 }
 0xad8   :  { %v3578_v60 = vsel %vm2746_vm3, %v3577_v47, 0.0 }
 0xad9   :  { %v3714_v57 = vsel %vm2746_vm3, %v3713_v62, 0.0 }
 0xada   :  { %4687 = vmatmul.mubr.msk.f32.vlgmr.msra.gmra.mrb[162].mxu1 %vm2775_vm4, %v3610_v13 }
 0xba9   :  { %v3560_v51 = vpop.f32.mrb[160].mxu1 }
 0xbaa   :  { %v4683_v42 = vpop.f32.mrb[161].mxu1  ;;  %v3565_v28 = vsel %vm3564_vm13, %v3560_v51, -inf }
 0xbab   :  { %3566 = vmax.xlane.f32.xlu0 %v3565_v28 }
 0xbad   :  { %v3697_v35 = vpop.f32.mrb[162].mxu1 }
 0xbae   :  { %v4688_v36 = vpop.f32.mrb[163].mxu1  ;;  %v3701_v48 = vsel %vm3564_vm13, %v3697_v35, -inf }
 0xbaf   :  { %3702 = vmax.xlane.f32.xlu1 %v3701_v48 }
 0xc38   :  { %v3567_v11 = vpop.xlane.xlu0 %3566 }
 0xc39   :  { %v3568_v25 = vsub.f32 %v3560_v51, %v3567_v11 }
 0xc3b   :  { %v3569_v22 = vmul.f32 1.442695, %v3568_v25 }
 0xc3c   :  { %v3703_v40 = vpop.xlane.xlu1 %3702 }
 0xc3d   :  { %4814 = vpow2.f32 %v3569_v22  ;;  %v3704_v58 = vsub.f32 %v3697_v35, %v3703_v40 }
 0xc3f   :  { %v3705_v10 = vmul.f32 1.442695, %v3704_v58 }
 0xc41   :  { %4816 = vpow2.f32 %v3705_v10 }
 0xc47   :  { %v4815_v24 = vpop.eup %4814 }
 0xc48   :  { %v3571_v54 = vsel %vm3564_vm13, %v4815_v24, 0.0 }
 0xc49   :  { %3572 = vadd.xlane.f32.xlu0 %v3571_v54 }
 0xc4b   :  { %v4817_v55 = vpop.eup %4816 }
 0xc4c   :  { %v3707_v61 = vsel %vm3564_vm13, %v4817_v55, 0.0 }
 0xc4d   :  { %3579 = vadd.xlane.f32.xlu0 %v3578_v60  ;;  %3708 = vadd.xlane.f32.xlu1 %v3707_v61 }
 0xc51   :  { %3715 = vadd.xlane.f32.xlu1 %v3714_v57 }
 0xcd6   :  { %v3573_v53 = vpop.xlane.xlu0 %3572 }
 0xcd7   :  { %4818 = vlog2.f32 %v3573_v53 }
 0xcda   :  { %v3709_v63 = vpop.xlane.xlu1 %3708  ;;  %v3580_v1 = vpop.xlane.xlu0 %3579 }
 0xcdb   :  { %4820 = vlog2.f32 %v3709_v63 }
 0xcde   :  { %v3716_v9 = vpop.xlane.xlu1 %3715 }
 0xce1   :  { %v4819_v52 = vpop.eup %4818 }
 0xce2   :  { %v3575_v19 = vmul.f32 0.6931472, %v4819_v52 }
 0xce4   :  { %v3576_v37 = vadd.f32 %v3575_v19, %v3567_v11 }
 0xce5   :  { %v4821_v32 = vpop.eup %4820 }
 0xce6   :  { %v3581_v0 = vsub.f32 %v3576_v37, %v3580_v1  ;;  %v3711_v38 = vmul.f32 0.6931472, %v4821_v32 }
 0xce8   :  { %v3712_v46 = vadd.f32 %v3711_v38, %v3703_v40  ;;  %v3583_v49 = vsel %vm3582_vm14, %v3581_v0, 0.0 }
 0xce9   :  { %3584 = vadd.xlane.f32.xlu0 %v3583_v49 }
 0xcea   :  { %v3717_v4 = vsub.f32 %v3712_v46, %v3716_v9 }
 0xcec   :  { %v3718_v3 = vsel %vm3582_vm14, %v3717_v4, 0.0 }
 0xced   :  { %3719 = vadd.xlane.f32.xlu1 %v3718_v3 }
 0xd76   :  { %v3585_v15 = vpop.xlane.xlu0 %3584 }
 0xd77   :  { %v3586_v17 = vrot.slane %v3585_v15, 4 }
 0xd79   :  { %v3587_v20 = vadd.f32 %v3586_v17, %v3585_v15 }
 0xd7a   :  { %v3720_v16 = vpop.xlane.xlu1 %3719 }
 0xd7b   :  { %v3588_v45 = vrot.slane %v3587_v20, 2  ;;  %v3721_v18 = vrot.slane %v3720_v16, 4 }
 0xd7d   :  { %v3722_v43 = vadd.f32 %v3721_v18, %v3720_v16  ;;  %v3589_v59 = vadd.f32 %v3588_v45, %v3587_v20 }
 0xd7f   :  { %v3723_v34 = vrot.slane %v3722_v43, 2  ;;  %v3590_v26 = vrot.slane %v3589_v59, 1 }
 0xd81   :  { %v3724_v56 = vadd.f32 %v3723_v34, %v3722_v43  ;;  %v3591_v39 = vadd.f32 %v3590_v26, %v3589_v59 }
 0xd83   :  { %4689 = vpush %v3591_v39  ;;  %v3725_v5 = vrot.slane %v3724_v56, 1 }
 0xd85   :  { %v3726_v14 = vadd.f32 %v3725_v5, %v3724_v56 }
 0xd87   :  { %4691 = vpush %v3726_v14 }
 0xdb4   :  { %s4690_s10 = spop %4689 }
 0xdb5   :  { %s3595_s11 = smul.f32 0.5, %s4690_s10 }
 0xdb7   :  { %s3596_s23 = smul.f32 2.0, %s3595_s11 }
 0xdb8   :  { %s4692_s1 = spop %4691 }
 0xdb9   :  { %s3730_s22 = smul.f32 0.5, %s4692_s1 }
 0xdbb   :  { %s3731_s24 = smul.f32 2.0, %s3730_s22 }
 0xdbd   :  { %s3732_s25 = sadd.f32 %s3731_s24, %s3596_s23 }
 0xdbf   :  { %3734 = sst [smem:[#allocation2]] %s3732_s25 }
 0xdc0   :  { %4878 = shalt.err (!%p4875_p2)
}
 0xdc1   :  { %s4884_s5 = smov [#allocation2]  }
 0xdc2   :  { %3742 = dma.smem_to_hbm %s4884_s5, 16, %s5865_s16, [#allocation3]  }
 0xdc3   :  { %4879 = dma.done.wait [#allocation3], 16  }
 0xdc4   :  { %4880 = vsyncadd [#allocation3], 4294967280 }
 0xdc5   :  { %3746 = sfence }
 0xdc6   :  { %3747 = vsyncpa [#allocation3], 1 }

</bundles_post_ra>
